<compile_context>
chip_gen: v6e
topology: v6e:2x2x1
jax: 0.10.0
libtpu: 0.0.40
codegen_flags: <defaults>
</compile_context>

<pallas_src>
import functools

import jax
import jax.numpy as jnp
from jax import lax
from jax.experimental import pallas as pl
from jax.experimental.pallas import tpu as pltpu

EPS = 1e-5


def _hardswish(x):
    # PyTorch nn.Hardswish: x * relu6(x + 3) / 6
    return x * jnp.clip(x + 3.0, 0.0, 6.0) * (1.0 / 6.0)


def _hardsigmoid(x):
    # PyTorch nn.Hardsigmoid: clip(x/6 + 0.5, 0, 1)
    return jnp.clip(x * (1.0 / 6.0) + 0.5, 0.0, 1.0)


# ----------------------- fused DW + SE + PW kernel -----------------------
def _fused_kernel(*refs, kh, kw, oh, ow, stride, pad, use_se):
    if use_se:
        (x_ref, w_dw_ref, dw_scale_ref, dw_shift_ref,
         se_w1_ref, se_b1_ref, se_w2_ref, se_b2_ref,
         w_pw_ref, pw_scale_ref, pw_shift_ref, o_ref) = refs
    else:
        (x_ref, w_dw_ref, dw_scale_ref, dw_shift_ref,
         w_pw_ref, pw_scale_ref, pw_shift_ref, o_ref) = refs

    x = x_ref[0]                                        # (H, W, C)
    if x.dtype != jnp.float32:
        x = x.astype(jnp.float32)
    h, w, c = x.shape

    # ---- H halo only: leading-dim zero concat over aligned (W, C) tiles ----
    if pad > 0:
        zrow = jnp.zeros((pad, w, c), jnp.float32)
        xh = jnp.concatenate([zrow, x, zrow], axis=0)   # (H+2p, W, C)
    else:
        xh = x
    hp = h + 2 * pad

    # ---- hoisted W-shifted slabs: kw relayouts total, not kh*kw per tap ----
    slabs = []
    for j in range(kw):
        dwj = j - pad
        if dwj == 0:
            s = xh
        elif dwj > 0:
            s = jnp.concatenate(
                [xh[:, dwj:, :], jnp.zeros((hp, dwj, c), jnp.float32)], axis=1)
        else:
            s = jnp.concatenate(
                [jnp.zeros((hp, -dwj, c), jnp.float32), xh[:, :w + dwj, :]],
                axis=1)
        if stride > 1:
            # Hoisted strided W subsample: once per slab instead of per tap.
            s = lax.slice(s, (0, 0, 0), (hp, (ow - 1) * stride + 1, c),
                          (1, stride, 1))
        slabs.append(s)

    # ---- depthwise conv: taps are free leading-dim H slices of the slabs ----
    w_dw = w_dw_ref[...].astype(jnp.float32)            # (kh*kw, C), read once
    acc = None
    for i in range(kh):
        for j in range(kw):
            sl = slabs[j]
            if stride == 1:
                patch = sl[i:i + oh]                    # free vreg-row select
            else:
                patch = lax.slice(
                    sl, (i, 0, 0),
                    (i + (oh - 1) * stride + 1, ow, c), (stride, 1, 1))
            term = patch * w_dw[i * kw + j, :]
            acc = term if acc is None else acc + term

    y = acc * dw_scale_ref[0, :] + dw_shift_ref[0, :]    # folded BatchNorm
    y = _hardswish(y)                                    # (oh, ow, C), in VMEM

    # ---- SE epilogue (fused: no HBM round trip of y) ----
    if use_se:
        pooled = jnp.mean(y, axis=(0, 1)).reshape(1, c)  # AdaptiveAvgPool2d(1)
        hid = jnp.dot(pooled, se_w1_ref[...],
                      preferred_element_type=jnp.float32) + se_b1_ref[...]
        hid = jnp.maximum(hid, 0.0)                      # ReLU
        sse = jnp.dot(hid, se_w2_ref[...],
                      preferred_element_type=jnp.float32) + se_b2_ref[...]
        sse = _hardsigmoid(sse)
        y = y * sse.reshape(1, 1, c)

    # ---- pointwise 1x1 conv: bf16 MXU operands, f32 accumulation ----
    y2 = y.reshape(oh * ow, c).astype(jnp.bfloat16)
    z = jnp.dot(y2, w_pw_ref[...], preferred_element_type=jnp.float32)
    z = z * pw_scale_ref[0, :] + pw_shift_ref[0, :]      # folded BatchNorm
    z = _hardswish(z)
    # Store transposed: (Cout, OH*OW) slab is lane-dense (OH*OW is a large
    # multiple of 128 here) and is already NCHW order -> no wrapper transpose.
    o_ref[0] = z.T.astype(o_ref.dtype)


def depthwise_separable_forward(x_nchw, params, *, stride, dw_size, use_se):
    # Input-side layout change only; in an NHWC-native model this transpose
    # disappears. The output side needs no transpose (kernel emits NCHW).
    x = jnp.transpose(x_nchw, (0, 2, 3, 1))              # NCHW -> NHWC
    n, h, w, c = x.shape
    pad = (dw_size - 1) // 2
    oh = (h + 2 * pad - dw_size) // stride + 1
    ow = (w + 2 * pad - dw_size) // stride + 1
    cout = params["w_pw"].shape[-1]

    kern = functools.partial(_fused_kernel, kh=dw_size, kw=dw_size, oh=oh,
                             ow=ow, stride=stride, pad=pad, use_se=use_se)

    rep = lambda b: (0, 0)                               # replicated weights
    in_specs = [
        pl.BlockSpec((1, h, w, c), lambda b: (b, 0, 0, 0)),
        pl.BlockSpec((dw_size * dw_size, c), rep),
        pl.BlockSpec((1, c), rep),
        pl.BlockSpec((1, c), rep),
    ]
    args = [x, params["w_dw"], params["dw_scale"], params["dw_shift"]]
    if use_se:
        cr = params["se_w1"].shape[-1]
        in_specs += [
            pl.BlockSpec((c, cr), rep),
            pl.BlockSpec((1, cr), rep),
            pl.BlockSpec((cr, c), rep),
            pl.BlockSpec((1, c), rep),
        ]
        args += [params["se_w1"], params["se_b1"],
                 params["se_w2"], params["se_b2"]]
    in_specs += [
        pl.BlockSpec((c, cout), rep),
        pl.BlockSpec((1, cout), rep),
        pl.BlockSpec((1, cout), rep),
    ]
    # Ship the pointwise weight in bf16 (halves its HBM/VMEM traffic).
    args += [params["w_pw"].astype(jnp.bfloat16),
             params["pw_scale"], params["pw_shift"]]

    # Explicit scoped-VMEM budget sized to the per-step working set
    # (v5e default scoped limit is 16 MiB; v7x has only 64 MiB physical).
    f32 = 4
    plane = (h + 2 * pad) * w * c * f32
    est = (2 * h * w * c * f32                 # double-buffered input block
           + (dw_size + 1) * plane             # H-padded x + shifted slabs
           + oh * ow * c * (f32 + 2)           # y (f32) + y (bf16)
           + 4 * oh * ow * cout * f32          # z, z.T, double-buffered output
           + (dw_size * dw_size * c + 4 * c + c * cout + 4 * cout) * f32)
    vmem_limit = int(min(max(2 * est, 16 * 2 ** 20), 64 * 2 ** 20))

    out = pl.pallas_call(
        kern,
        out_shape=jax.ShapeDtypeStruct((n, cout, oh * ow), x.dtype),
        grid=(n,),
        in_specs=in_specs,
        out_specs=pl.BlockSpec((1, cout, oh * ow), lambda b: (b, 0, 0)),
        compiler_params=pltpu.CompilerParams(
            dimension_semantics=("parallel",),
            vmem_limit_bytes=vmem_limit),
    )(*args)
    # TODO(synk): for ImageNet-scale planes add an H-tile grid axis (two-pass
    # SE: pooled stats then scale) so the working set fits v7x's 64 MiB VMEM
    # and both v7x TensorCores stay busy for N=1.
    # TODO(synk): for C<=32 a (H, W*C) lane-packed depthwise layout would lift
    # VPU lane utilization from ~25% to ~100%; kept in NHWC here to keep the
    # pointwise-matmul input reshape-free.
    return out.reshape(n, cout, oh, ow)                  # free reshape -> NCHW


# --------------------------- pure-JAX reference ---------------------------
def reference_forward(x_nchw, params, *, stride, dw_size, use_se):
    x = jnp.transpose(x_nchw, (0, 2, 3, 1))
    c = x.shape[-1]
    pad = (dw_size - 1) // 2
    w_hwio = params["w_dw"].reshape(dw_size, dw_size, 1, c)
    y = lax.conv_general_dilated(
        x, w_hwio, window_strides=(stride, stride),
        padding=[(pad, pad), (pad, pad)],
        dimension_numbers=("NHWC", "HWIO", "NHWC"),
        feature_group_count=c)
    y = y * params["dw_scale"][0] + params["dw_shift"][0]
    y = _hardswish(y)
    if use_se:
        pooled = jnp.mean(y, axis=(1, 2))                               # (N, C)
        h = jnp.maximum(pooled @ params["se_w1"] + params["se_b1"][0], 0.0)
        s = _hardsigmoid(h @ params["se_w2"] + params["se_b2"][0])
        y = y * s[:, None, None, :]
    # Mirror the kernel's bf16 MXU operands (f32 accumulation) so the
    # comparison tolerance stays meaningful.
    z = jnp.einsum("nhwc,cf->nhwf", y.astype(jnp.bfloat16),
                   params["w_pw"].astype(jnp.bfloat16),
                   preferred_element_type=jnp.float32)
    z = z * params["pw_scale"][0] + params["pw_shift"][0]
    z = _hardswish(z)
    return jnp.transpose(z, (0, 3, 1, 2))


# ------------------------------ param setup ------------------------------
def fold_bn(gamma, beta, mean, var):
    scale = gamma / jnp.sqrt(var + EPS)
    shift = beta - mean * scale
    return scale.reshape(1, -1), shift.reshape(1, -1)


def make_params(key, num_channels, num_filters, dw_size, use_se):
    keys = jax.random.split(key, 16)
    c, f = num_channels, num_filters
    cr = c // 4
    p = {}
    p["w_dw"] = 0.2 * jax.random.normal(keys[0], (dw_size * dw_size, c), jnp.float32)
    g = 0.5 + jax.random.uniform(keys[1], (c,), jnp.float32)
    b = 0.1 * jax.random.normal(keys[2], (c,), jnp.float32)
    m = 0.1 * jax.random.normal(keys[3], (c,), jnp.float32)
    v = 0.5 + jax.random.uniform(keys[4], (c,), jnp.float32)
    p["dw_scale"], p["dw_shift"] = fold_bn(g, b, m, v)
    if use_se:
        p["se_w1"] = 0.3 * jax.random.normal(keys[5], (c, cr), jnp.float32)
        p["se_b1"] = 0.1 * jax.random.normal(keys[6], (1, cr), jnp.float32)
        p["se_w2"] = 0.3 * jax.random.normal(keys[7], (cr, c), jnp.float32)
        p["se_b2"] = 0.1 * jax.random.normal(keys[8], (1, c), jnp.float32)
    p["w_pw"] = 0.2 * jax.random.normal(keys[9], (c, f), jnp.float32)
    g2 = 0.5 + jax.random.uniform(keys[10], (f,), jnp.float32)
    b2 = 0.1 * jax.random.normal(keys[11], (f,), jnp.float32)
    m2 = 0.1 * jax.random.normal(keys[12], (f,), jnp.float32)
    v2 = 0.5 + jax.random.uniform(keys[13], (f,), jnp.float32)
    p["pw_scale"], p["pw_shift"] = fold_bn(g2, b2, m2, v2)
    return p


if __name__ == "__main__":
    N, C, H, W = 2, 32, 16, 16        # num_channels=32
    F = 64                            # num_filters=64
    STRIDE, DW_SIZE, USE_SE = 1, 3, True

    key = jax.random.PRNGKey(0)
    kx, kp = jax.random.split(key)
    x = jax.random.normal(kx, (N, C, H, W), jnp.float32)

    # Tolerance is relaxed vs. an all-f32 check because the pointwise matmul
    # uses bf16 MXU operands (the reference mirrors this).
    ATOL = RTOL = 2e-2

    # Config 1: with SE (the interesting fused path).
    params = make_params(kp, C, F, DW_SIZE, USE_SE)
    out = depthwise_separable_forward(x, params, stride=STRIDE, dw_size=DW_SIZE,
                                      use_se=USE_SE)
    out = jax.block_until_ready(out)
    ref = reference_forward(x, params, stride=STRIDE, dw_size=DW_SIZE, use_se=USE_SE)
    assert out.shape == (N, F, H, W), out.shape
    assert jnp.allclose(out, ref, atol=ATOL, rtol=RTOL), \
        float(jnp.max(jnp.abs(out - ref)))

    # Config 2: without SE (exercises the second kernel signature).
    params2 = make_params(kp, C, F, DW_SIZE, False)
    out2 = depthwise_separable_forward(x, params2, stride=STRIDE, dw_size=DW_SIZE,
                                       use_se=False)
    out2 = jax.block_until_ready(out2)
    ref2 = reference_forward(x, params2, stride=STRIDE, dw_size=DW_SIZE, use_se=False)
    assert out2.shape == (N, F, H, W), out2.shape
    assert jnp.allclose(out2, ref2, atol=ATOL, rtol=RTOL), \
        float(jnp.max(jnp.abs(out2 - ref2)))

    print("KERNEL_OK")
</pallas_src>

<mosaic_0001>
module attributes {stable_mosaic.version = 11 : i64} {
  func.func @_fused_kernel(%arg0: i32, %arg1: memref<1x16x16x32xf32, #tpu.memory_space<vmem>>, %arg2: memref<9x32xf32, #tpu.memory_space<vmem>>, %arg3: memref<1x32xf32, #tpu.memory_space<vmem>>, %arg4: memref<1x32xf32, #tpu.memory_space<vmem>>, %arg5: memref<32x8xf32, #tpu.memory_space<vmem>>, %arg6: memref<1x8xf32, #tpu.memory_space<vmem>>, %arg7: memref<8x32xf32, #tpu.memory_space<vmem>>, %arg8: memref<1x32xf32, #tpu.memory_space<vmem>>, %arg9: memref<32x64xbf16, #tpu.memory_space<vmem>>, %arg10: memref<1x64xf32, #tpu.memory_space<vmem>>, %arg11: memref<1x64xf32, #tpu.memory_space<vmem>>, %arg12: memref<1x64x256xf32, #tpu.memory_space<vmem>>) attributes {dimension_semantics = [#tpu.dimension_semantics<parallel>], iteration_bounds = array<i64: 2>, scalar_prefetch = 0 : i64, scratch_operands = 0 : i64, tpu.core_type = #tpu.core_type<tc>, window_params = [{transform_indices = @transform_0, window_bounds = array<i64: 1, 16, 16, 32>}, {pipeline_mode = #tpu.pipeline_mode<synchronous>, transform_indices = @transform_1, window_bounds = array<i64: 9, 32>}, {pipeline_mode = #tpu.pipeline_mode<synchronous>, transform_indices = @transform_2, window_bounds = array<i64: 1, 32>}, {pipeline_mode = #tpu.pipeline_mode<synchronous>, transform_indices = @transform_3, window_bounds = array<i64: 1, 32>}, {pipeline_mode = #tpu.pipeline_mode<synchronous>, transform_indices = @transform_4, window_bounds = array<i64: 32, 8>}, {pipeline_mode = #tpu.pipeline_mode<synchronous>, transform_indices = @transform_5, window_bounds = array<i64: 1, 8>}, {pipeline_mode = #tpu.pipeline_mode<synchronous>, transform_indices = @transform_6, window_bounds = array<i64: 8, 32>}, {pipeline_mode = #tpu.pipeline_mode<synchronous>, transform_indices = @transform_7, window_bounds = array<i64: 1, 32>}, {pipeline_mode = #tpu.pipeline_mode<synchronous>, transform_indices = @transform_8, window_bounds = array<i64: 32, 64>}, {pipeline_mode = #tpu.pipeline_mode<synchronous>, transform_indices = @transform_9, window_bounds = array<i64: 1, 64>}, {pipeline_mode = #tpu.pipeline_mode<synchronous>, transform_indices = @transform_10, window_bounds = array<i64: 1, 64>}, {transform_indices = @transform_11, window_bounds = array<i64: 1, 64, 256>}]} {
    %c0 = arith.constant 0 : index
    %c0_0 = arith.constant 0 : index
    %c0_1 = arith.constant 0 : index
    %c0_2 = arith.constant 0 : index
    %0 = vector.load %arg1[%c0, %c0_0, %c0_1, %c0_2] : memref<1x16x16x32xf32, #tpu.memory_space<vmem>>, vector<1x16x16x32xf32>
    %1 = vector.shape_cast %0 : vector<1x16x16x32xf32> to vector<16x16x32xf32>
    %cst = arith.constant 0.000000e+00 : f32
    %2 = vector.broadcast %cst : f32 to vector<1x16x32xf32>
    %3 = tpu.concatenate %2, %1, %2 in 0 : vector<1x16x32xf32>, vector<16x16x32xf32>, vector<1x16x32xf32> -> vector<18x16x32xf32>
    %cst_3 = arith.constant 0.000000e+00 : f32
    %4 = vector.broadcast %cst_3 : f32 to vector<18x1x32xf32>
    %5 = vector.extract_strided_slice %3 {offsets = [0, 0, 0], sizes = [18, 15, 32], strides = [1, 1, 1]} : vector<18x16x32xf32> to vector<18x15x32xf32>
    %6 = tpu.concatenate %4, %5 in 1 : vector<18x1x32xf32>, vector<18x15x32xf32> -> vector<18x16x32xf32>
    %7 = vector.extract_strided_slice %3 {offsets = [0, 1, 0], sizes = [18, 15, 32], strides = [1, 1, 1]} : vector<18x16x32xf32> to vector<18x15x32xf32>
    %cst_4 = arith.constant 0.000000e+00 : f32
    %8 = vector.broadcast %cst_4 : f32 to vector<18x1x32xf32>
    %9 = tpu.concatenate %7, %8 in 1 : vector<18x15x32xf32>, vector<18x1x32xf32> -> vector<18x16x32xf32>
    %c0_5 = arith.constant 0 : index
    %c0_6 = arith.constant 0 : index
    %10 = vector.load %arg2[%c0_5, %c0_6] : memref<9x32xf32, #tpu.memory_space<vmem>>, vector<9x32xf32>
    %11 = vector.extract_strided_slice %6 {offsets = [0, 0, 0], sizes = [16, 16, 32], strides = [1, 1, 1]} : vector<18x16x32xf32> to vector<16x16x32xf32>
    %12 = vector.extract_strided_slice %10 {offsets = [0, 0], sizes = [1, 32], strides = [1, 1]} : vector<9x32xf32> to vector<1x32xf32>
    %13 = vector.shape_cast %12 : vector<1x32xf32> to vector<32xf32>
    %14 = vector.shape_cast %13 : vector<32xf32> to vector<1x1x32xf32>
    %15 = vector.broadcast %14 : vector<1x1x32xf32> to vector<16x16x32xf32>
    %16 = arith.mulf %11, %15 : vector<16x16x32xf32>
    %17 = vector.extract_strided_slice %3 {offsets = [0, 0, 0], sizes = [16, 16, 32], strides = [1, 1, 1]} : vector<18x16x32xf32> to vector<16x16x32xf32>
    %18 = vector.extract_strided_slice %10 {offsets = [1, 0], sizes = [1, 32], strides = [1, 1]} : vector<9x32xf32> to vector<1x32xf32>
    %19 = vector.shape_cast %18 : vector<1x32xf32> to vector<32xf32>
    %20 = vector.shape_cast %19 : vector<32xf32> to vector<1x1x32xf32>
    %21 = vector.broadcast %20 : vector<1x1x32xf32> to vector<16x16x32xf32>
    %22 = arith.mulf %17, %21 : vector<16x16x32xf32>
    %23 = arith.addf %16, %22 : vector<16x16x32xf32>
    %24 = vector.extract_strided_slice %9 {offsets = [0, 0, 0], sizes = [16, 16, 32], strides = [1, 1, 1]} : vector<18x16x32xf32> to vector<16x16x32xf32>
    %25 = vector.extract_strided_slice %10 {offsets = [2, 0], sizes = [1, 32], strides = [1, 1]} : vector<9x32xf32> to vector<1x32xf32>
    %26 = vector.shape_cast %25 : vector<1x32xf32> to vector<32xf32>
    %27 = vector.shape_cast %26 : vector<32xf32> to vector<1x1x32xf32>
    %28 = vector.broadcast %27 : vector<1x1x32xf32> to vector<16x16x32xf32>
    %29 = arith.mulf %24, %28 : vector<16x16x32xf32>
    %30 = arith.addf %23, %29 : vector<16x16x32xf32>
    %31 = vector.extract_strided_slice %6 {offsets = [1, 0, 0], sizes = [16, 16, 32], strides = [1, 1, 1]} : vector<18x16x32xf32> to vector<16x16x32xf32>
    %32 = vector.extract_strided_slice %10 {offsets = [3, 0], sizes = [1, 32], strides = [1, 1]} : vector<9x32xf32> to vector<1x32xf32>
    %33 = vector.shape_cast %32 : vector<1x32xf32> to vector<32xf32>
    %34 = vector.shape_cast %33 : vector<32xf32> to vector<1x1x32xf32>
    %35 = vector.broadcast %34 : vector<1x1x32xf32> to vector<16x16x32xf32>
    %36 = arith.mulf %31, %35 : vector<16x16x32xf32>
    %37 = arith.addf %30, %36 : vector<16x16x32xf32>
    %38 = vector.extract_strided_slice %3 {offsets = [1, 0, 0], sizes = [16, 16, 32], strides = [1, 1, 1]} : vector<18x16x32xf32> to vector<16x16x32xf32>
    %39 = vector.extract_strided_slice %10 {offsets = [4, 0], sizes = [1, 32], strides = [1, 1]} : vector<9x32xf32> to vector<1x32xf32>
    %40 = vector.shape_cast %39 : vector<1x32xf32> to vector<32xf32>
    %41 = vector.shape_cast %40 : vector<32xf32> to vector<1x1x32xf32>
    %42 = vector.broadcast %41 : vector<1x1x32xf32> to vector<16x16x32xf32>
    %43 = arith.mulf %38, %42 : vector<16x16x32xf32>
    %44 = arith.addf %37, %43 : vector<16x16x32xf32>
    %45 = vector.extract_strided_slice %9 {offsets = [1, 0, 0], sizes = [16, 16, 32], strides = [1, 1, 1]} : vector<18x16x32xf32> to vector<16x16x32xf32>
    %46 = vector.extract_strided_slice %10 {offsets = [5, 0], sizes = [1, 32], strides = [1, 1]} : vector<9x32xf32> to vector<1x32xf32>
    %47 = vector.shape_cast %46 : vector<1x32xf32> to vector<32xf32>
    %48 = vector.shape_cast %47 : vector<32xf32> to vector<1x1x32xf32>
    %49 = vector.broadcast %48 : vector<1x1x32xf32> to vector<16x16x32xf32>
    %50 = arith.mulf %45, %49 : vector<16x16x32xf32>
    %51 = arith.addf %44, %50 : vector<16x16x32xf32>
    %52 = vector.extract_strided_slice %6 {offsets = [2, 0, 0], sizes = [16, 16, 32], strides = [1, 1, 1]} : vector<18x16x32xf32> to vector<16x16x32xf32>
    %53 = vector.extract_strided_slice %10 {offsets = [6, 0], sizes = [1, 32], strides = [1, 1]} : vector<9x32xf32> to vector<1x32xf32>
    %54 = vector.shape_cast %53 : vector<1x32xf32> to vector<32xf32>
    %55 = vector.shape_cast %54 : vector<32xf32> to vector<1x1x32xf32>
    %56 = vector.broadcast %55 : vector<1x1x32xf32> to vector<16x16x32xf32>
    %57 = arith.mulf %52, %56 : vector<16x16x32xf32>
    %58 = arith.addf %51, %57 : vector<16x16x32xf32>
    %59 = vector.extract_strided_slice %3 {offsets = [2, 0, 0], sizes = [16, 16, 32], strides = [1, 1, 1]} : vector<18x16x32xf32> to vector<16x16x32xf32>
    %60 = vector.extract_strided_slice %10 {offsets = [7, 0], sizes = [1, 32], strides = [1, 1]} : vector<9x32xf32> to vector<1x32xf32>
    %61 = vector.shape_cast %60 : vector<1x32xf32> to vector<32xf32>
    %62 = vector.shape_cast %61 : vector<32xf32> to vector<1x1x32xf32>
    %63 = vector.broadcast %62 : vector<1x1x32xf32> to vector<16x16x32xf32>
    %64 = arith.mulf %59, %63 : vector<16x16x32xf32>
    %65 = arith.addf %58, %64 : vector<16x16x32xf32>
    %66 = vector.extract_strided_slice %9 {offsets = [2, 0, 0], sizes = [16, 16, 32], strides = [1, 1, 1]} : vector<18x16x32xf32> to vector<16x16x32xf32>
    %67 = vector.extract_strided_slice %10 {offsets = [8, 0], sizes = [1, 32], strides = [1, 1]} : vector<9x32xf32> to vector<1x32xf32>
    %68 = vector.shape_cast %67 : vector<1x32xf32> to vector<32xf32>
    %69 = vector.shape_cast %68 : vector<32xf32> to vector<1x1x32xf32>
    %70 = vector.broadcast %69 : vector<1x1x32xf32> to vector<16x16x32xf32>
    %71 = arith.mulf %66, %70 : vector<16x16x32xf32>
    %72 = arith.addf %65, %71 : vector<16x16x32xf32>
    %c0_7 = arith.constant 0 : index
    %c0_8 = arith.constant 0 : index
    %73 = vector.load %arg3[%c0_7, %c0_8] : memref<1x32xf32, #tpu.memory_space<vmem>>, vector<1x32xf32>
    %74 = vector.shape_cast %73 : vector<1x32xf32> to vector<32xf32>
    %75 = vector.shape_cast %74 : vector<32xf32> to vector<1x1x32xf32>
    %76 = vector.broadcast %75 : vector<1x1x32xf32> to vector<16x16x32xf32>
    %77 = arith.mulf %72, %76 : vector<16x16x32xf32>
    %c0_9 = arith.constant 0 : index
    %c0_10 = arith.constant 0 : index
    %78 = vector.load %arg4[%c0_9, %c0_10] : memref<1x32xf32, #tpu.memory_space<vmem>>, vector<1x32xf32>
    %79 = vector.shape_cast %78 : vector<1x32xf32> to vector<32xf32>
    %80 = vector.shape_cast %79 : vector<32xf32> to vector<1x1x32xf32>
    %81 = vector.broadcast %80 : vector<1x1x32xf32> to vector<16x16x32xf32>
    %82 = arith.addf %77, %81 : vector<16x16x32xf32>
    %cst_11 = arith.constant 3.000000e+00 : f32
    %83 = vector.broadcast %cst_11 : f32 to vector<16x16x32xf32>
    %84 = arith.addf %82, %83 : vector<16x16x32xf32>
    %cst_12 = arith.constant 0.000000e+00 : f32
    %cst_13 = arith.constant 6.000000e+00 : f32
    %85 = vector.broadcast %cst_12 : f32 to vector<16x16x32xf32>
    %86 = arith.maximumf %85, %84 : vector<16x16x32xf32>
    %87 = vector.broadcast %cst_13 : f32 to vector<16x16x32xf32>
    %88 = arith.minimumf %87, %86 : vector<16x16x32xf32>
    %89 = arith.mulf %82, %88 : vector<16x16x32xf32>
    %cst_14 = arith.constant 0.166666672 : f32
    %90 = vector.broadcast %cst_14 : f32 to vector<16x16x32xf32>
    %91 = arith.mulf %89, %90 : vector<16x16x32xf32>
    %cst_15 = arith.constant dense<0.000000e+00> : vector<32xf32>
    %92 = vector.multi_reduction <add>, %91, %cst_15 [0, 1] : vector<16x16x32xf32> to vector<32xf32>
    %cst_16 = arith.constant 2.560000e+02 : f32
    %93 = vector.broadcast %cst_16 : f32 to vector<32xf32>
    %94 = arith.divf %92, %93 : vector<32xf32>
    %95 = vector.shape_cast %94 : vector<32xf32> to vector<1x32xf32>
    %c0_17 = arith.constant 0 : index
    %c0_18 = arith.constant 0 : index
    %96 = vector.load %arg5[%c0_17, %c0_18] : memref<32x8xf32, #tpu.memory_space<vmem>>, vector<32x8xf32>
    %cst_19 = arith.constant dense<0.000000e+00> : vector<1x8xf32>
    %97 = tpu.matmul %95, %96, %cst_19 {dimension_numbers = #tpu.dot_dimension_numbers<[1], [0], [0], [1], [0, 0, 1, 1], [], []>} : vector<1x32xf32>, vector<32x8xf32>, vector<1x8xf32> -> vector<1x8xf32>
    %c0_20 = arith.constant 0 : index
    %c0_21 = arith.constant 0 : index
    %98 = vector.load %arg6[%c0_20, %c0_21] : memref<1x8xf32, #tpu.memory_space<vmem>>, vector<1x8xf32>
    %99 = arith.addf %97, %98 : vector<1x8xf32>
    %cst_22 = arith.constant 0.000000e+00 : f32
    %100 = vector.broadcast %cst_22 : f32 to vector<1x8xf32>
    %101 = arith.maximumf %99, %100 : vector<1x8xf32>
    %c0_23 = arith.constant 0 : index
    %c0_24 = arith.constant 0 : index
    %102 = vector.load %arg7[%c0_23, %c0_24] : memref<8x32xf32, #tpu.memory_space<vmem>>, vector<8x32xf32>
    %cst_25 = arith.constant dense<0.000000e+00> : vector<1x32xf32>
    %103 = tpu.matmul %101, %102, %cst_25 {dimension_numbers = #tpu.dot_dimension_numbers<[1], [0], [0], [1], [0, 0, 1, 1], [], []>} : vector<1x8xf32>, vector<8x32xf32>, vector<1x32xf32> -> vector<1x32xf32>
    %c0_26 = arith.constant 0 : index
    %c0_27 = arith.constant 0 : index
    %104 = vector.load %arg8[%c0_26, %c0_27] : memref<1x32xf32, #tpu.memory_space<vmem>>, vector<1x32xf32>
    %105 = arith.addf %103, %104 : vector<1x32xf32>
    %cst_28 = arith.constant 0.166666672 : f32
    %106 = vector.broadcast %cst_28 : f32 to vector<1x32xf32>
    %107 = arith.mulf %105, %106 : vector<1x32xf32>
    %cst_29 = arith.constant 5.000000e-01 : f32
    %108 = vector.broadcast %cst_29 : f32 to vector<1x32xf32>
    %109 = arith.addf %107, %108 : vector<1x32xf32>
    %cst_30 = arith.constant 0.000000e+00 : f32
    %cst_31 = arith.constant 1.000000e+00 : f32
    %110 = vector.broadcast %cst_30 : f32 to vector<1x32xf32>
    %111 = arith.maximumf %110, %109 : vector<1x32xf32>
    %112 = vector.broadcast %cst_31 : f32 to vector<1x32xf32>
    %113 = arith.minimumf %112, %111 : vector<1x32xf32>
    %114 = vector.shape_cast %113 : vector<1x32xf32> to vector<1x1x32xf32>
    %115 = vector.broadcast %114 : vector<1x1x32xf32> to vector<16x16x32xf32>
    %116 = arith.mulf %91, %115 : vector<16x16x32xf32>
    %117 = vector.shape_cast %116 : vector<16x16x32xf32> to vector<256x32xf32>
    %118 = arith.truncf %117 : vector<256x32xf32> to vector<256x32xbf16>
    %c0_32 = arith.constant 0 : index
    %c0_33 = arith.constant 0 : index
    %119 = vector.load %arg9[%c0_32, %c0_33] : memref<32x64xbf16, #tpu.memory_space<vmem>>, vector<32x64xbf16>
    %cst_34 = arith.constant dense<0.000000e+00> : vector<256x64xf32>
    %120 = tpu.matmul %118, %119, %cst_34 {dimension_numbers = #tpu.dot_dimension_numbers<[1], [0], [0], [1], [0, 0, 1, 1], [], []>} : vector<256x32xbf16>, vector<32x64xbf16>, vector<256x64xf32> -> vector<256x64xf32>
    %c0_35 = arith.constant 0 : index
    %c0_36 = arith.constant 0 : index
    %121 = vector.load %arg10[%c0_35, %c0_36] : memref<1x64xf32, #tpu.memory_space<vmem>>, vector<1x64xf32>
    %122 = vector.shape_cast %121 : vector<1x64xf32> to vector<64xf32>
    %123 = vector.shape_cast %122 : vector<64xf32> to vector<1x64xf32>
    %124 = vector.broadcast %123 : vector<1x64xf32> to vector<256x64xf32>
    %125 = arith.mulf %120, %124 : vector<256x64xf32>
    %c0_37 = arith.constant 0 : index
    %c0_38 = arith.constant 0 : index
    %126 = vector.load %arg11[%c0_37, %c0_38] : memref<1x64xf32, #tpu.memory_space<vmem>>, vector<1x64xf32>
    %127 = vector.shape_cast %126 : vector<1x64xf32> to vector<64xf32>
    %128 = vector.shape_cast %127 : vector<64xf32> to vector<1x64xf32>
    %129 = vector.broadcast %128 : vector<1x64xf32> to vector<256x64xf32>
    %130 = arith.addf %125, %129 : vector<256x64xf32>
    %cst_39 = arith.constant 3.000000e+00 : f32
    %131 = vector.broadcast %cst_39 : f32 to vector<256x64xf32>
    %132 = arith.addf %130, %131 : vector<256x64xf32>
    %cst_40 = arith.constant 0.000000e+00 : f32
    %cst_41 = arith.constant 6.000000e+00 : f32
    %133 = vector.broadcast %cst_40 : f32 to vector<256x64xf32>
    %134 = arith.maximumf %133, %132 : vector<256x64xf32>
    %135 = vector.broadcast %cst_41 : f32 to vector<256x64xf32>
    %136 = arith.minimumf %135, %134 : vector<256x64xf32>
    %137 = arith.mulf %130, %136 : vector<256x64xf32>
    %cst_42 = arith.constant 0.166666672 : f32
    %138 = vector.broadcast %cst_42 : f32 to vector<256x64xf32>
    %139 = arith.mulf %137, %138 : vector<256x64xf32>
    %140 = tpu.transpose %139, [1, 0] : vector<256x64xf32> -> vector<64x256xf32>
    %c0_43 = arith.constant 0 : index
    %c0_44 = arith.constant 0 : index
    %c0_45 = arith.constant 0 : index
    %141 = vector.load %arg12[%c0_43, %c0_44, %c0_45] : memref<1x64x256xf32, #tpu.memory_space<vmem>>, vector<1x64x256xf32>
    %142 = vector.shape_cast %141 : vector<1x64x256xf32> to vector<64x256xf32>
    %143 = vector.shape_cast %140 : vector<64x256xf32> to vector<1x64x256xf32>
    tpu.vector_store %arg12[%c0_43, %c0_44, %c0_45], %143 {strides = array<i32>} : memref<1x64x256xf32, #tpu.memory_space<vmem>>, vector<1x64x256xf32>,
    return
  }
  func.func @transform_0(%arg0: i32) -> (i32, i32, i32, i32) {
    %c0_i32 = arith.constant 0 : i32
    %c0_i32_0 = arith.constant 0 : i32
    %c0_i32_1 = arith.constant 0 : i32
    %c0_i32_2 = arith.constant 0 : i32
    return %arg0, %c0_i32, %c0_i32_0, %c0_i32_1 : i32, i32, i32, i32
  }
  func.func @transform_1(%arg0: i32) -> (i32, i32) {
    %c0_i32 = arith.constant 0 : i32
    %c0_i32_0 = arith.constant 0 : i32
    %c0_i32_1 = arith.constant 0 : i32
    return %c0_i32, %c0_i32_0 : i32, i32
  }
  func.func @transform_2(%arg0: i32) -> (i32, i32) {
    %c0_i32 = arith.constant 0 : i32
    %c0_i32_0 = arith.constant 0 : i32
    %c0_i32_1 = arith.constant 0 : i32
    return %c0_i32, %c0_i32_0 : i32, i32
  }
  func.func @transform_3(%arg0: i32) -> (i32, i32) {
    %c0_i32 = arith.constant 0 : i32
    %c0_i32_0 = arith.constant 0 : i32
    %c0_i32_1 = arith.constant 0 : i32
    return %c0_i32, %c0_i32_0 : i32, i32
  }
  func.func @transform_4(%arg0: i32) -> (i32, i32) {
    %c0_i32 = arith.constant 0 : i32
    %c0_i32_0 = arith.constant 0 : i32
    %c0_i32_1 = arith.constant 0 : i32
    return %c0_i32, %c0_i32_0 : i32, i32
  }
  func.func @transform_5(%arg0: i32) -> (i32, i32) {
    %c0_i32 = arith.constant 0 : i32
    %c0_i32_0 = arith.constant 0 : i32
    %c0_i32_1 = arith.constant 0 : i32
    return %c0_i32, %c0_i32_0 : i32, i32
  }
  func.func @transform_6(%arg0: i32) -> (i32, i32) {
    %c0_i32 = arith.constant 0 : i32
    %c0_i32_0 = arith.constant 0 : i32
    %c0_i32_1 = arith.constant 0 : i32
    return %c0_i32, %c0_i32_0 : i32, i32
  }
  func.func @transform_7(%arg0: i32) -> (i32, i32) {
    %c0_i32 = arith.constant 0 : i32
    %c0_i32_0 = arith.constant 0 : i32
    %c0_i32_1 = arith.constant 0 : i32
    return %c0_i32, %c0_i32_0 : i32, i32
  }
  func.func @transform_8(%arg0: i32) -> (i32, i32) {
    %c0_i32 = arith.constant 0 : i32
    %c0_i32_0 = arith.constant 0 : i32
    %c0_i32_1 = arith.constant 0 : i32
    return %c0_i32, %c0_i32_0 : i32, i32
  }
  func.func @transform_9(%arg0: i32) -> (i32, i32) {
    %c0_i32 = arith.constant 0 : i32
    %c0_i32_0 = arith.constant 0 : i32
    %c0_i32_1 = arith.constant 0 : i32
    return %c0_i32, %c0_i32_0 : i32, i32
  }
  func.func @transform_10(%arg0: i32) -> (i32, i32) {
    %c0_i32 = arith.constant 0 : i32
    %c0_i32_0 = arith.constant 0 : i32
    %c0_i32_1 = arith.constant 0 : i32
    return %c0_i32, %c0_i32_0 : i32, i32
  }
  func.func @transform_11(%arg0: i32) -> (i32, i32, i32) {
    %c0_i32 = arith.constant 0 : i32
    %c0_i32_0 = arith.constant 0 : i32
    %c0_i32_1 = arith.constant 0 : i32
    return %arg0, %c0_i32, %c0_i32_0 : i32, i32, i32
  }
}

</mosaic_0001>

<bundles_post_ra>
// kernel: tpu_custom_call.1
= control target key start
LH: loop header
LB: loop body
LE: loop exit
PB: predicated region body
PF: predicated region fallthrough
CT: control target
= control target key end

     0   :  { %16 = vsyncpa [#allocation3], 0  ;;  %s5125_s0 = inlined_call_operand.hbm [shape: f32[2,16,16,32], index: 0, kind: input, shape index: {}]   ;;  %s5126_s1 = inlined_call_operand.vmem [shape: f32[9,32], index: 1, kind: input, shape index: {}]   ;;  %s5127_s2 = inlined_call_operand.vmem [shape: f32[1,32], index: 2, kind: input, shape index: {}]   ;;  %s5128_s3 = inlined_call_operand.vmem [shape: f32[1,32], index: 3, kind: input, shape index: {}]   ;;  %s5129_s4 = inlined_call_operand.vmem [shape: f32[32,8], index: 4, kind: input, shape index: {}]   ;;  %s5130_s5 = inlined_call_operand.vmem [shape: f32[1,8], index: 5, kind: input, shape index: {}]   ;;  %s5131_s6 = inlined_call_operand.vmem [shape: f32[8,32], index: 6, kind: input, shape index: {}]   ;;  %s5132_s7 = inlined_call_operand.vmem [shape: f32[1,32], index: 7, kind: input, shape index: {}]   ;;  %s5133_s8 = inlined_call_operand.vmem [shape: bf16[32,64], index: 8, kind: input, shape index: {}]   ;;  %s5134_s9 = inlined_call_operand.vmem [shape: f32[1,64], index: 9, kind: input, shape index: {}]   ;;  %s5135_s10 = inlined_call_operand.vmem [shape: f32[1,64], index: 10, kind: input, shape index: {}]   ;;  %s5136_s11 = inlined_call_operand.hbm [shape: f32[2,64,256], index: 11, kind: output, shape index: {}]  }
   0x1   :  { %18 = vsyncpa [#allocation3 + $0x1], 0 }
   0x2   :  { %19 = vsyncpa [#allocation4], 0 }
   0x3   :  { %21 = vsyncpa [#allocation4 + $0x1], 0  ;;  %s2773_s17 = smov 0   ;;  %s2775_s18 = smov 0  }
   0x4   :  { %s2777_s19 = smov 0   ;;  %s2779_s20 = smov 0  }
   0x5 LB: > { %5301 = sst [smem:[#allocation8_spill]] %s2699_s19  ;;  %s2794_s21 = sadd.s32 4294967295, %s2703_s20   ;;  %s2703_s20 = sphi %s2779_s20, %s5828_s20   ;;  %s2699_s19 = sphi %s2777_s19, %s5830_s19   ;;  %s2695_s18 = sphi %s2775_s18, %s5832_s18   ;;  %s2691_s17 = sphi %s2773_s17, %s5831_s17  }
   0x6   : > { %s2406_s22 = sadd.s32 4294967294, %s2703_s20   ;;  %s2798_s23 = sadd.s32 1, %s2703_s20  }
   0x7   : > { %5302 = sst [smem:[#allocation9_spill]] %s2798_s23  ;;  %s34_s24 = sadd.s32 1, %s2699_s19 }
   0x8   : > { %s31_s25 = ssub.s32 %s2703_s20, %s2798_s23  ;;  %p41_p0 = scmp.ne.s32.totalorder %s2699_s19, %s2695_s18 }
   0x9   : > { %p32_p1 = scmp.eq.s32.totalorder %s31_s25, 0  ;;  %p42_p2 = scmp.eq.s32.totalorder %s2703_s20, 0 }
   0xa   : > { %p47_p3 = scmp.ne.s32.totalorder %s2695_s18, %s2691_s17  ;;  %p48_p4 = scmp.eq.s32.totalorder %s2794_s21, 0 }
   0xb   : > { %s2810_s26 = scalar_select %p32_p1, %s2699_s19, %s34_s24  }
   0xc   : > { %p2812_p5 = por %p42_p2, %p41_p0  ;;  %p2816_p6 = por %p48_p4, %p47_p3 }
   0xd   : > { %5303 = sst [smem:[#allocation10_spill]] %s2810_s26  ;;  %p281_p7 = scmp.eq.s32.totalorder %s2794_s21, 1 }
   0xe   : > { %s5305_s28 = scalar_select %p2816_p6, 1, 0 }
   0xf   : > { %p287_p8 = scmp.eq.s32.totalorder %s2406_s22, 1  ;;  %p2540_p10 = scmp.lt.s32.totalorder %s2703_s20, 2 }
  0x10   : > { %p2823_p11 = por %p281_p7, %p41_p0  ;;  %s337_s12 = sand.u32 1, %s2699_s19  }
  0x11   : > { %p2827_p12 = por %p287_p8, %p47_p3  ;;  %s2445_s13 = sshll.u32 %s2703_s20, 12 }
  0x12   : > { %s5306_s29 = scalar_select %p2823_p11, 1, 0 }
  0x13   : > { %s5307_s30 = scalar_select %p2827_p12, 1, 0 }
  0x14   : > { %s2409_s14 = sshll.u32 %s337_s12, 8  ;;  %s2836_s24 = scalar_lea.hbm %s5125_s0, %s2445_s13 }
  0x15   : > { %5308 = sst [smem:[#allocation11_spill]] %s5307_s30  ;;  %s341_s22 = scalar_lea.vmem [#allocation2], %s2409_s14 }
  0x16   : > { %s348_s25 = sshll.u32 %s341_s22, 4  ;;  %p2840_p13 = pnand %p2540_p10, %p2812_p5  ;;  %s2844_s25 = int_to_ptr.vmem [resolvable:$true] %s348_s25 }
  0x17   : > { %s2846_s19 = scalar_lea.sflag [#allocation3], %s337_s12  ;;  %s2611_s23 = scalar_lea.hbm %s2836_s24, 4096 }
  0x18   : > { %p2612_p0 = scmp.ne.s32.totalorder %s2836_s24, %s2611_s23  ;;  %p2613_p1 = pneg %p2840_p13 }
  0x19   : > { %s2616_s14 = scalar_lea.hbm %s5125_s0, 8192  ;;  %p2617_p4 = scmp.lt.s32.totalorder %s2836_s24, %s5125_s0 }
  0x1a   : > { %p2614_p2 = pnand %p2613_p1, %p2612_p0  ;;  %p2618_p5 = scmp.lt.s32.totalorder %s2616_s14, %s2611_s23 }
  0x1c   : > { %p2615_p3 = pneg %p2614_p2  ;;  %p2619_p7 = por %p2618_p5, %p2617_p4 }
  0x1e   : > { %p2620_p8 = pnand %p2619_p7, %p2615_p3 }
  0x20   : > { %2623 = shalt.err (!%p2620_p8)
}
  0x21   : > { %s2624_s12 = scalar_lea.vmem %s2844_s25, 4096  ;;  %s2705_s22 = smov [#allocation2]  }
  0x22   : > { %p2625_p10 = scmp.ne.s32.totalorder %s2844_s25, %s2624_s12  ;;  %s2629_s30 = sshll.u32 %s2705_s22, 4  ;;  %s2630_s30 = int_to_ptr.vmem [resolvable:$false] %s2629_s30 }
  0x23   : > { %s2631_s13 = scalar_lea.vmem %s2630_s30, 8192  ;;  %p2632_p2 = scmp.lt.s32.totalorder %s2844_s25, %s2630_s30 }
  0x24   : > { %p2627_p9 = pnand %p2625_p10, %p2613_p1  ;;  %p2633_p12 = scmp.lt.s32.totalorder %s2631_s13, %s2624_s12 }
  0x26   : > { %p2628_p0 = pneg %p2627_p9  ;;  %p2634_p11 = por %p2633_p12, %p2632_p2 }
  0x28   : > { %p2635_p6 = pnand %p2634_p11, %p2628_p0 }
  0x2a   : > { %2638 = shalt.err (!%p2635_p6)
}
  0x2b   : > { %s2706_s23 = smov 128   ;;  %s2707_s15 = smov 8  }
  0x2c   : > { %2535 = dma.hbm_to_vmem [thread:$0]  (!%p2840_p13), %s2836_s24, 4096, %s2844_s25, %s2846_s19, %s2706_s23, %s2706_s23, %s2707_s15  }
  0x2d   : > { %p2412_p9 = scmp.ge.s32.totalorder %s2703_s20, 1  ;;  %p356_p1 = scmp.lt.s32.totalorder %s2703_s20, 3 }
  0x2f   : > { %p357_p3 = pnand %p2412_p9, %p356_p1 }
  0x31   : > { %360 = sbr.rel (%p357_p3) target bundleno = 1145 (0x479), region = 64 }
  0x36   : > { %s2870_s30 = sand.u32 1, %s2695_s18   ;;  %p5310_p6 = scmp.ne.s32.totalorder %s5305_s28, 0 }
  0x37   : > { %s2413_s14 = sshll.u32 %s2870_s30, 8  ;;  %s363_s27 = scalar_lea.sflag [#allocation3], %s2870_s30 }
  0x38   : > { %s2874_s16 = scalar_lea.vmem [#allocation2], %s2413_s14 }
  0x39   : > { %2682 = dma.done.wait (%p5310_p6), %s363_s27, 4096  }
  0x3a   : > { %2684 = vsyncadd (%p5310_p6), %s363_s27, 4294963200  ;;  %v5143_v0 = vmov 0.0   ;;  %vm2709_vm0 = vmmov 0   ;;  %v1568_v1 = vld [vmem:[%s5129_s4 + $0x18] sm:$0xff]  ;;  %v1567_v2 = vld [vmem:[%s5129_s4 + $0x10] sm:$0xff]  ;;  %v677_v5 = vlaneseq  ;;  %vm471_vm1 = vcmask 1040384  }
  0x3b   : > { %2472 = vmatprep.subr.mxu0 %v5143_v0  ;;  %2480 = vmatprep.mubr.msk.f32.mxu0 %vm2709_vm0, %v5143_v0  ;;  %v1566_v3 = vld [vmem:[%s5129_s4 + $0x8] sm:$0xff]  ;;  %v1565_v4 = vld [vmem:[%s5129_s4] sm:$0xff]  ;;  %v2900_v6 = vrot.slane %v5143_v0, 7  ;;  %v2903_v7 = vrot.slane %v5143_v0, 1  ;;  %vm573_vm2 = vcmask 1046528   ;;  %v2911_v10 = vld [vmem:[%s2874_s16 + $0x18] sm:$0xff] }
  0x3c   : > { %2473 = vmatpush3.msra.mxu0 %v1568_v1  ;;  %v2905_v8 = vshrl.u32 %v677_v5, 7  ;;  %v2908_v9 = vld [vmem:[%s2874_s16 + $0x8] sm:$0xff]  ;;  %5315 = vst [vmem:[#allocation16_spill] sm:$0xff] %v2911_v10  ;;  %v2914_v11 = vld [vmem:[%s2874_s16] sm:$0xff]  ;;  %v2929_v16 = vld [vmem:[%s2874_s16 + $0x10] sm:$0xff]  ;;  %v478_v25 = vrot.slane %v2911_v10, 7 }
  0x3d   : > { %2474 = vmatprep.subr.mxu0 %v5143_v0  ;;  %5311 = vst [vmem:[#allocation12_spill] sm:$0xff] %v2900_v6  ;;  %5312 = vst [vmem:[#allocation13_spill] sm:$0xff] %v2903_v7  ;;  %v2917_v12 = vld [vmem:[%s2874_s16 + $0x28] sm:$0xff]  ;;  %v2921_v13 = vsel %vm471_vm1, 0.0, %v2900_v6  ;;  %v2925_v14 = vsel %vm573_vm2, %v2903_v7, 0.0  ;;  %v2932_v17 = vld [vmem:[%s2874_s16 + $0x38] sm:$0xff] }
  0x3e   : > { %2475 = vmatpush3.msra.mxu0 %v1567_v2  ;;  %5313 = vst [vmem:[#allocation14_spill] sm:$0xff] %v2905_v8  ;;  %5314 = vst [vmem:[#allocation15_spill] sm:$0xff] %v2908_v9  ;;  %v2935_v18 = vld [vmem:[%s2874_s16 + $0x48] sm:$0xff]  ;;  %v2941_v22 = vld [vmem:[%s2874_s16 + $0x20] sm:$0xff]  ;;  %v475_v24 = vrot.slane %v2908_v9, 7  ;;  %v5144_v30 = vrot.slane %v2914_v11, 7 }
  0x3f   : > { %2476 = vmatprep.subr.mxu0 %v5143_v0  ;;  %5316 = vst [vmem:[#allocation17_spill] sm:$0xff] %v2914_v11  ;;  %5317 = vst [vmem:[#allocation18_spill] sm:$0xff] %v2917_v12  ;;  %v2944_v23 = vld [vmem:[%s2874_s16 + $0x58] sm:$0xff]  ;;  %v2951_v28 = vld [vmem:[%s2874_s16 + $0x30] sm:$0xff]  ;;  %v481_v31 = vrot.slane %v2917_v12, 7  ;;  %v477_v37 = vrot.slane %v2929_v16, 7 }
  0x40   : > { %2477 = vmatpush3.msra.mxu0 %v1566_v3  ;;  %5318 = vst [vmem:[#allocation19_spill] sm:$0xff] %v2921_v13  ;;  %5319 = vst [vmem:[#allocation20_spill] sm:$0xff] %v2925_v14  ;;  %v2954_v29 = vld [vmem:[%s2874_s16 + $0x40] sm:$0xff]  ;;  %v2961_v34 = vld [vmem:[%s2874_s16 + $0x50] sm:$0xff]  ;;  %v484_v38 = vrot.slane %v2932_v17, 7  ;;  %v487_v39 = vrot.slane %v2935_v18, 7  ;;  %v2996_v49 = vsel %vm471_vm1, %v5144_v30, %v475_v24 }
  0x41   : > { %2478 = vmatprep.subr.mxu0 %v5143_v0  ;;  %5320 = vst [vmem:[#allocation21_spill] sm:$0xff] %v2929_v16  ;;  %5321 = vst [vmem:[#allocation22_spill] sm:$0xff] %v2932_v17  ;;  %v2964_v35 = vld [vmem:[%s2874_s16 + $0x68] sm:$0xff]  ;;  %v2967_v36 = vld [vmem:[%s2874_s16 + $0x78] sm:$0xff]  ;;  %v480_v43 = vrot.slane %v2941_v22, 7  ;;  %v490_v44 = vrot.slane %v2944_v23, 7  ;;  %v2999_v50 = vsel %vm471_vm1, %v477_v37, %v478_v25 }
  0x42   : > { %2479 = vmatpush3.msra.mxu0 %v1565_v4  ;;  %5322 = vst [vmem:[#allocation23_spill] sm:$0xff] %v2935_v18  ;;  %5323 = vst [vmem:[#allocation24_spill] sm:$0xff] %v2941_v22  ;;  %v2973_v40 = vld [vmem:[%s2874_s16 + $0x60] sm:$0xff]  ;;  %v2976_v41 = vld [vmem:[%s2874_s16 + $0x70] sm:$0xff]  ;;  %v483_v51 = vrot.slane %v2951_v28, 7  ;;  %v486_v52 = vrot.slane %v2954_v29, 7 }
  0x43   : > { %2483 = vmatprep.subr.mxu0 %v5143_v0  ;;  %5324 = vst [vmem:[#allocation25_spill] sm:$0xff] %v2944_v23  ;;  %5325 = vst [vmem:[#allocation26_spill] sm:$0xff] %v2951_v28  ;;  %v2979_v42 = vld [vmem:[%s2874_s16 + $0x80] sm:$0xff]  ;;  %v2985_v46 = vld [vmem:[%s2874_s16 + $0x88] sm:$0xff]  ;;  %v3013_v56 = vsel %vm471_vm1, %v480_v43, %v481_v31  ;;  %v489_v57 = vrot.slane %v2961_v34, 7  ;;  %v493_v58 = vrot.slane %v2964_v35, 7 }
  0x44   : > { %5326 = vst [vmem:[#allocation27_spill] sm:$0xff] %v2954_v29  ;;  %5327 = vst [vmem:[#allocation28_spill] sm:$0xff] %v2961_v34  ;;  %v2988_v47 = vld [vmem:[%s2874_s16 + $0x98] sm:$0xff]  ;;  %v2991_v48 = vld [vmem:[%s2874_s16 + $0xa8] sm:$0xff]  ;;  %v496_v59 = vrot.slane %v2967_v36, 7  ;;  %v3028_v63 = vsel %vm471_vm1, %v483_v51, %v484_v38  ;;  %v3031_v1 = vsel %vm471_vm1, %v486_v52, %v487_v39  ;;  %v492_v2 = vrot.slane %v2973_v40, 7 }
  0x45   : > { %5328 = vst [vmem:[#allocation29_spill] sm:$0xff] %v2964_v35  ;;  %5329 = vst [vmem:[#allocation30_spill] sm:$0xff] %v2967_v36  ;;  %v3004_v53 = vld [vmem:[%s2874_s16 + $0x90] sm:$0xff]  ;;  %v3007_v54 = vld [vmem:[%s2874_s16 + $0xb8] sm:$0xff]  ;;  %v495_v3 = vrot.slane %v2976_v41, 7  ;;  %v3045_v25 = vsel %vm471_vm1, %v489_v57, %v490_v44  ;;  %v499_v31 = vrot.slane %v2985_v46, 7 }
  0x46   : > { %5330 = vst [vmem:[#allocation31_spill] sm:$0xff] %v2973_v40  ;;  %5331 = vst [vmem:[#allocation32_spill] sm:$0xff] %v2976_v41  ;;  %v3010_v55 = vld [vmem:[%s2874_s16 + $0xc8] sm:$0xff]  ;;  %v3019_v60 = vld [vmem:[%s2874_s16 + $0xa0] sm:$0xff]  ;;  %v502_v38 = vrot.slane %v2988_v47, 7  ;;  %v505_v39 = vrot.slane %v2991_v48, 7  ;;  %v3064_v20 = vsel %vm471_vm1, %v492_v2, %v493_v58 }
  0x47   : > { %5332 = vst [vmem:[#allocation33_spill] sm:$0xff] %v2979_v42  ;;  %5333 = vst [vmem:[#allocation34_spill] sm:$0xff] %v2985_v46  ;;  %v3022_v61 = vld [vmem:[%s2874_s16 + $0xb0] sm:$0xff]  ;;  %v3025_v62 = vld [vmem:[%s2874_s16 + $0xd8] sm:$0xff]  ;;  %v498_v33 = vrot.slane %v2979_v42, 7  ;;  %v501_v32 = vrot.slane %v3004_v53, 7  ;;  %v3067_v19 = vsel %vm471_vm1, %v495_v3, %v496_v59 }
  0x48   : > { %5334 = vst [vmem:[#allocation35_spill] sm:$0xff] %v2988_v47  ;;  %5335 = vst [vmem:[#allocation36_spill] sm:$0xff] %v2991_v48  ;;  %v3036_v4 = vld [vmem:[%s2874_s16 + $0xc0] sm:$0xff]  ;;  %v3039_v5 = vld [vmem:[%s2874_s16 + $0xe8] sm:$0xff]  ;;  %v508_v27 = vrot.slane %v3007_v54, 7  ;;  %v511_v26 = vrot.slane %v3010_v55, 7 }
  0x49   : > { %5336 = vst [vmem:[#allocation37_spill] sm:$0xff] %v2996_v49  ;;  %5337 = vst [vmem:[#allocation38_spill] sm:$0xff] %v2999_v50  ;;  %v3042_v24 = vld [vmem:[%s2874_s16 + $0xf8] sm:$0xff]  ;;  %v3051_v0 = vld [vmem:[%s2874_s16 + $0xd0] sm:$0xff]  ;;  %v504_v15 = vrot.slane %v3019_v60, 7  ;;  %v514_v45 = vrot.slane %v3025_v62, 7  ;;  %v3079_v58 = vsel %vm471_vm1, %v501_v32, %v502_v38 }
  0x4a   : > { %5338 = vst [vmem:[#allocation39_spill] sm:$0xff] %v3004_v53  ;;  %5339 = vst [vmem:[#allocation40_spill] sm:$0xff] %v3007_v54  ;;  %v3058_v21 = vld [vmem:[%s2874_s16 + $0xe0] sm:$0xff]  ;;  %v3061_v44 = vld [vmem:[%s2874_s16 + $0xf0] sm:$0xff]  ;;  %v507_v30 = vrot.slane %v3022_v61, 7  ;;  %v510_v14 = vrot.slane %v3036_v4, 7 }
  0x4b   : > { %5340 = vst [vmem:[#allocation41_spill] sm:$0xff] %v3010_v55  ;;  %5341 = vst [vmem:[#allocation42_spill] sm:$0xff] %v3013_v56  ;;  %v517_v7 = vrot.slane %v3039_v5, 7  ;;  %v3082_v59 = vsel %vm471_vm1, %v504_v15, %v505_v39  ;;  %v516_v56 = vrot.slane %v3058_v21, 7  ;;  %v519_v50 = vrot.slane %v3061_v44, 7  ;;  %s2414_s28 = sshll.u32 %s2870_s30, 7 }
  0x4c   : > { %5342 = vst [vmem:[#allocation43_spill] sm:$0xff] %v3019_v60  ;;  %5343 = vst [vmem:[#allocation44_spill] sm:$0xff] %v3022_v61  ;;  %v5362_v38 = vrot.slane %v2914_v11, 7  ;;  %vm1493_vm3 = vcmask 261120   ;;  %vm1646_vm4 = vcmask 64512   ;;  %s5057_s12 = scalar_lea.vmem [#allocation5], %s2414_s28 }
  0x4d   : > { %5344 = vst [vmem:[#allocation45_spill] sm:$0xff] %v3025_v62  ;;  %5345 = vst [vmem:[#allocation46_spill] sm:$0xff] %v3028_v63  ;;  %v3089_v63 = vsel %vm471_vm1, %v510_v14, %v511_v26  ;;  %v3108_v26 = vsel %vm471_vm1, %v516_v56, %v517_v7  ;;  %v577_v7 = vrot.slane %v2908_v9, 1  ;;  %v3142_v9 = vsel %vm471_vm1, 0.0, %v504_v15  ;;  %s2446_s22 = sshll.u32 %s2794_s21, 11  ;;  %s2333_s13 = sshll.u32 %s5057_s12, 4  ;;  %s5081_s13 = int_to_ptr.vmem [resolvable:$true] %s2333_s13 }
  0x4e   : > { %5346 = vst [vmem:[#allocation47_spill] sm:$0xff] %v3031_v1  ;;  %5347 = vst [vmem:[#allocation48_spill] sm:$0xff] %v3036_v4  ;;  %v3076_v1 = vsel %vm471_vm1, %v498_v33, %v499_v31  ;;  %v3099_v39 = vsel %vm471_vm1, 0.0, %v5362_v38  ;;  %v3120_v38 = vsel %vm471_vm1, 0.0, %v489_v57  ;;  %v3137_v57 = vsel %vm471_vm1, 0.0, %v501_v32  ;;  %s5079_s14 = scalar_lea.hbm %s5136_s11, %s2446_s22  ;;  %s2320_s27 = scalar_lea.sflag [#allocation4], %s2870_s30 }
  0x4f   : > { %5348 = vst [vmem:[#allocation49_spill] sm:$0xff] %v3039_v5  ;;  %5349 = vst [vmem:[#allocation50_spill] sm:$0xff] %v3042_v24  ;;  %v3157_v32 = vsel %vm471_vm1, 0.0, %v519_v50  ;;  %p5824_p12 = scmp.ne.s32.totalorder %s5306_s29, 0  ;;  %s2710_s21 = smov [#allocation5]  }
  0x50   : > { %5350 = vst [vmem:[#allocation51_spill] sm:$0xff] %v3045_v25  ;;  %5351 = vst [vmem:[#allocation52_spill] sm:$0xff] %v3051_v0  ;;  %v520_v25 = vrot.slane %v3042_v24, 7  ;;  %s2643_s19 = sshll.u32 %s2710_s21, 4  ;;  %s2644_s19 = int_to_ptr.vmem [resolvable:$false] %s2643_s19 }
  0x51   : > { %5352 = vst [vmem:[#allocation53_spill] sm:$0xff] %v3058_v21  ;;  %5353 = vst [vmem:[#allocation54_spill] sm:$0xff] %v3061_v44  ;;  %s2645_s26 = scalar_lea.vmem %s2644_s19, 4096  ;;  %p2646_p5 = scmp.lt.s32.totalorder %s5081_s13, %s2644_s19 }
  0x52   : > { %5354 = vst [vmem:[#allocation55_spill] sm:$0xff] %v3064_v20  ;;  %5355 = vst [vmem:[#allocation56_spill] sm:$0xff] %v3067_v19  ;;  %v513_v19 = vrot.slane %v3051_v0, 7  ;;  %v3086_v20 = vsel %vm471_vm1, %v507_v30, %v508_v27  ;;  %v3105_v27 = vsel %vm471_vm1, 0.0, %v480_v43  ;;  %v3126_v43 = vsel %vm471_vm1, 0.0, %v495_v3 }
  0x53   : > { %5356 = vst [vmem:[#allocation57_spill] sm:$0xff] %v3076_v1  ;;  %5357 = vst [vmem:[#allocation58_spill] sm:$0xff] %v3079_v58  ;;  %v586_v3 = vrot.slane %v2932_v17, 1  ;;  %v5381_v17 = vrot.slane %v2914_v11, 1 }
  0x54   : > { %5358 = vst [vmem:[#allocation59_spill] sm:$0xff] %v3082_v59  ;;  %5359 = vst [vmem:[#allocation60_spill] sm:$0xff] %v3086_v20  ;;  %v3094_v31 = vsel %vm471_vm1, %v513_v19, %v514_v45  ;;  %v3102_v59 = vsel %vm471_vm1, 0.0, %v477_v37  ;;  %v3114_v45 = vsel %vm471_vm1, 0.0, %v483_v51  ;;  %v3123_v37 = vsel %vm471_vm1, 0.0, %v492_v2 }
  0x55   : > { %5360 = vst [vmem:[#allocation61_spill] sm:$0xff] %v3089_v63  ;;  %5361 = vst [vmem:[#allocation62_spill] sm:$0xff] %v3094_v31  ;;  %v3111_v63 = vsel %vm471_vm1, %v519_v50, %v520_v25  ;;  %v3117_v31 = vsel %vm471_vm1, 0.0, %v486_v52  ;;  %v579_v25 = vrot.slane %v2929_v16, 1  ;;  %v582_v51 = vrot.slane %v2941_v22, 1 }
  0x56   : > { %5363 = vst [vmem:[#allocation63_spill] sm:$0xff] %v3099_v39  ;;  %5364 = vst [vmem:[#allocation64_spill] sm:$0xff] %v3102_v59  ;;  %v583_v52 = vrot.slane %v2917_v12, 1  ;;  %v585_v2 = vrot.slane %v2951_v28, 1  ;;  %v3145_v16 = vsel %vm471_vm1, 0.0, %v507_v30  ;;  %v3148_v22 = vsel %vm471_vm1, 0.0, %v510_v14 }
  0x57   : > { %5365 = vst [vmem:[#allocation65_spill] sm:$0xff] %v3105_v27  ;;  %5366 = vst [vmem:[#allocation66_spill] sm:$0xff] %v3108_v26  ;;  %v3134_v26 = vsel %vm471_vm1, 0.0, %v498_v33  ;;  %v3151_v12 = vsel %vm471_vm1, 0.0, %v513_v19  ;;  %v3154_v33 = vsel %vm471_vm1, 0.0, %v516_v56  ;;  %v3162_v15 = vsel %vm573_vm2, %v5381_v17, %v577_v7 }
  0x58   : > { %5367 = vst [vmem:[#allocation67_spill] sm:$0xff] %v3111_v63  ;;  %5368 = vst [vmem:[#allocation68_spill] sm:$0xff] %v3114_v45  ;;  %v580_v63 = vrot.slane %v2911_v10, 1  ;;  %v588_v30 = vrot.slane %v2954_v29, 1  ;;  %v3169_v14 = vsel %vm573_vm2, %v582_v51, %v583_v52  ;;  %v589_v19 = vrot.slane %v2935_v18, 1 }
  0x59   : > { %5369 = vst [vmem:[#allocation69_spill] sm:$0xff] %v3117_v31  ;;  %5370 = vst [vmem:[#allocation70_spill] sm:$0xff] %v3120_v38  ;;  %v591_v56 = vrot.slane %v2961_v34, 1  ;;  %v3174_v50 = vsel %vm573_vm2, %v585_v2, %v586_v3  ;;  %v594_v17 = vrot.slane %v2973_v40, 1  ;;  %v597_v29 = vrot.slane %v2976_v41, 1 }
  0x5a   : > { %5371 = vst [vmem:[#allocation71_spill] sm:$0xff] %v3123_v37  ;;  %5372 = vst [vmem:[#allocation72_spill] sm:$0xff] %v3126_v43  ;;  %v3166_v28 = vsel %vm573_vm2, %v579_v25, %v580_v63  ;;  %v598_v25 = vrot.slane %v2967_v36, 1  ;;  %v600_v51 = vrot.slane %v2979_v42, 1  ;;  %v604_v34 = vrot.slane %v2988_v47, 1 }
  0x5b   : > { %5373 = vst [vmem:[#allocation73_spill] sm:$0xff] %v3134_v26  ;;  %5374 = vst [vmem:[#allocation74_spill] sm:$0xff] %v3137_v57  ;;  %v606_v2 = vrot.slane %v3019_v60, 1  ;;  %v609_v40 = vrot.slane %v3022_v61, 1  ;;  %v612_v41 = vrot.slane %v3036_v4, 1  ;;  %v613_v36 = vrot.slane %v3010_v55, 1 }
  0x5c   : > { %5375 = vst [vmem:[#allocation75_spill] sm:$0xff] %v3142_v9  ;;  %5376 = vst [vmem:[#allocation76_spill] sm:$0xff] %v3145_v16  ;;  %v615_v42 = vrot.slane %v3051_v0, 1  ;;  %v619_v47 = vrot.slane %v3039_v5, 1  ;;  %v3196_v60 = vsel %vm573_vm2, %v588_v30, %v589_v19  ;;  %v622_v4 = vrot.slane %v3042_v24, 1 }
  0x5d   : > { %5377 = vst [vmem:[#allocation77_spill] sm:$0xff] %v3148_v22  ;;  %5378 = vst [vmem:[#allocation78_spill] sm:$0xff] %v3151_v12  ;;  %v3207_v0 = vsel %vm573_vm2, %v597_v29, %v598_v25  ;;  %v3230_v29 = vld [vmem:[%s5126_s1] sm:$0xff]  ;;  %v3251_v24 = vsel %vm573_vm2, %v589_v19, 0.0 }
  0x5e   : > { %5379 = vst [vmem:[#allocation79_spill] sm:$0xff] %v3154_v33  ;;  %5380 = vst [vmem:[#allocation80_spill] sm:$0xff] %v3157_v32  ;;  %v592_v32 = vrot.slane %v2944_v23, 1 }
  0x5f   : > { %5382 = vst [vmem:[#allocation81_spill] sm:$0xff] %v3162_v15  ;;  %5383 = vst [vmem:[#allocation82_spill] sm:$0xff] %v3166_v28  ;;  %v595_v15 = vrot.slane %v2964_v35, 1  ;;  %v603_v28 = vrot.slane %v3004_v53, 1  ;;  %v610_v35 = vrot.slane %v3007_v54, 1  ;;  %v618_v53 = vrot.slane %v3058_v21, 1 }
  0x60   : > { %5384 = vst [vmem:[#allocation83_spill] sm:$0xff] %v3169_v14  ;;  %5385 = vst [vmem:[#allocation84_spill] sm:$0xff] %v3174_v50  ;;  %v601_v14 = vrot.slane %v2985_v46, 1  ;;  %v607_v50 = vrot.slane %v2991_v48, 1  ;;  %v616_v46 = vrot.slane %v3025_v62, 1  ;;  %v3199_v48 = vsel %vm573_vm2, %v591_v56, %v592_v32 }
  0x61   : > { %5386 = vst [vmem:[#allocation85_spill] sm:$0xff] %v3196_v60  ;;  %5387 = vst [vmem:[#allocation86_spill] sm:$0xff] %v3199_v48  ;;  %v621_v54 = vrot.slane %v3061_v44, 1  ;;  %v3204_v55 = vsel %vm573_vm2, %v594_v17, %v595_v15  ;;  %v3213_v5 = vsel %vm573_vm2, %v603_v28, %v604_v34  ;;  %v3219_v56 = vsel %vm573_vm2, %v609_v40, %v610_v35  ;;  %v5452_v48 = vld [vmem:[#allocation29_spill] sm:$0xff]  ;;  %v5454_v60 = vld [vmem:[#allocation30_spill] sm:$0xff] }
  0x62   : > { %5388 = vst [vmem:[#allocation87_spill] sm:$0xff] %v3204_v55  ;;  %5389 = vst [vmem:[#allocation88_spill] sm:$0xff] %v3207_v0  ;;  %v3210_v21 = vsel %vm573_vm2, %v600_v51, %v601_v14  ;;  %v3216_v30 = vsel %vm573_vm2, %v606_v2, %v607_v50  ;;  %v3222_v44 = vsel %vm573_vm2, %v612_v41, %v613_v36  ;;  %v3225_v17 = vsel %vm573_vm2, %v577_v7, 0.0  ;;  %v5448_v0 = vld [vmem:[#allocation22_spill] sm:$0xff]  ;;  %v5450_v55 = vld [vmem:[#allocation28_spill] sm:$0xff] }
  0x63   : > { %5390 = vst [vmem:[#allocation89_spill] sm:$0xff] %v3210_v21  ;;  %5391 = vst [vmem:[#allocation90_spill] sm:$0xff] %v3213_v5  ;;  %v3233_v28 = vsel %vm573_vm2, %v615_v42, %v616_v46  ;;  %v3236_v51 = vsel %vm573_vm2, %v618_v53, %v619_v47  ;;  %v3239_v40 = vsel %vm573_vm2, %v580_v63, 0.0  ;;  %v3242_v41 = vsel %vm573_vm2, %v583_v52, 0.0  ;;  %v5444_v5 = vld [vmem:[#allocation21_spill] sm:$0xff]  ;;  %v5446_v21 = vld [vmem:[#allocation18_spill] sm:$0xff] }
  0x64   : > { %5392 = vst [vmem:[#allocation91_spill] sm:$0xff] %v3216_v30  ;;  %5393 = vst [vmem:[#allocation92_spill] sm:$0xff] %v3219_v56  ;;  %v3245_v7 = vsel %vm573_vm2, %v621_v54, %v622_v4  ;;  %v3248_v2 = vsel %vm573_vm2, %v586_v3, 0.0  ;;  %v3254_v42 = vsel %vm573_vm2, %v592_v32, 0.0  ;;  %v3257_v53 = vsel %vm573_vm2, %v595_v15, 0.0 }
  0x65   : > { %5394 = vst [vmem:[#allocation93_spill] sm:$0xff] %v3222_v44  ;;  %5395 = vst [vmem:[#allocation94_spill] sm:$0xff] %v3225_v17  ;;  %v3260_v63 = vsel %vm573_vm2, %v598_v25, 0.0  ;;  %v3263_v52 = vsel %vm573_vm2, %v601_v14, 0.0  ;;  %v5408_v54 = vsub.s32 0, %v2905_v8  ;;  %v3272_v19 = vsel %vm573_vm2, %v607_v50, 0.0 }
  0x66   : > { %5396 = vst [vmem:[#allocation95_spill] sm:$0xff] %v3230_v29  ;;  %5397 = vst [vmem:[#allocation96_spill] sm:$0xff] %v3233_v28  ;;  %v3275_v32 = vsel %vm573_vm2, %v610_v35, 0.0  ;;  %v3278_v15 = vsel %vm573_vm2, %v613_v36, 0.0  ;;  %v3281_v25 = vsel %vm573_vm2, %v616_v46, 0.0  ;;  %v3284_v14 = vsel %vm573_vm2, %v619_v47, 0.0 }
  0x67   : > { %5398 = vst [vmem:[#allocation97_spill] sm:$0xff] %v3236_v51  ;;  %5399 = vst [vmem:[#allocation98_spill] sm:$0xff] %v3239_v40  ;;  %v680_v3 = vrot.slane %v3230_v29, %v5408_v54  ;;  %v3287_v54 = vsel %vm573_vm2, %v622_v4, 0.0  ;;  %v5417_v35 = vsub.s32 2, %v2905_v8  ;;  %v5419_v36 = vsub.s32 3, %v2905_v8  ;;  %v5457_v40 = vld [vmem:[#allocation39_spill] sm:$0xff] }
  0x68   : > { %5400 = vst [vmem:[#allocation99_spill] sm:$0xff] %v3242_v41  ;;  %5401 = vst [vmem:[#allocation100_spill] sm:$0xff] %v3245_v7  ;;  %v3269_v7 = vsel %vm573_vm2, %v604_v34, 0.0  ;;  %v5416_v34 = vsub.s32 1, %v2905_v8  ;;  %v5421_v47 = vsub.s32 4, %v2905_v8  ;;  %v5456_v41 = vld [vmem:[#allocation34_spill] sm:$0xff] }
  0x69   : > { %5402 = vst [vmem:[#allocation101_spill] sm:$0xff] %v3248_v2  ;;  %5403 = vst [vmem:[#allocation102_spill] sm:$0xff] %v3251_v24  ;;  %v3297_v51 = vrot.slane %v3230_v29, %v5417_v35  ;;  %v3302_v46 = vrot.slane %v3230_v29, %v5419_v36  ;;  %v3318_v35 = vmul.f32 %v680_v3, %v2900_v6  ;;  %v5453_v24 = vld [vmem:[#allocation32_spill] sm:$0xff]  ;;  %v5455_v2 = vld [vmem:[#allocation33_spill] sm:$0xff] }
  0x6a   : > { %5404 = vst [vmem:[#allocation103_spill] sm:$0xff] %v3254_v42  ;;  %5405 = vst [vmem:[#allocation104_spill] sm:$0xff] %v3257_v53  ;;  %v3292_v50 = vrot.slane %v3230_v29, %v5416_v34  ;;  %v3307_v4 = vrot.slane %v3230_v29, %v5421_v47  ;;  %v3324_v36 = vmul.f32 %v680_v3, %v2996_v49  ;;  %v5449_v53 = vld [vmem:[#allocation27_spill] sm:$0xff] }
  0x6b   : > { %5406 = vst [vmem:[#allocation105_spill] sm:$0xff] %v3260_v63  ;;  %5407 = vst [vmem:[#allocation106_spill] sm:$0xff] %v3263_v52  ;;  %v3327_v47 = vmul.f32 %v680_v3, %v3102_v59  ;;  %v3339_v6 = vmul.f32 %v680_v3, %v3114_v45  ;;  %v3345_v49 = vmul.f32 %v680_v3, %v3117_v31  ;;  %v5428_v59 = vld [vmem:[#allocation47_spill] sm:$0xff]  ;;  %v5431_v31 = vld [vmem:[#allocation56_spill] sm:$0xff] }
  0x6c   : > { %5409 = vst [vmem:[#allocation107_spill] sm:$0xff] %v3269_v7  ;;  %5410 = vst [vmem:[#allocation108_spill] sm:$0xff] %v3272_v19  ;;  %v5430_v45 = vld [vmem:[#allocation55_spill] sm:$0xff]  ;;  %v3366_v44 = vmul.f32 %v680_v3, %v5431_v31  ;;  %v3387_v31 = vmul.f32 %v680_v3, %v3145_v16  ;;  %v5441_v16 = vld [vmem:[#allocation66_spill] sm:$0xff] }
  0x6d   : > { %5411 = vst [vmem:[#allocation109_spill] sm:$0xff] %v3275_v32  ;;  %5412 = vst [vmem:[#allocation110_spill] sm:$0xff] %v3278_v15  ;;  %v3360_v15 = vmul.f32 %v680_v3, %v5430_v45  ;;  %v3381_v45 = vmul.f32 %v680_v3, %v3142_v9  ;;  %v5438_v9 = vld [vmem:[#allocation62_spill] sm:$0xff]  ;;  %v3408_v30 = vmul.f32 %v680_v3, %v5441_v16  ;;  %v5443_v7 = vld [vmem:[#allocation15_spill] sm:$0xff] }
  0x6e   : > { %5413 = vst [vmem:[#allocation111_spill] sm:$0xff] %v3281_v25  ;;  %5414 = vst [vmem:[#allocation112_spill] sm:$0xff] %v3284_v14  ;;  %v3315_v14 = vmul.f32 %v680_v3, %v2921_v13  ;;  %v3321_v25 = vmul.f32 %v680_v3, %v3099_v39  ;;  %v5426_v13 = vld [vmem:[#allocation42_spill] sm:$0xff]  ;;  %v3402_v19 = vmul.f32 %v680_v3, %v5438_v9  ;;  %v5445_v52 = vld [vmem:[#allocation24_spill] sm:$0xff] }
  0x6f   : > { %5415 = vst [vmem:[#allocation113_spill] sm:$0xff] %v3287_v54  ;;  %5418 = vst [vmem:[#allocation114_spill] sm:$0xff] %v3297_v51  ;;  %v5423_v54 = vsub.s32 5, %v2905_v8  ;;  %v721_v9 = vmul.f32 %v3292_v50, %v2911_v10  ;;  %v5447_v16 = vld [vmem:[#allocation26_spill] sm:$0xff]  ;;  %v728_v10 = vmul.f32 %v3292_v50, %v5450_v55  ;;  %v5451_v42 = vld [vmem:[#allocation31_spill] sm:$0xff]  ;;  %v735_v55 = vmul.f32 %v3292_v50, %v5456_v41 }
  0x70   : > { %5420 = vst [vmem:[#allocation115_spill] sm:$0xff] %v3302_v46  ;;  %5422 = vst [vmem:[#allocation116_spill] sm:$0xff] %v3307_v4  ;;  %v5425_v4 = vld [vmem:[#allocation38_spill] sm:$0xff]  ;;  %v3348_v46 = vmul.f32 %v680_v3, %v5428_v59  ;;  %v3369_v59 = vmul.f32 %v680_v3, %v3134_v26  ;;  %v3390_v26 = vmul.f32 %v680_v3, %v3086_v20  ;;  %v717_v20 = vmul.f32 0.0, %v3292_v50  ;;  %v5458_v17 = vld [vmem:[#allocation35_spill] sm:$0xff] }
  0x71   : > { %v3312_v34 = vrot.slane %v3230_v29, %v5423_v54  ;;  %v3330_v8 = vmul.f32 %v680_v3, %v5425_v4  ;;  %v3333_v54 = vmul.f32 %v680_v3, %v3105_v27  ;;  %v3336_v29 = vmul.f32 %v680_v3, %v5426_v13  ;;  %v5429_v27 = vld [vmem:[#allocation51_spill] sm:$0xff]  ;;  %5439 = vst [vmem:[#allocation122_spill] sm:$0xff] %v3402_v19  ;;  %v5462_v19 = vld [vmem:[#allocation48_spill] sm:$0xff] }
  0x72   : > { %v3351_v4 = vmul.f32 %v680_v3, %v3120_v38  ;;  %v3354_v28 = vmul.f32 %v680_v3, %v5429_v27  ;;  %v3357_v13 = vmul.f32 %v680_v3, %v3123_v37  ;;  %v3372_v38 = vmul.f32 %v680_v3, %v3076_v1  ;;  %5433 = vst [vmem:[#allocation118_spill] sm:$0xff] %v3390_v26  ;;  %v5459_v51 = vld [vmem:[#allocation43_spill] sm:$0xff]  ;;  %v5466_v26 = vld [vmem:[#allocation49_spill] sm:$0xff] }
  0x73   : > { %5424 = vst [vmem:[#allocation117_spill] sm:$0xff] %v3312_v34  ;;  %v5427_v34 = vld [vmem:[#allocation46_spill] sm:$0xff]  ;;  %v3375_v27 = vmul.f32 %v680_v3, %v3137_v57  ;;  %v3378_v37 = vmul.f32 %v680_v3, %v3079_v58  ;;  %v3393_v1 = vmul.f32 %v680_v3, %v3148_v22  ;;  %v5435_v57 = vld [vmem:[#allocation61_spill] sm:$0xff]  ;;  %v3399_v58 = vmul.f32 %v680_v3, %v3151_v12 }
  0x74   : > { %v3342_v39 = vmul.f32 %v680_v3, %v5427_v34  ;;  %v3363_v34 = vmul.f32 %v680_v3, %v3126_v43  ;;  %v5432_v43 = vld [vmem:[#allocation59_spill] sm:$0xff]  ;;  %v3396_v56 = vmul.f32 %v680_v3, %v5435_v57  ;;  %5442 = vst [vmem:[#allocation124_spill] sm:$0xff] %v3408_v30  ;;  %v718_v22 = vmul.f32 %v3292_v50, %v2914_v11  ;;  %v5460_v30 = vld [vmem:[#allocation36_spill] sm:$0xff] }
  0x75   : > { %v3384_v32 = vmul.f32 %v680_v3, %v5432_v43  ;;  %5434 = vst [vmem:[#allocation119_spill] sm:$0xff] %v3393_v1  ;;  %5437 = vst [vmem:[#allocation121_spill] sm:$0xff] %v3399_v58  ;;  %v3405_v43 = vmul.f32 %v680_v3, %v3154_v33  ;;  %v719_v57 = vmul.f32 %v3292_v50, %v5443_v7  ;;  %v5463_v58 = vld [vmem:[#allocation41_spill] sm:$0xff] }
  0x76   : > { %5436 = vst [vmem:[#allocation120_spill] sm:$0xff] %v3396_v56  ;;  %v720_v12 = vmul.f32 %v3292_v50, %v5444_v5  ;;  %v722_v33 = vmul.f32 %v3292_v50, %v5445_v52  ;;  %v723_v3 = vmul.f32 %v3292_v50, %v5446_v21  ;;  %v724_v63 = vmul.f32 %v3292_v50, %v5447_v16  ;;  %v5464_v56 = vld [vmem:[#allocation52_spill] sm:$0xff]  ;;  %v5465_v1 = vld [vmem:[#allocation53_spill] sm:$0xff] }
  0x77   : > { %5440 = vst [vmem:[#allocation123_spill] sm:$0xff] %v3405_v43  ;;  %v725_v11 = vmul.f32 %v3292_v50, %v5448_v0  ;;  %v726_v7 = vmul.f32 %v3292_v50, %v5449_v53  ;;  %v727_v5 = vmul.f32 %v3292_v50, %v2935_v18  ;;  %v729_v52 = vmul.f32 %v3292_v50, %v2944_v23  ;;  %v5461_v43 = vld [vmem:[#allocation40_spill] sm:$0xff] }
  0x78   : > { %v730_v21 = vmul.f32 %v3292_v50, %v5451_v42  ;;  %v731_v16 = vmul.f32 %v3292_v50, %v5452_v48  ;;  %v732_v0 = vmul.f32 %v3292_v50, %v5453_v24  ;;  %v733_v53 = vmul.f32 %v3292_v50, %v5454_v60 }
  0x79   : > { %v734_v18 = vmul.f32 %v3292_v50, %v5455_v2  ;;  %v736_v23 = vmul.f32 %v3292_v50, %v5457_v40  ;;  %v737_v42 = vmul.f32 %v3292_v50, %v5458_v17  ;;  %v738_v48 = vmul.f32 %v3292_v50, %v5459_v51 }
  0x7a   : > { %v739_v24 = vmul.f32 %v3292_v50, %v5460_v30  ;;  %v740_v60 = vmul.f32 %v3292_v50, %v3022_v61  ;;  %v741_v2 = vmul.f32 %v3292_v50, %v5461_v43  ;;  %v742_v41 = vmul.f32 %v3292_v50, %v5462_v19 }
  0x7b   : > { %v743_v40 = vmul.f32 %v3292_v50, %v5463_v58  ;;  %v744_v17 = vmul.f32 %v3292_v50, %v5464_v56  ;;  %v745_v51 = vmul.f32 %v3292_v50, %v3025_v62  ;;  %v746_v30 = vmul.f32 %v3292_v50, %v5465_v1 }
  0x7c   : > { %v747_v61 = vmul.f32 %v3292_v50, %v5466_v26  ;;  %v3472_v43 = vadd.f32 %v717_v20, %v3315_v14  ;;  %v3475_v19 = vadd.f32 %v717_v20, %v3318_v35  ;;  %v3478_v58 = vadd.f32 %v718_v22, %v3321_v25  ;;  %v5490_v25 = vld [vmem:[#allocation99_spill] sm:$0xff]  ;;  %v5492_v35 = vld [vmem:[#allocation101_spill] sm:$0xff]  ;;  %v5506_v26 = vld [vmem:[#allocation108_spill] sm:$0xff] }
  0x7d   : > { %v3481_v56 = vadd.f32 %v719_v57, %v3324_v36  ;;  %v3484_v62 = vadd.f32 %v720_v12, %v3327_v47  ;;  %v3487_v1 = vadd.f32 %v721_v9, %v3330_v8  ;;  %v3490_v50 = vadd.f32 %v722_v33, %v3333_v54  ;;  %v5493_v47 = vld [vmem:[#allocation85_spill] sm:$0xff] }
  0x7e   : > { %v3493_v14 = vadd.f32 %v723_v3, %v3336_v29  ;;  %v3496_v20 = vadd.f32 %v724_v63, %v3339_v6  ;;  %v3499_v22 = vadd.f32 %v725_v11, %v3342_v39  ;;  %v3502_v57 = vadd.f32 %v726_v7, %v3345_v49  ;;  %v5483_v7 = vld [vmem:[#allocation114_spill] sm:$0xff] }
  0x7f   : > { %v3505_v12 = vadd.f32 %v727_v5, %v3348_v46  ;;  %v3508_v8 = vadd.f32 %v728_v10, %v3351_v4  ;;  %v3511_v9 = vadd.f32 %v729_v52, %v3354_v28  ;;  %v3514_v33 = vadd.f32 %v730_v21, %v3357_v13  ;;  %v5482_v28 = vld [vmem:[#allocation13_spill] sm:$0xff]  ;;  %v5491_v4 = vld [vmem:[#allocation84_spill] sm:$0xff]  ;;  %v5494_v3 = vld [vmem:[#allocation102_spill] sm:$0xff] }
  0x80   : > { %v3517_v6 = vadd.f32 %v731_v16, %v3360_v15  ;;  %v3520_v11 = vadd.f32 %v732_v0, %v3363_v34  ;;  %v3523_v49 = vadd.f32 %v733_v53, %v3366_v44  ;;  %v3526_v5 = vadd.f32 %v734_v18, %v3369_v59  ;;  %v5468_v18 = vld [vmem:[#allocation118_spill] sm:$0xff] }
  0x81   : > { %v3529_v10 = vadd.f32 %v735_v55, %v3372_v38  ;;  %v3532_v39 = vadd.f32 %v736_v23, %v3375_v27  ;;  %v3535_v13 = vadd.f32 %v737_v42, %v3378_v37  ;;  %v3538_v16 = vadd.f32 %v738_v48, %v3381_v45  ;;  %v5470_v55 = vld [vmem:[#allocation119_spill] sm:$0xff]  ;;  %v5472_v23 = vld [vmem:[#allocation120_spill] sm:$0xff]  ;;  %v5474_v38 = vld [vmem:[#allocation121_spill] sm:$0xff] }
  0x82   : > { %v3541_v0 = vadd.f32 %v739_v24, %v3384_v32  ;;  %v3544_v21 = vadd.f32 %v740_v60, %v3387_v31  ;;  %v3547_v44 = vadd.f32 %v741_v2, %v5468_v18  ;;  %v3550_v59 = vadd.f32 %v742_v41, %v5470_v55  ;;  %v5476_v48 = vld [vmem:[#allocation122_spill] sm:$0xff]  ;;  %v5478_v24 = vld [vmem:[#allocation123_spill] sm:$0xff]  ;;  %v5480_v60 = vld [vmem:[#allocation124_spill] sm:$0xff] }
  0x83   : > { %v3553_v27 = vadd.f32 %v743_v40, %v5472_v23  ;;  %v3556_v37 = vadd.f32 %v744_v17, %v5474_v38  ;;  %v3559_v45 = vadd.f32 %v745_v51, %v5476_v48  ;;  %v3562_v29 = vadd.f32 %v746_v30, %v5478_v24  ;;  %v5484_v41 = vld [vmem:[#allocation20_spill] sm:$0xff]  ;;  %v5485_v40 = vld [vmem:[#allocation81_spill] sm:$0xff]  ;;  %v5486_v17 = vld [vmem:[#allocation94_spill] sm:$0xff] }
  0x84   : > { %5467 = vst [vmem:[#allocation125_spill] sm:$0xff] %v3544_v21  ;;  %5469 = vst [vmem:[#allocation118_spill] sm:$0xff] %v3547_v44  ;;  %v3565_v31 = vadd.f32 %v747_v61, %v5480_v60  ;;  %v784_v2 = vmul.f32 %v5483_v7, %v5482_v28  ;;  %v785_v42 = vmul.f32 %v5483_v7, %v5484_v41  ;;  %v5487_v51 = vld [vmem:[#allocation82_spill] sm:$0xff]  ;;  %v5489_v61 = vld [vmem:[#allocation83_spill] sm:$0xff] }
  0x85   : > { %5471 = vst [vmem:[#allocation119_spill] sm:$0xff] %v3550_v59  ;;  %5473 = vst [vmem:[#allocation120_spill] sm:$0xff] %v3553_v27  ;;  %v786_v53 = vmul.f32 %v5483_v7, %v5485_v40  ;;  %v787_v63 = vmul.f32 %v5483_v7, %v5486_v17  ;;  %v788_v52 = vmul.f32 %v5483_v7, %v5487_v51  ;;  %v5488_v30 = vld [vmem:[#allocation98_spill] sm:$0xff]  ;;  %v5496_v38 = vld [vmem:[#allocation103_spill] sm:$0xff] }
  0x86   : > { %5475 = vst [vmem:[#allocation121_spill] sm:$0xff] %v3556_v37  ;;  %5477 = vst [vmem:[#allocation122_spill] sm:$0xff] %v3559_v45  ;;  %v789_v32 = vmul.f32 %v5483_v7, %v5488_v30  ;;  %v790_v15 = vmul.f32 %v5483_v7, %v5489_v61  ;;  %v791_v46 = vmul.f32 %v5483_v7, %v5490_v25  ;;  %v5495_v55 = vld [vmem:[#allocation86_spill] sm:$0xff]  ;;  %v5497_v24 = vld [vmem:[#allocation87_spill] sm:$0xff] }
  0x87   : > { %5479 = vst [vmem:[#allocation123_spill] sm:$0xff] %v3562_v29  ;;  %5481 = vst [vmem:[#allocation124_spill] sm:$0xff] %v3565_v31  ;;  %v792_v34 = vmul.f32 %v5483_v7, %v5491_v4  ;;  %v793_v36 = vmul.f32 %v5483_v7, %v5492_v35  ;;  %v794_v54 = vmul.f32 %v5483_v7, %v5493_v47  ;;  %v5498_v41 = vld [vmem:[#allocation104_spill] sm:$0xff]  ;;  %v5500_v25 = vld [vmem:[#allocation105_spill] sm:$0xff] }
  0x88   : > { %v795_v18 = vmul.f32 %v5483_v7, %v5494_v3  ;;  %v796_v23 = vmul.f32 %v5483_v7, %v5495_v55  ;;  %v797_v48 = vmul.f32 %v5483_v7, %v5496_v38  ;;  %v798_v60 = vmul.f32 %v5483_v7, %v5497_v24  ;;  %v5499_v4 = vld [vmem:[#allocation88_spill] sm:$0xff]  ;;  %v5501_v61 = vld [vmem:[#allocation89_spill] sm:$0xff]  ;;  %v5502_v30 = vld [vmem:[#allocation106_spill] sm:$0xff] }
  0x89   : > { %v799_v28 = vmul.f32 %v5483_v7, %v5498_v41  ;;  %v800_v35 = vmul.f32 %v5483_v7, %v5499_v4  ;;  %v801_v47 = vmul.f32 %v5483_v7, %v5500_v25  ;;  %v802_v3 = vmul.f32 %v5483_v7, %v5501_v61  ;;  %v5503_v51 = vld [vmem:[#allocation90_spill] sm:$0xff]  ;;  %v5504_v17 = vld [vmem:[#allocation107_spill] sm:$0xff]  ;;  %v5507_v31 = vld [vmem:[#allocation92_spill] sm:$0xff] }
  0x8a   : > { %v803_v55 = vmul.f32 %v5483_v7, %v5502_v30  ;;  %v804_v38 = vmul.f32 %v5483_v7, %v5503_v51  ;;  %v805_v24 = vmul.f32 %v5483_v7, %v5504_v17  ;;  %v5505_v40 = vld [vmem:[#allocation91_spill] sm:$0xff]  ;;  %v807_v4 = vmul.f32 %v5483_v7, %v5506_v26  ;;  %v5508_v29 = vld [vmem:[#allocation109_spill] sm:$0xff]  ;;  %v5510_v37 = vld [vmem:[#allocation110_spill] sm:$0xff] }
  0x8b   : > { %v806_v41 = vmul.f32 %v5483_v7, %v5505_v40  ;;  %v808_v25 = vmul.f32 %v5483_v7, %v5507_v31  ;;  %v809_v61 = vmul.f32 %v5483_v7, %v5508_v29  ;;  %v5509_v45 = vld [vmem:[#allocation93_spill] sm:$0xff]  ;;  %v811_v51 = vmul.f32 %v5483_v7, %v5510_v37  ;;  %v5511_v27 = vld [vmem:[#allocation96_spill] sm:$0xff]  ;;  %v5512_v59 = vld [vmem:[#allocation111_spill] sm:$0xff] }
  0x8c   : > { %v810_v30 = vmul.f32 %v5483_v7, %v5509_v45  ;;  %v812_v17 = vmul.f32 %v5483_v7, %v5511_v27  ;;  %v813_v40 = vmul.f32 %v5483_v7, %v5512_v59  ;;  %v5513_v44 = vld [vmem:[#allocation97_spill] sm:$0xff]  ;;  %v5514_v21 = vld [vmem:[#allocation112_spill] sm:$0xff]  ;;  %v3632_v29 = vadd.f32 %v784_v2, %v3472_v43 }
  0x8d   : > { %v814_v26 = vmul.f32 %v5483_v7, %v5513_v44  ;;  %v815_v31 = vmul.f32 %v5483_v7, %v5514_v21  ;;  %v3635_v45 = vadd.f32 %v785_v42, %v3475_v19  ;;  %v3638_v37 = vadd.f32 %v786_v53, %v3478_v58  ;;  %v5559_v21 = vld [vmem:[#allocation59_spill] sm:$0xff] }
  0x8e   : > { %v3641_v27 = vadd.f32 %v787_v63, %v3481_v56  ;;  %v3644_v59 = vadd.f32 %v788_v52, %v3484_v62  ;;  %v3647_v44 = vadd.f32 %v789_v32, %v3487_v1  ;;  %v3650_v7 = vadd.f32 %v790_v15, %v3490_v50  ;;  %v5533_v32 = vld [vmem:[#allocation124_spill] sm:$0xff] }
  0x8f   : > { %v3653_v43 = vadd.f32 %v791_v46, %v3493_v14  ;;  %v3656_v19 = vadd.f32 %v792_v34, %v3496_v20  ;;  %v3659_v58 = vadd.f32 %v793_v36, %v3499_v22  ;;  %v3662_v56 = vadd.f32 %v794_v54, %v3502_v57  ;;  %v5537_v34 = vld [vmem:[#allocation37_spill] sm:$0xff]  ;;  %v5539_v36 = vld [vmem:[#allocation38_spill] sm:$0xff] }
  0x90   : > { %v3665_v62 = vadd.f32 %v795_v18, %v3505_v12  ;;  %v3668_v1 = vadd.f32 %v796_v23, %v3508_v8  ;;  %v3671_v50 = vadd.f32 %v797_v48, %v3511_v9  ;;  %v3674_v14 = vadd.f32 %v798_v60, %v3514_v33  ;;  %v5541_v54 = vld [vmem:[#allocation42_spill] sm:$0xff] }
  0x91   : > { %v3677_v20 = vadd.f32 %v799_v28, %v3517_v6  ;;  %v3680_v22 = vadd.f32 %v800_v35, %v3520_v11  ;;  %v3683_v57 = vadd.f32 %v801_v47, %v3523_v49  ;;  %v3686_v12 = vadd.f32 %v802_v3, %v3526_v5  ;;  %v5519_v49 = vld [vmem:[#allocation125_spill] sm:$0xff]  ;;  %v5521_v5 = vld [vmem:[#allocation118_spill] sm:$0xff]  ;;  %v5538_v35 = vld [vmem:[#allocation64_spill] sm:$0xff] }
  0x92   : > { %v3689_v8 = vadd.f32 %v803_v55, %v3529_v10  ;;  %v3692_v9 = vadd.f32 %v804_v38, %v3532_v39  ;;  %v3695_v33 = vadd.f32 %v805_v24, %v3535_v13  ;;  %v3698_v6 = vadd.f32 %v806_v41, %v3538_v16  ;;  %v5523_v10 = vld [vmem:[#allocation119_spill] sm:$0xff]  ;;  %v5525_v39 = vld [vmem:[#allocation120_spill] sm:$0xff]  ;;  %v5527_v13 = vld [vmem:[#allocation121_spill] sm:$0xff] }
  0x93   : > { %v3701_v11 = vadd.f32 %v807_v4, %v3541_v0  ;;  %v3704_v28 = vadd.f32 %v808_v25, %v5519_v49  ;;  %v3707_v2 = vadd.f32 %v809_v61, %v5521_v5  ;;  %v3710_v42 = vadd.f32 %v810_v30, %v5523_v10  ;;  %v5529_v16 = vld [vmem:[#allocation122_spill] sm:$0xff]  ;;  %v5531_v0 = vld [vmem:[#allocation123_spill] sm:$0xff]  ;;  %v5540_v47 = vld [vmem:[#allocation65_spill] sm:$0xff] }
  0x94   : > { %5515 = vst [vmem:[#allocation114_spill] sm:$0xff] %v3692_v9  ;;  %5516 = vst [vmem:[#allocation126_spill] sm:$0xff] %v3695_v33  ;;  %v3713_v53 = vadd.f32 %v811_v51, %v5525_v39  ;;  %v3716_v63 = vadd.f32 %v812_v17, %v5527_v13  ;;  %v3719_v41 = vadd.f32 %v813_v40, %v5529_v16  ;;  %v5534_v25 = vld [vmem:[#allocation67_spill] sm:$0xff]  ;;  %v5542_v3 = vld [vmem:[#allocation68_spill] sm:$0xff] }
  0x95   : > { %5517 = vst [vmem:[#allocation127_spill] sm:$0xff] %v3698_v6  ;;  %5518 = vst [vmem:[#allocation128_spill] sm:$0xff] %v3701_v11  ;;  %v3722_v52 = vadd.f32 %v814_v26, %v5531_v0  ;;  %v847_v15 = vadd.f32 %v815_v31, %v5533_v32  ;;  %v5535_v61 = vld [vmem:[#allocation115_spill] sm:$0xff]  ;;  %v5543_v55 = vld [vmem:[#allocation46_spill] sm:$0xff] }
  0x96   : > { %5520 = vst [vmem:[#allocation125_spill] sm:$0xff] %v3704_v28  ;;  %5522 = vst [vmem:[#allocation118_spill] sm:$0xff] %v3707_v2  ;;  %v883_v46 = vmul.f32 %v5535_v61, %v5534_v25  ;;  %v5536_v4 = vld [vmem:[#allocation63_spill] sm:$0xff]  ;;  %v853_v51 = vmul.f32 %v5535_v61, %v5537_v34  ;;  %v854_v17 = vmul.f32 %v5535_v61, %v5538_v35  ;;  %v5544_v38 = vld [vmem:[#allocation69_spill] sm:$0xff] }
  0x97   : > { %5524 = vst [vmem:[#allocation119_spill] sm:$0xff] %v3710_v42  ;;  %5526 = vst [vmem:[#allocation120_spill] sm:$0xff] %v3713_v53  ;;  %v852_v30 = vmul.f32 %v5535_v61, %v5536_v4  ;;  %v855_v40 = vmul.f32 %v5535_v61, %v5539_v36  ;;  %v856_v26 = vmul.f32 %v5535_v61, %v5540_v47  ;;  %v5545_v24 = vld [vmem:[#allocation47_spill] sm:$0xff]  ;;  %v5546_v49 = vld [vmem:[#allocation70_spill] sm:$0xff] }
  0x98   : > { %5528 = vst [vmem:[#allocation121_spill] sm:$0xff] %v3716_v63  ;;  %5530 = vst [vmem:[#allocation122_spill] sm:$0xff] %v3719_v41  ;;  %v857_v31 = vmul.f32 %v5535_v61, %v5541_v54  ;;  %v858_v18 = vmul.f32 %v5535_v61, %v5542_v3  ;;  %v859_v23 = vmul.f32 %v5535_v61, %v5543_v55  ;;  %v5547_v10 = vld [vmem:[#allocation51_spill] sm:$0xff]  ;;  %v5550_v34 = vld [vmem:[#allocation50_spill] sm:$0xff] }
  0x99   : > { %5532 = vst [vmem:[#allocation123_spill] sm:$0xff] %v3722_v52  ;;  %v860_v48 = vmul.f32 %v5535_v61, %v5544_v38  ;;  %v861_v60 = vmul.f32 %v5535_v61, %v5545_v24  ;;  %v862_v5 = vmul.f32 %v5535_v61, %v5546_v49  ;;  %v863_v39 = vmul.f32 %v5535_v61, %v5547_v10  ;;  %v5548_v13 = vld [vmem:[#allocation71_spill] sm:$0xff]  ;;  %v5551_v55 = vld [vmem:[#allocation116_spill] sm:$0xff]  ;;  %v5554_v49 = vld [vmem:[#allocation73_spill] sm:$0xff] }
  0x9a   : > { %v864_v16 = vmul.f32 %v5535_v61, %v5548_v13  ;;  %v5549_v0 = vld [vmem:[#allocation55_spill] sm:$0xff]  ;;  %v915_v4 = vadd.f32 %v883_v46, %v847_v15  ;;  %v951_v3 = vmul.f32 %v5551_v55, %v5550_v34  ;;  %v5552_v38 = vld [vmem:[#allocation72_spill] sm:$0xff]  ;;  %v868_v36 = vmul.f32 %v5535_v61, %v5554_v49  ;;  %v5555_v10 = vld [vmem:[#allocation57_spill] sm:$0xff] }
  0x9b   : > { %v865_v32 = vmul.f32 %v5535_v61, %v5549_v0  ;;  %v866_v54 = vmul.f32 %v5535_v61, %v5552_v38  ;;  %v5553_v24 = vld [vmem:[#allocation56_spill] sm:$0xff]  ;;  %v869_v35 = vmul.f32 %v5535_v61, %v5555_v10  ;;  %v5556_v13 = vld [vmem:[#allocation74_spill] sm:$0xff]  ;;  %v5558_v46 = vld [vmem:[#allocation75_spill] sm:$0xff]  ;;  %v873_v38 = vmul.f32 %v5535_v61, %v5559_v21 }
  0x9c   : > { %v867_v47 = vmul.f32 %v5535_v61, %v5553_v24  ;;  %v870_v25 = vmul.f32 %v5535_v61, %v5556_v13  ;;  %v5557_v0 = vld [vmem:[#allocation58_spill] sm:$0xff]  ;;  %v872_v34 = vmul.f32 %v5535_v61, %v5558_v46  ;;  %v5560_v55 = vld [vmem:[#allocation76_spill] sm:$0xff]  ;;  %v5562_v41 = vld [vmem:[#allocation77_spill] sm:$0xff]  ;;  %v983_v2 = vadd.f32 %v951_v3, %v915_v4 }
  0x9d   : > { %v871_v15 = vmul.f32 %v5535_v61, %v5557_v0  ;;  %v874_v24 = vmul.f32 %v5535_v61, %v5560_v55  ;;  %v5561_v52 = vld [vmem:[#allocation60_spill] sm:$0xff]  ;;  %v876_v10 = vmul.f32 %v5535_v61, %v5562_v41  ;;  %v5563_v63 = vld [vmem:[#allocation61_spill] sm:$0xff]  ;;  %v5564_v53 = vld [vmem:[#allocation78_spill] sm:$0xff]  ;;  %v3800_v3 = vadd.f32 %v854_v17, %v3638_v37 }
  0x9e   : > { %v875_v49 = vmul.f32 %v5535_v61, %v5561_v52  ;;  %v877_v13 = vmul.f32 %v5535_v61, %v5563_v63  ;;  %v878_v0 = vmul.f32 %v5535_v61, %v5564_v53  ;;  %v5565_v42 = vld [vmem:[#allocation62_spill] sm:$0xff]  ;;  %v5566_v21 = vld [vmem:[#allocation113_spill] sm:$0xff]  ;;  %v5568_v55 = vld [vmem:[#allocation79_spill] sm:$0xff]  ;;  %v3794_v63 = vadd.f32 %v852_v30, %v3632_v29 }
  0x9f   : > { %v879_v46 = vmul.f32 %v5535_v61, %v5565_v42  ;;  %v5567_v28 = vld [vmem:[#allocation117_spill] sm:$0xff]  ;;  %v880_v6 = vmul.f32 %v5535_v61, %v5568_v55  ;;  %v5569_v52 = vld [vmem:[#allocation66_spill] sm:$0xff]  ;;  %v5570_v41 = vld [vmem:[#allocation80_spill] sm:$0xff]  ;;  %v3797_v53 = vadd.f32 %v853_v51, %v3635_v45  ;;  %v3803_v4 = vadd.f32 %v855_v40, %v3641_v27 }
  0xa0   : > { %v1019_v11 = vmul.f32 %v5567_v28, %v5566_v21  ;;  %v881_v33 = vmul.f32 %v5535_v61, %v5569_v52  ;;  %v882_v9 = vmul.f32 %v5535_v61, %v5570_v41  ;;  %v3806_v55 = vadd.f32 %v856_v26, %v3644_v59  ;;  %v5581_v26 = vld [vmem:[#allocation127_spill] sm:$0xff]  ;;  %v5612_v41 = vld [vmem:[#allocation36_spill] sm:$0xff] }
  0xa1   : > { %v3809_v52 = vadd.f32 %v857_v31, %v3647_v44  ;;  %v3812_v61 = vadd.f32 %v858_v18, %v3650_v7  ;;  %v3815_v29 = vadd.f32 %v859_v23, %v3653_v43  ;;  %v3818_v45 = vadd.f32 %v860_v48, %v3656_v19  ;;  %v5582_v31 = vld [vmem:[#allocation128_spill] sm:$0xff]  ;;  %v5583_v18 = vld [vmem:[#allocation125_spill] sm:$0xff]  ;;  %v5589_v23 = vld [vmem:[#allocation123_spill] sm:$0xff] }
  0xa2   : > { %v3821_v37 = vadd.f32 %v861_v60, %v3659_v58  ;;  %v3824_v27 = vadd.f32 %v862_v5, %v3662_v56  ;;  %v3827_v59 = vadd.f32 %v863_v39, %v3665_v62  ;;  %v3829_v44 = vadd.f32 %v1019_v11, %v983_v2  ;;  %v5579_v62 = vld [vmem:[#allocation114_spill] sm:$0xff]  ;;  %v5590_v60 = vld [vmem:[#allocation17_spill] sm:$0xff]  ;;  %v5613_v42 = vld [vmem:[#allocation44_spill] sm:$0xff] }
  0xa3   : > { %5571 = vst [vmem:[#allocation124_spill] sm:$0xff] %v3809_v52  ;;  %5572 = vst [vmem:[#allocation115_spill] sm:$0xff] %v3812_v61  ;;  %v896_v7 = vadd.f32 %v864_v16, %v3668_v1  ;;  %v897_v30 = vadd.f32 %v865_v32, %v3671_v50  ;;  %v898_v43 = vadd.f32 %v866_v54, %v3674_v14  ;;  %v5580_v11 = vld [vmem:[#allocation126_spill] sm:$0xff]  ;;  %v5593_v39 = vld [vmem:[#allocation21_spill] sm:$0xff] }
  0xa4   : > { %5573 = vst [vmem:[#allocation63_spill] sm:$0xff] %v3815_v29  ;;  %5574 = vst [vmem:[#allocation37_spill] sm:$0xff] %v3818_v45  ;;  %v899_v19 = vadd.f32 %v867_v47, %v3677_v20  ;;  %v900_v51 = vadd.f32 %v868_v36, %v3680_v22  ;;  %v901_v58 = vadd.f32 %v869_v35, %v3683_v57  ;;  %v5584_v54 = vld [vmem:[#allocation118_spill] sm:$0xff]  ;;  %v5585_v47 = vld [vmem:[#allocation119_spill] sm:$0xff] }
  0xa5   : > { %5575 = vst [vmem:[#allocation129_spill] sm:$0xff] %v3821_v37  ;;  %5576 = vst [vmem:[#allocation130_spill] sm:$0xff] %v3824_v27  ;;  %v902_v56 = vadd.f32 %v870_v25, %v3686_v12  ;;  %v903_v17 = vadd.f32 %v871_v15, %v3689_v8  ;;  %v904_v40 = vadd.f32 %v872_v34, %v5579_v62  ;;  %v5586_v36 = vld [vmem:[#allocation120_spill] sm:$0xff]  ;;  %v5587_v35 = vld [vmem:[#allocation121_spill] sm:$0xff] }
  0xa6   : > { %5577 = vst [vmem:[#allocation131_spill] sm:$0xff] %v3827_v59  ;;  %5578 = vst [vmem:[#allocation132_spill] sm:$0xff] %v3829_v44  ;;  %v905_v2 = vadd.f32 %v873_v38, %v5580_v11  ;;  %v906_v1 = vadd.f32 %v874_v24, %v5581_v26  ;;  %v907_v50 = vadd.f32 %v875_v49, %v5582_v31  ;;  %v5588_v25 = vld [vmem:[#allocation122_spill] sm:$0xff]  ;;  %v5591_v38 = vld [vmem:[#allocation116_spill] sm:$0xff] }
  0xa7   : > { %v908_v14 = vadd.f32 %v876_v10, %v5583_v18  ;;  %v909_v20 = vadd.f32 %v877_v13, %v5584_v54  ;;  %v910_v22 = vadd.f32 %v878_v0, %v5585_v47  ;;  %v911_v57 = vadd.f32 %v879_v46, %v5586_v36  ;;  %v5592_v24 = vld [vmem:[#allocation15_spill] sm:$0xff]  ;;  %v5594_v13 = vld [vmem:[#allocation16_spill] sm:$0xff]  ;;  %v5597_v34 = vld [vmem:[#allocation26_spill] sm:$0xff] }
  0xa8   : > { %v912_v12 = vadd.f32 %v880_v6, %v5587_v35  ;;  %v913_v8 = vadd.f32 %v881_v33, %v5588_v25  ;;  %v914_v48 = vadd.f32 %v882_v9, %v5589_v23  ;;  %v920_v5 = vmul.f32 %v5591_v38, %v5590_v60  ;;  %v5595_v0 = vld [vmem:[#allocation24_spill] sm:$0xff]  ;;  %v5596_v6 = vld [vmem:[#allocation18_spill] sm:$0xff]  ;;  %v5599_v62 = vld [vmem:[#allocation27_spill] sm:$0xff] }
  0xa9   : > { %v921_v49 = vmul.f32 %v5591_v38, %v5592_v24  ;;  %v922_v10 = vmul.f32 %v5591_v38, %v5593_v39  ;;  %v923_v16 = vmul.f32 %v5591_v38, %v5594_v13  ;;  %v924_v32 = vmul.f32 %v5591_v38, %v5595_v0  ;;  %v5598_v15 = vld [vmem:[#allocation22_spill] sm:$0xff]  ;;  %v5600_v26 = vld [vmem:[#allocation23_spill] sm:$0xff]  ;;  %v5601_v18 = vld [vmem:[#allocation28_spill] sm:$0xff] }
  0xaa   : > { %v925_v33 = vmul.f32 %v5591_v38, %v5596_v6  ;;  %v926_v9 = vmul.f32 %v5591_v38, %v5597_v34  ;;  %v927_v46 = vmul.f32 %v5591_v38, %v5598_v15  ;;  %v928_v11 = vmul.f32 %v5591_v38, %v5599_v62  ;;  %v5602_v47 = vld [vmem:[#allocation25_spill] sm:$0xff]  ;;  %v5603_v35 = vld [vmem:[#allocation31_spill] sm:$0xff]  ;;  %v5605_v24 = vld [vmem:[#allocation32_spill] sm:$0xff] }
  0xab   : > { %v929_v31 = vmul.f32 %v5591_v38, %v5600_v26  ;;  %v930_v54 = vmul.f32 %v5591_v38, %v5601_v18  ;;  %v931_v36 = vmul.f32 %v5591_v38, %v5602_v47  ;;  %v932_v25 = vmul.f32 %v5591_v38, %v5603_v35  ;;  %v5604_v23 = vld [vmem:[#allocation29_spill] sm:$0xff]  ;;  %v5606_v13 = vld [vmem:[#allocation30_spill] sm:$0xff]  ;;  %v5609_v26 = vld [vmem:[#allocation39_spill] sm:$0xff] }
  0xac   : > { %v933_v60 = vmul.f32 %v5591_v38, %v5604_v23  ;;  %v934_v39 = vmul.f32 %v5591_v38, %v5605_v24  ;;  %v935_v0 = vmul.f32 %v5591_v38, %v5606_v13  ;;  %v5607_v6 = vld [vmem:[#allocation33_spill] sm:$0xff]  ;;  %v5608_v15 = vld [vmem:[#allocation34_spill] sm:$0xff]  ;;  %v938_v18 = vmul.f32 %v5591_v38, %v5609_v26  ;;  %v5610_v47 = vld [vmem:[#allocation35_spill] sm:$0xff] }
  0xad   : > { %v936_v34 = vmul.f32 %v5591_v38, %v5607_v6  ;;  %v937_v62 = vmul.f32 %v5591_v38, %v5608_v15  ;;  %v939_v35 = vmul.f32 %v5591_v38, %v5610_v47  ;;  %v5611_v44 = vld [vmem:[#allocation43_spill] sm:$0xff]  ;;  %v941_v24 = vmul.f32 %v5591_v38, %v5612_v41  ;;  %v5614_v21 = vld [vmem:[#allocation40_spill] sm:$0xff]  ;;  %v5616_v59 = vld [vmem:[#allocation41_spill] sm:$0xff] }
  0xae   : > { %v940_v23 = vmul.f32 %v5591_v38, %v5611_v44  ;;  %v942_v13 = vmul.f32 %v5591_v38, %v5613_v42  ;;  %v943_v6 = vmul.f32 %v5591_v38, %v5614_v21  ;;  %v5615_v28 = vld [vmem:[#allocation48_spill] sm:$0xff]  ;;  %v945_v26 = vmul.f32 %v5591_v38, %v5616_v59  ;;  %v5618_v37 = vld [vmem:[#allocation45_spill] sm:$0xff]  ;;  %v5621_v61 = vld [vmem:[#allocation54_spill] sm:$0xff] }
  0xaf   : > { %v944_v15 = vmul.f32 %v5591_v38, %v5615_v28  ;;  %v5617_v27 = vld [vmem:[#allocation52_spill] sm:$0xff]  ;;  %v947_v44 = vmul.f32 %v5591_v38, %v5618_v37  ;;  %v5619_v45 = vld [vmem:[#allocation53_spill] sm:$0xff]  ;;  %v950_v21 = vmul.f32 %v5591_v38, %v5621_v61  ;;  %v952_v28 = vadd.f32 %v920_v5, %v3794_v63  ;;  %v5624_v5 = vld [vmem:[#allocation63_spill] sm:$0xff] }
  0xb0   : > { %v946_v47 = vmul.f32 %v5591_v38, %v5617_v27  ;;  %v948_v41 = vmul.f32 %v5591_v38, %v5619_v45  ;;  %v5620_v29 = vld [vmem:[#allocation49_spill] sm:$0xff]  ;;  %v953_v52 = vadd.f32 %v921_v49, %v3797_v53  ;;  %v954_v59 = vadd.f32 %v922_v10, %v3800_v3  ;;  %v5622_v45 = vld [vmem:[#allocation124_spill] sm:$0xff] }
  0xb1   : > { %v949_v42 = vmul.f32 %v5591_v38, %v5620_v29  ;;  %v955_v27 = vadd.f32 %v923_v16, %v3803_v4  ;;  %v956_v37 = vadd.f32 %v924_v32, %v3806_v55  ;;  %v957_v29 = vadd.f32 %v925_v33, %v5622_v45  ;;  %v5623_v38 = vld [vmem:[#allocation115_spill] sm:$0xff]  ;;  %v5625_v49 = vld [vmem:[#allocation37_spill] sm:$0xff]  ;;  %v5627_v4 = vld [vmem:[#allocation130_spill] sm:$0xff] }
  0xb2   : > { %v958_v61 = vadd.f32 %v926_v9, %v5623_v38  ;;  %v959_v63 = vadd.f32 %v927_v46, %v5624_v5  ;;  %v960_v53 = vadd.f32 %v928_v11, %v5625_v49  ;;  %v5626_v3 = vld [vmem:[#allocation129_spill] sm:$0xff]  ;;  %v962_v16 = vadd.f32 %v930_v54, %v5627_v4  ;;  %v5628_v32 = vld [vmem:[#allocation131_spill] sm:$0xff] }
  0xb3   : > { %v961_v10 = vadd.f32 %v929_v31, %v5626_v3  ;;  %v963_v55 = vadd.f32 %v931_v36, %v5628_v32  ;;  %v964_v33 = vadd.f32 %v932_v25, %v896_v7  ;;  %v965_v45 = vadd.f32 %v933_v60, %v897_v30  ;;  %v5647_v60 = vld [vmem:[#allocation101_spill] sm:$0xff] }
  0xb4   : > { %v966_v9 = vadd.f32 %v934_v39, %v898_v43  ;;  %v967_v38 = vadd.f32 %v935_v0, %v899_v19  ;;  %v968_v5 = vadd.f32 %v936_v34, %v900_v51  ;;  %v969_v46 = vadd.f32 %v937_v62, %v901_v58  ;;  %v5639_v58 = vld [vmem:[#allocation81_spill] sm:$0xff]  ;;  %v5649_v62 = vld [vmem:[#allocation102_spill] sm:$0xff] }
  0xb5   : > { %v970_v11 = vadd.f32 %v938_v18, %v902_v56  ;;  %v971_v49 = vadd.f32 %v939_v35, %v903_v17  ;;  %v3924_v3 = vadd.f32 %v940_v23, %v904_v40  ;;  %v3926_v31 = vadd.f32 %v941_v24, %v905_v2  ;;  %v5640_v56 = vld [vmem:[#allocation117_spill] sm:$0xff]  ;;  %v5641_v40 = vld [vmem:[#allocation94_spill] sm:$0xff]  ;;  %v5651_v24 = vld [vmem:[#allocation103_spill] sm:$0xff] }
  0xb6   : > { %v3928_v4 = vadd.f32 %v942_v13, %v906_v1  ;;  %v3930_v54 = vadd.f32 %v943_v6, %v907_v50  ;;  %v3932_v32 = vadd.f32 %v944_v15, %v908_v14  ;;  %v3934_v36 = vadd.f32 %v945_v26, %v909_v20  ;;  %v5642_v1 = vld [vmem:[#allocation82_spill] sm:$0xff]  ;;  %v5648_v0 = vld [vmem:[#allocation85_spill] sm:$0xff]  ;;  %v5652_v6 = vld [vmem:[#allocation87_spill] sm:$0xff] }
  0xb7   : > { %5629 = vst [vmem:[#allocation114_spill] sm:$0xff] %v3926_v31  ;;  %v3936_v7 = vadd.f32 %v946_v47, %v910_v22  ;;  %v3938_v30 = vadd.f32 %v947_v44, %v911_v57  ;;  %v3940_v43 = vadd.f32 %v948_v41, %v912_v12  ;;  %v3942_v19 = vadd.f32 %v949_v42, %v913_v8  ;;  %v5643_v14 = vld [vmem:[#allocation98_spill] sm:$0xff]  ;;  %v5644_v22 = vld [vmem:[#allocation83_spill] sm:$0xff]  ;;  %v5653_v26 = vld [vmem:[#allocation104_spill] sm:$0xff] }
  0xb8   : > { %5630 = vst [vmem:[#allocation126_spill] sm:$0xff] %v3928_v4  ;;  %5631 = vst [vmem:[#allocation127_spill] sm:$0xff] %v3930_v54  ;;  %v3944_v51 = vadd.f32 %v950_v21, %v914_v48  ;;  %v988_v17 = vmul.f32 %v5640_v56, %v5639_v58  ;;  %v989_v2 = vmul.f32 %v5640_v56, %v5641_v40  ;;  %v5645_v12 = vld [vmem:[#allocation99_spill] sm:$0xff]  ;;  %v5646_v48 = vld [vmem:[#allocation84_spill] sm:$0xff] }
  0xb9   : > { %5632 = vst [vmem:[#allocation128_spill] sm:$0xff] %v3932_v32  ;;  %5633 = vst [vmem:[#allocation125_spill] sm:$0xff] %v3934_v36  ;;  %v990_v50 = vmul.f32 %v5640_v56, %v5642_v1  ;;  %v991_v20 = vmul.f32 %v5640_v56, %v5643_v14  ;;  %v992_v57 = vmul.f32 %v5640_v56, %v5644_v22  ;;  %v5650_v35 = vld [vmem:[#allocation86_spill] sm:$0xff]  ;;  %v5654_v44 = vld [vmem:[#allocation88_spill] sm:$0xff] }
  0xba   : > { %5634 = vst [vmem:[#allocation118_spill] sm:$0xff] %v3936_v7  ;;  %5635 = vst [vmem:[#allocation119_spill] sm:$0xff] %v3938_v30  ;;  %v993_v8 = vmul.f32 %v5640_v56, %v5645_v12  ;;  %v994_v25 = vmul.f32 %v5640_v56, %v5646_v48  ;;  %v995_v39 = vmul.f32 %v5640_v56, %v5647_v60  ;;  %v5655_v42 = vld [vmem:[#allocation105_spill] sm:$0xff]  ;;  %v5659_v60 = vld [vmem:[#allocation107_spill] sm:$0xff] }
  0xbb   : > { %5636 = vst [vmem:[#allocation120_spill] sm:$0xff] %v3940_v43  ;;  %5637 = vst [vmem:[#allocation121_spill] sm:$0xff] %v3942_v19  ;;  %v996_v34 = vmul.f32 %v5640_v56, %v5648_v0  ;;  %v997_v18 = vmul.f32 %v5640_v56, %v5649_v62  ;;  %v998_v23 = vmul.f32 %v5640_v56, %v5650_v35  ;;  %v5656_v58 = vld [vmem:[#allocation89_spill] sm:$0xff]  ;;  %v5657_v62 = vld [vmem:[#allocation106_spill] sm:$0xff] }
  0xbc   : > { %5638 = vst [vmem:[#allocation122_spill] sm:$0xff] %v3944_v51  ;;  %v999_v13 = vmul.f32 %v5640_v56, %v5651_v24  ;;  %v1000_v15 = vmul.f32 %v5640_v56, %v5652_v6  ;;  %v1001_v47 = vmul.f32 %v5640_v56, %v5653_v26  ;;  %v1002_v41 = vmul.f32 %v5640_v56, %v5654_v44  ;;  %v5658_v0 = vld [vmem:[#allocation90_spill] sm:$0xff]  ;;  %v5660_v48 = vld [vmem:[#allocation91_spill] sm:$0xff]  ;;  %v5661_v12 = vld [vmem:[#allocation108_spill] sm:$0xff] }
  0xbd   : > { %v1003_v21 = vmul.f32 %v5640_v56, %v5655_v42  ;;  %v1004_v40 = vmul.f32 %v5640_v56, %v5656_v58  ;;  %v1005_v35 = vmul.f32 %v5640_v56, %v5657_v62  ;;  %v1006_v24 = vmul.f32 %v5640_v56, %v5658_v0  ;;  %v5662_v22 = vld [vmem:[#allocation92_spill] sm:$0xff]  ;;  %v5663_v14 = vld [vmem:[#allocation109_spill] sm:$0xff]  ;;  %v5665_v51 = vld [vmem:[#allocation110_spill] sm:$0xff] }
  0xbe   : > { %v1007_v6 = vmul.f32 %v5640_v56, %v5659_v60  ;;  %v1008_v26 = vmul.f32 %v5640_v56, %v5660_v48  ;;  %v1009_v44 = vmul.f32 %v5640_v56, %v5661_v12  ;;  %v1010_v42 = vmul.f32 %v5640_v56, %v5662_v22  ;;  %v5664_v1 = vld [vmem:[#allocation93_spill] sm:$0xff]  ;;  %v5666_v19 = vld [vmem:[#allocation96_spill] sm:$0xff]  ;;  %v5667_v43 = vld [vmem:[#allocation111_spill] sm:$0xff] }
  0xbf   : > { %v1011_v58 = vmul.f32 %v5640_v56, %v5663_v14  ;;  %v1012_v62 = vmul.f32 %v5640_v56, %v5664_v1  ;;  %v1013_v0 = vmul.f32 %v5640_v56, %v5665_v51  ;;  %v1014_v60 = vmul.f32 %v5640_v56, %v5666_v19  ;;  %v5668_v30 = vld [vmem:[#allocation97_spill] sm:$0xff]  ;;  %v5669_v7 = vld [vmem:[#allocation112_spill] sm:$0xff] }
  0xc0   : > { %v1015_v48 = vmul.f32 %v5640_v56, %v5667_v43  ;;  %v1016_v12 = vmul.f32 %v5640_v56, %v5668_v30  ;;  %v1017_v22 = vmul.f32 %v5640_v56, %v5669_v7  ;;  %v5670_v36 = vld [vmem:[#allocation100_spill] sm:$0xff]  ;;  %v4008_v32 = vadd.f32 %v988_v17, %v952_v28 }
  0xc1   : > { %v1018_v14 = vmul.f32 %v5640_v56, %v5670_v36  ;;  %v4010_v1 = vadd.f32 %v989_v2, %v953_v52  ;;  %v4012_v51 = vadd.f32 %v990_v50, %v954_v59  ;;  %v4014_v54 = vadd.f32 %v991_v20, %v955_v27  ;;  %v5684_v2 = vld [vmem:[#allocation128_spill] sm:$0xff]  ;;  %v5686_v20 = vld [vmem:[#allocation125_spill] sm:$0xff] }
  0xc2   : > { %v4016_v19 = vadd.f32 %v992_v57, %v956_v37  ;;  %v4018_v43 = vadd.f32 %v993_v8, %v957_v29  ;;  %v4020_v4 = vadd.f32 %v994_v25, %v958_v61  ;;  %v4022_v30 = vadd.f32 %v995_v39, %v959_v63  ;;  %v5690_v25 = vld [vmem:[#allocation119_spill] sm:$0xff]  ;;  %v5721_v36 = vld [vmem:[#allocation73_spill] sm:$0xff] }
  0xc3   : > { %v4024_v7 = vadd.f32 %v996_v34, %v960_v53  ;;  %v4026_v31 = vadd.f32 %v997_v18, %v961_v10  ;;  %v4028_v28 = vadd.f32 %v998_v23, %v962_v16  ;;  %v4030_v52 = vadd.f32 %v999_v13, %v963_v55  ;;  %v4051_v16 = vld [vmem:[%s5126_s1 + $0x8] ss:$0 sm:$0xff]  ;;  %v5692_v34 = vld [vmem:[#allocation120_spill] sm:$0xff] }
  0xc4   : > { %v4032_v59 = vadd.f32 %v1000_v15, %v964_v33  ;;  %v4034_v27 = vadd.f32 %v1001_v47, %v965_v45  ;;  %v4036_v37 = vadd.f32 %v1002_v41, %v966_v9  ;;  %v4038_v29 = vadd.f32 %v1003_v21, %v967_v38  ;;  %5673 = vst [vmem:[#allocation116_spill] sm:$0xff] %v4051_v16  ;;  %v5675_v33 = vld [vmem:[#allocation114_spill] sm:$0xff]  ;;  %v5704_v47 = vld [vmem:[#allocation64_spill] sm:$0xff]  ;;  %v5707_v21 = vld [vmem:[#allocation83_spill] sm:$0xff] }
  0xc5   : > { %v4040_v61 = vadd.f32 %v1004_v40, %v968_v5  ;;  %v4042_v63 = vadd.f32 %v1005_v35, %v969_v46  ;;  %v4044_v53 = vadd.f32 %v1006_v24, %v970_v11  ;;  %v4046_v10 = vadd.f32 %v1007_v6, %v971_v49  ;;  %v5677_v9 = vld [vmem:[#allocation126_spill] sm:$0xff]  ;;  %v5681_v11 = vld [vmem:[#allocation95_spill] sm:$0xff]  ;;  %v5694_v35 = vld [vmem:[#allocation121_spill] sm:$0xff] }
  0xc6   : > { %v4054_v55 = vadd.f32 %v1008_v26, %v3924_v3  ;;  %v4057_v45 = vadd.f32 %v1009_v44, %v5675_v33  ;;  %v4060_v38 = vadd.f32 %v1010_v42, %v5677_v9  ;;  %v5679_v5 = vld [vmem:[#allocation14_spill] sm:$0xff]  ;;  %v5682_v49 = vld [vmem:[#allocation127_spill] sm:$0xff]  ;;  %v4069_v50 = vadd.f32 %v1012_v62, %v5684_v2  ;;  %v5706_v42 = vld [vmem:[#allocation65_spill] sm:$0xff] }
  0xc7   : > { %5671 = vst [vmem:[#allocation123_spill] sm:$0xff] %v4044_v53  ;;  %5672 = vst [vmem:[#allocation17_spill] sm:$0xff] %v4046_v10  ;;  %v5680_v46 = vsub.s32 6, %v5679_v5  ;;  %v4066_v17 = vadd.f32 %v1011_v58, %v5682_v49  ;;  %v4072_v57 = vadd.f32 %v1013_v0, %v5686_v20  ;;  %v5688_v3 = vld [vmem:[#allocation118_spill] sm:$0xff]  ;;  %v4078_v39 = vadd.f32 %v1015_v48, %v5690_v25  ;;  %v5695_v24 = vld [vmem:[#allocation67_spill] sm:$0xff] }
  0xc8   : > { %5674 = vst [vmem:[#allocation15_spill] sm:$0xff] %v4054_v55  ;;  %5676 = vst [vmem:[#allocation21_spill] sm:$0xff] %v4057_v45  ;;  %v4075_v8 = vadd.f32 %v1014_v60, %v5688_v3  ;;  %v4081_v18 = vadd.f32 %v1016_v12, %v5692_v34  ;;  %v1049_v23 = vadd.f32 %v1017_v22, %v5694_v35  ;;  %v5696_v6 = vld [vmem:[#allocation122_spill] sm:$0xff]  ;;  %v5698_v62 = vsub.s32 7, %v5679_v5  ;;  %v5710_v9 = vld [vmem:[#allocation68_spill] sm:$0xff] }
  0xc9   : > { %5678 = vst [vmem:[#allocation16_spill] sm:$0xff] %v4060_v38  ;;  %v1055_v56 = vrot.slane %v5681_v11, %v5680_v46  ;;  %5683 = vst [vmem:[#allocation24_spill] sm:$0xff] %v4066_v17  ;;  %v4086_v15 = vadd.f32 %v1018_v14, %v5696_v6  ;;  %v5700_v60 = vld [vmem:[#allocation82_spill] sm:$0xff]  ;;  %v4106_v58 = vmul.f32 %v4051_v16, %v5707_v21  ;;  %v5712_v2 = vld [vmem:[#allocation69_spill] sm:$0xff] }
  0xca   : > { %5685 = vst [vmem:[#allocation18_spill] sm:$0xff] %v4069_v50  ;;  %5687 = vst [vmem:[#allocation26_spill] sm:$0xff] %v4072_v57  ;;  %v4091_v0 = vrot.slane %v5681_v11, %v5698_v62  ;;  %v4095_v26 = vmul.f32 %v4051_v16, %v5700_v60  ;;  %v5702_v48 = vld [vmem:[#allocation98_spill] sm:$0xff]  ;;  %v5713_v3 = vld [vmem:[#allocation47_spill] sm:$0xff] }
  0xcb   : > { %5689 = vst [vmem:[#allocation22_spill] sm:$0xff] %v4075_v8  ;;  %5691 = vst [vmem:[#allocation27_spill] sm:$0xff] %v4078_v39  ;;  %v1085_v13 = vmul.f32 %v1055_v56, %v5695_v24  ;;  %v4099_v12 = vmul.f32 %v4051_v16, %v5702_v48  ;;  %v1056_v22 = vmul.f32 %v1055_v56, %v5704_v47  ;;  %v5705_v44 = vld [vmem:[#allocation38_spill] sm:$0xff]  ;;  %v5716_v60 = vld [vmem:[#allocation51_spill] sm:$0xff] }
  0xcc   : > { %5693 = vst [vmem:[#allocation23_spill] sm:$0xff] %v4081_v18  ;;  %5697 = vst [vmem:[#allocation28_spill] sm:$0xff] %v4086_v15  ;;  %v1057_v41 = vmul.f32 %v1055_v56, %v5705_v44  ;;  %v1058_v14 = vmul.f32 %v1055_v56, %v5706_v42  ;;  %v5709_v40 = vld [vmem:[#allocation42_spill] sm:$0xff]  ;;  %v1060_v46 = vmul.f32 %v1055_v56, %v5710_v9  ;;  %v5717_v47 = vld [vmem:[#allocation71_spill] sm:$0xff] }
  0xcd   : > { %5699 = vst [vmem:[#allocation25_spill] sm:$0xff] %v4091_v0  ;;  %5701 = vst [vmem:[#allocation31_spill] sm:$0xff] %v4095_v26  ;;  %v1059_v33 = vmul.f32 %v1055_v56, %v5709_v40  ;;  %v5711_v11 = vld [vmem:[#allocation46_spill] sm:$0xff]  ;;  %v1062_v20 = vmul.f32 %v1055_v56, %v5712_v2  ;;  %v1063_v25 = vmul.f32 %v1055_v56, %v5713_v3  ;;  %v5718_v42 = vld [vmem:[#allocation55_spill] sm:$0xff] }
  0xce   : > { %5703 = vst [vmem:[#allocation29_spill] sm:$0xff] %v4099_v12  ;;  %5708 = vst [vmem:[#allocation32_spill] sm:$0xff] %v4106_v58  ;;  %v1061_v49 = vmul.f32 %v1055_v56, %v5711_v11  ;;  %v5714_v34 = vld [vmem:[#allocation70_spill] sm:$0xff]  ;;  %v1117_v24 = vadd.f32 %v1085_v13, %v1049_v23  ;;  %v1065_v48 = vmul.f32 %v1055_v56, %v5716_v60  ;;  %v5719_v40 = vld [vmem:[#allocation72_spill] sm:$0xff] }
  0xcf   : > { %v1064_v35 = vmul.f32 %v1055_v56, %v5714_v34  ;;  %v5715_v6 = vld [vmem:[#allocation50_spill] sm:$0xff]  ;;  %v1066_v44 = vmul.f32 %v1055_v56, %v5717_v47  ;;  %v1067_v21 = vmul.f32 %v1055_v56, %v5718_v42  ;;  %v1068_v9 = vmul.f32 %v1055_v56, %v5719_v40  ;;  %v5720_v5 = vld [vmem:[#allocation56_spill] sm:$0xff]  ;;  %v5722_v58 = vld [vmem:[#allocation57_spill] sm:$0xff] }
  0xd0   : > { %v1153_v62 = vmul.f32 %v4091_v0, %v5715_v6  ;;  %v1069_v11 = vmul.f32 %v1055_v56, %v5720_v5  ;;  %v1070_v2 = vmul.f32 %v1055_v56, %v5721_v36  ;;  %v1071_v3 = vmul.f32 %v1055_v56, %v5722_v58  ;;  %v5723_v12 = vld [vmem:[#allocation74_spill] sm:$0xff]  ;;  %v5725_v26 = vld [vmem:[#allocation75_spill] sm:$0xff]  ;;  %v5727_v15 = vld [vmem:[#allocation76_spill] sm:$0xff] }
  0xd1   : > { %v1072_v34 = vmul.f32 %v1055_v56, %v5723_v12  ;;  %v5724_v23 = vld [vmem:[#allocation58_spill] sm:$0xff]  ;;  %v1074_v6 = vmul.f32 %v1055_v56, %v5725_v26  ;;  %v5726_v0 = vld [vmem:[#allocation59_spill] sm:$0xff]  ;;  %v1076_v47 = vmul.f32 %v1055_v56, %v5727_v15  ;;  %v5728_v18 = vld [vmem:[#allocation60_spill] sm:$0xff] }
  0xd2   : > { %v1073_v13 = vmul.f32 %v1055_v56, %v5724_v23  ;;  %v1075_v60 = vmul.f32 %v1055_v56, %v5726_v0  ;;  %v1077_v42 = vmul.f32 %v1055_v56, %v5728_v18  ;;  %v5729_v39 = vld [vmem:[#allocation77_spill] sm:$0xff]  ;;  %v1184_v8 = vadd.f32 %v1153_v62, %v1117_v24  ;;  %v5732_v50 = vld [vmem:[#allocation78_spill] sm:$0xff]  ;;  %v5734_v38 = vld [vmem:[#allocation79_spill] sm:$0xff] }
  0xd3   : > { %v1078_v40 = vmul.f32 %v1055_v56, %v5729_v39  ;;  %v5730_v5 = vld [vmem:[#allocation113_spill] sm:$0xff]  ;;  %v1080_v12 = vmul.f32 %v1055_v56, %v5732_v50  ;;  %v5733_v17 = vld [vmem:[#allocation62_spill] sm:$0xff]  ;;  %v1082_v26 = vmul.f32 %v1055_v56, %v5734_v38  ;;  %v5736_v55 = vld [vmem:[#allocation80_spill] sm:$0xff]  ;;  %v4141_v24 = vadd.f32 %v1056_v22, %v4008_v32 }
  0xd4   : > { %v1220_v36 = vmul.f32 %v4051_v16, %v5730_v5  ;;  %v5731_v57 = vld [vmem:[#allocation61_spill] sm:$0xff]  ;;  %v1081_v23 = vmul.f32 %v1055_v56, %v5733_v17  ;;  %v5735_v45 = vld [vmem:[#allocation66_spill] sm:$0xff]  ;;  %v1084_v15 = vmul.f32 %v1055_v56, %v5736_v55  ;;  %v5737_v10 = vld [vmem:[#allocation19_spill] sm:$0xff]  ;;  %v4144_v62 = vadd.f32 %v1057_v41, %v4010_v1 }
  0xd5   : > { %v1079_v58 = vmul.f32 %v1055_v56, %v5731_v57  ;;  %v1083_v0 = vmul.f32 %v1055_v56, %v5735_v45  ;;  %v1086_v18 = vmul.f32 %v1055_v56, %v5737_v10  ;;  %v5738_v53 = vld [vmem:[#allocation12_spill] sm:$0xff]  ;;  %v4147_v50 = vadd.f32 %v1058_v14, %v4012_v51  ;;  %v5741_v38 = vld [vmem:[#allocation17_spill] sm:$0xff]  ;;  %v5746_v41 = vld [vmem:[#allocation18_spill] sm:$0xff] }
  0xd6   : > { %v1087_v39 = vmul.f32 %v1055_v56, %v5738_v53  ;;  %v4150_v17 = vadd.f32 %v1059_v33, %v4014_v54  ;;  %v4153_v45 = vadd.f32 %v1060_v46, %v4016_v19  ;;  %v4156_v55 = vadd.f32 %v1061_v49, %v4018_v43  ;;  %v5742_v56 = vld [vmem:[#allocation15_spill] sm:$0xff]  ;;  %v5748_v33 = vld [vmem:[#allocation26_spill] sm:$0xff] }
  0xd7   : > { %v4159_v53 = vadd.f32 %v1062_v20, %v4020_v4  ;;  %v4161_v32 = vadd.f32 %v1220_v36, %v1184_v8  ;;  %v4164_v1 = vadd.f32 %v1063_v25, %v4022_v30  ;;  %v4167_v51 = vadd.f32 %v1064_v35, %v4024_v7  ;;  %v5744_v8 = vld [vmem:[#allocation16_spill] sm:$0xff]  ;;  %v5750_v49 = vld [vmem:[#allocation22_spill] sm:$0xff]  ;;  %v5752_v25 = vld [vmem:[#allocation27_spill] sm:$0xff] }
  0xd8   : > { %v4170_v54 = vadd.f32 %v1065_v48, %v4026_v31  ;;  %v4173_v19 = vadd.f32 %v1066_v44, %v4028_v28  ;;  %v4176_v43 = vadd.f32 %v1067_v21, %v4030_v52  ;;  %v4179_v4 = vadd.f32 %v1068_v9, %v4032_v59  ;;  %v5740_v52 = vld [vmem:[#allocation123_spill] sm:$0xff]  ;;  %v5756_v21 = vld [vmem:[#allocation28_spill] sm:$0xff]  ;;  %v2586_v36 = vld [vmem:[%s2874_s16 + $0x30] sm:$0xff] }
  0xd9   : > { %5739 = vst [vmem:[#allocation30_spill] sm:$0xff] %v4161_v32  ;;  %v4182_v10 = vadd.f32 %v1069_v11, %v4034_v27  ;;  %v4185_v30 = vadd.f32 %v1070_v2, %v4036_v37  ;;  %v4188_v7 = vadd.f32 %v1071_v3, %v4038_v29  ;;  %v4191_v31 = vadd.f32 %v1072_v34, %v4040_v61  ;;  %v5743_v29 = vld [vmem:[#allocation21_spill] sm:$0xff]  ;;  %v5754_v48 = vld [vmem:[#allocation23_spill] sm:$0xff]  ;;  %v5758_v11 = vld [vmem:[#allocation132_spill] sm:$0xff] }
  0xda   : > { %v4194_v28 = vadd.f32 %v1073_v13, %v4042_v63  ;;  %v4197_v59 = vadd.f32 %v1074_v6, %v5740_v52  ;;  %v4200_v27 = vadd.f32 %v1075_v60, %v5741_v38  ;;  %v4203_v37 = vadd.f32 %v1076_v47, %v5742_v56  ;;  %v5745_v63 = vld [vmem:[#allocation24_spill] sm:$0xff]  ;;  %v2582_v3 = vld [vmem:[%s2874_s16 + $0x10] sm:$0xff]  ;;  %v5760_v34 = vld [vmem:[#allocation25_spill] sm:$0xff] }
  0xdb   : > { %v4206_v57 = vadd.f32 %v1077_v42, %v5743_v29  ;;  %v4209_v61 = vadd.f32 %v1078_v40, %v5744_v8  ;;  %v4212_v22 = vadd.f32 %v1079_v58, %v5745_v63  ;;  %v4215_v14 = vadd.f32 %v1080_v12, %v5746_v41  ;;  %v2583_v6 = vld [vmem:[%s2874_s16 + $0x18] sm:$0xff]  ;;  %v2584_v47 = vld [vmem:[%s2874_s16 + $0x20] sm:$0xff]  ;;  %v2585_v40 = vld [vmem:[%s2874_s16 + $0x28] sm:$0xff] }
  0xdc   : > { %v4218_v46 = vadd.f32 %v1081_v23, %v5748_v33  ;;  %v4221_v20 = vadd.f32 %v1082_v26, %v5750_v49  ;;  %v4224_v35 = vadd.f32 %v1083_v0, %v5752_v25  ;;  %v4227_v44 = vadd.f32 %v1084_v15, %v5754_v48  ;;  %v2587_v12 = vld [vmem:[%s2874_s16 + $0x38] sm:$0xff]  ;;  %v2588_v26 = vld [vmem:[%s2874_s16 + $0x40] sm:$0xff]  ;;  %v2589_v15 = vld [vmem:[%s2874_s16 + $0x48] sm:$0xff] }
  0xdd   : > { %5747 = vst [vmem:[#allocation33_spill] sm:$0xff] %v4215_v14  ;;  %v4230_v9 = vadd.f32 %v1086_v18, %v5756_v21  ;;  %v4233_v2 = vadd.f32 %v1087_v39, %v5758_v11  ;;  %v1124_v13 = vmul.f32 %v2582_v3, %v5760_v34  ;;  %v1125_v60 = vmul.f32 %v2583_v6, %v5760_v34  ;;  %v2590_v39 = vld [vmem:[%s2874_s16 + $0x50] sm:$0xff]  ;;  %v2591_v38 = vld [vmem:[%s2874_s16 + $0x58] sm:$0xff]  ;;  %v2592_v29 = vld [vmem:[%s2874_s16 + $0x60] sm:$0xff] }
  0xde   : > { %5749 = vst [vmem:[#allocation34_spill] sm:$0xff] %v4218_v46  ;;  %5751 = vst [vmem:[#allocation39_spill] sm:$0xff] %v4221_v20  ;;  %v1126_v42 = vmul.f32 %v2584_v47, %v5760_v34  ;;  %v1127_v5 = vmul.f32 %v2585_v40, %v5760_v34  ;;  %v1128_v58 = vmul.f32 %v2586_v36, %v5760_v34  ;;  %v2593_v63 = vld [vmem:[%s2874_s16 + $0x68] sm:$0xff]  ;;  %v2594_v33 = vld [vmem:[%s2874_s16 + $0x70] sm:$0xff] }
  0xdf   : > { %5753 = vst [vmem:[#allocation35_spill] sm:$0xff] %v4224_v35  ;;  %5755 = vst [vmem:[#allocation43_spill] sm:$0xff] %v4227_v44  ;;  %v1129_v23 = vmul.f32 %v2587_v12, %v5760_v34  ;;  %v1130_v0 = vmul.f32 %v2588_v26, %v5760_v34  ;;  %v1131_v18 = vmul.f32 %v2589_v15, %v5760_v34  ;;  %v2595_v25 = vld [vmem:[%s2874_s16 + $0x78] sm:$0xff]  ;;  %v2596_v21 = vld [vmem:[%s2874_s16 + $0x80] sm:$0xff] }
  0xe0   : > { %5757 = vst [vmem:[#allocation36_spill] sm:$0xff] %v4230_v9  ;;  %5759 = vst [vmem:[#allocation44_spill] sm:$0xff] %v4233_v2  ;;  %v1132_v52 = vmul.f32 %v2590_v39, %v5760_v34  ;;  %v1133_v56 = vmul.f32 %v2591_v38, %v5760_v34  ;;  %v1134_v8 = vmul.f32 %v2592_v29, %v5760_v34  ;;  %v2597_v3 = vld [vmem:[%s2874_s16 + $0x88] sm:$0xff]  ;;  %v2598_v47 = vld [vmem:[%s2874_s16 + $0x90] sm:$0xff] }
  0xe1   : > { %v1135_v41 = vmul.f32 %v2593_v63, %v5760_v34  ;;  %v1136_v49 = vmul.f32 %v2594_v33, %v5760_v34  ;;  %v1137_v48 = vmul.f32 %v2595_v25, %v5760_v34  ;;  %v1138_v11 = vmul.f32 %v2596_v21, %v5760_v34  ;;  %v2599_v36 = vld [vmem:[%s2874_s16 + $0x98] sm:$0xff]  ;;  %v2600_v26 = vld [vmem:[%s2874_s16 + $0xa0] sm:$0xff]  ;;  %v2601_v39 = vld [vmem:[%s2874_s16 + $0xa8] sm:$0xff] }
  0xe2   : > { %v1139_v6 = vmul.f32 %v2597_v3, %v5760_v34  ;;  %v1140_v40 = vmul.f32 %v2598_v47, %v5760_v34  ;;  %v1141_v12 = vmul.f32 %v2599_v36, %v5760_v34  ;;  %v1142_v15 = vmul.f32 %v2600_v26, %v5760_v34  ;;  %v2602_v29 = vld [vmem:[%s2874_s16 + $0xb0] sm:$0xff]  ;;  %v2603_v33 = vld [vmem:[%s2874_s16 + $0xb8] sm:$0xff]  ;;  %v2604_v21 = vld [vmem:[%s2874_s16 + $0xc0] sm:$0xff] }
  0xe3   : > { %v1143_v38 = vmul.f32 %v2601_v39, %v5760_v34  ;;  %v1144_v63 = vmul.f32 %v2602_v29, %v5760_v34  ;;  %v1145_v25 = vmul.f32 %v2603_v33, %v5760_v34  ;;  %v1146_v3 = vmul.f32 %v2604_v21, %v5760_v34  ;;  %v2605_v47 = vld [vmem:[%s2874_s16 + $0xc8] sm:$0xff]  ;;  %v2606_v32 = vld [vmem:[%s2874_s16 + $0xd0] sm:$0xff]  ;;  %v2607_v16 = vld [vmem:[%s2874_s16 + $0xd8] sm:$0xff] }
  0xe4   : > { %v1147_v36 = vmul.f32 %v2605_v47, %v5760_v34  ;;  %v1148_v26 = vmul.f32 %v2606_v32, %v5760_v34  ;;  %v1149_v2 = vmul.f32 %v2607_v16, %v5760_v34  ;;  %v2608_v39 = vld [vmem:[%s2874_s16 + $0xe0] sm:$0xff]  ;;  %v2609_v44 = vld [vmem:[%s2874_s16 + $0xe8] sm:$0xff]  ;;  %v2610_v35 = vld [vmem:[%s2874_s16 + $0xf0] sm:$0xff]  ;;  %v1154_v21 = vmul.f32 0.0, %v5760_v34  ;;  %s2639_s16 = scalar_lea.vmem %s5081_s13, 2048 }
  0xe5   : > { %v1150_v9 = vmul.f32 %v2608_v39, %v5760_v34  ;;  %v1151_v29 = vmul.f32 %v2609_v44, %v5760_v34  ;;  %v1152_v33 = vmul.f32 %v2610_v35, %v5760_v34  ;;  %v1155_v20 = vadd.f32 %v1124_v13, %v4141_v24  ;;  %p2640_p11 = scmp.ne.s32.totalorder %s5081_s13, %s2639_s16  ;;  %p2647_p7 = scmp.lt.s32.totalorder %s2645_s26, %s2639_s16 }
  0xe6   : > { %v1156_v47 = vadd.f32 %v1125_v60, %v4144_v62  ;;  %v1157_v32 = vadd.f32 %v1126_v42, %v4147_v50  ;;  %v1158_v46 = vadd.f32 %v1127_v5, %v4150_v17  ;;  %v1159_v16 = vadd.f32 %v1128_v58, %v4153_v45  ;;  %v5778_v58 = vld [vmem:[#allocation99_spill] sm:$0xff] }
  0xe7   : > { %v1160_v39 = vadd.f32 %v1129_v23, %v4156_v55  ;;  %v1161_v14 = vadd.f32 %v1130_v0, %v4159_v53  ;;  %v1162_v44 = vadd.f32 %v1131_v18, %v4164_v1  ;;  %v1163_v35 = vadd.f32 %v1132_v52, %v4167_v51  ;;  %v5779_v23 = vld [vmem:[#allocation116_spill] sm:$0xff]  ;;  %p2641_p13 = pnand %p2640_p11, %p5824_p12  ;;  %p2648_p8 = por %p2647_p7, %p2646_p5 }
  0xe8   : > { %v1164_v34 = vadd.f32 %v1133_v56, %v4170_v54  ;;  %v1165_v24 = vadd.f32 %v1134_v8, %v4173_v19  ;;  %v1166_v62 = vadd.f32 %v1135_v41, %v4176_v43  ;;  %v4307_v50 = vadd.f32 %v1136_v49, %v4179_v4  ;;  %v5782_v56 = vld [vmem:[#allocation85_spill] sm:$0xff]  ;;  %v5783_v41 = vld [vmem:[#allocation102_spill] sm:$0xff] }
  0xe9   : > { %v4310_v17 = vadd.f32 %v1137_v48, %v4182_v10  ;;  %v4313_v45 = vadd.f32 %v1138_v11, %v4185_v30  ;;  %v4316_v55 = vadd.f32 %v1139_v6, %v4188_v7  ;;  %v4319_v53 = vadd.f32 %v1140_v40, %v4191_v31  ;;  %v5764_v30 = vld [vmem:[#allocation33_spill] sm:$0xff]  ;;  %v5766_v31 = vld [vmem:[#allocation34_spill] sm:$0xff]  ;;  %v5785_v6 = vld [vmem:[#allocation103_spill] sm:$0xff]  ;;  %p2642_p4 = pneg %p2641_p13 }
  0xea   : > { %v4322_v1 = vadd.f32 %v1141_v12, %v4194_v28  ;;  %v4325_v51 = vadd.f32 %v1142_v15, %v4197_v59  ;;  %v4328_v54 = vadd.f32 %v1143_v38, %v4200_v27  ;;  %v4331_v19 = vadd.f32 %v1144_v63, %v4203_v37  ;;  %v5768_v59 = vld [vmem:[#allocation39_spill] sm:$0xff]  ;;  %v5784_v48 = vld [vmem:[#allocation86_spill] sm:$0xff]  ;;  %v5787_v38 = vld [vmem:[#allocation104_spill] sm:$0xff] }
  0xeb   : > { %v4334_v43 = vadd.f32 %v1145_v25, %v4206_v57  ;;  %v4337_v4 = vadd.f32 %v1146_v3, %v4209_v61  ;;  %v4340_v10 = vadd.f32 %v1147_v36, %v4212_v22  ;;  %v4343_v7 = vadd.f32 %v1148_v26, %v5764_v30  ;;  %v5770_v37 = vld [vmem:[#allocation35_spill] sm:$0xff]  ;;  %v5774_v61 = vld [vmem:[#allocation36_spill] sm:$0xff]  ;;  %v5789_v36 = vld [vmem:[#allocation105_spill] sm:$0xff]  ;;  %p2649_p10 = pnand %p2648_p8, %p2642_p4 }
  0xec   : > { %v4346_v28 = vadd.f32 %v1149_v2, %v5766_v31  ;;  %v4349_v27 = vadd.f32 %v1150_v9, %v5768_v59  ;;  %v4352_v13 = vadd.f32 %v1151_v29, %v5770_v37  ;;  %v5772_v57 = vld [vmem:[#allocation43_spill] sm:$0xff]  ;;  %v4358_v42 = vadd.f32 %v1154_v21, %v5774_v61  ;;  %v5776_v22 = vld [vmem:[#allocation44_spill] sm:$0xff]  ;;  %v5781_v9 = vld [vmem:[#allocation101_spill] sm:$0xff] }
  0xed   : > { %5761 = vst [vmem:[#allocation40_spill] sm:$0xff] %v4334_v43  ;;  %5762 = vst [vmem:[#allocation48_spill] sm:$0xff] %v4337_v4  ;;  %v4355_v60 = vadd.f32 %v1152_v33, %v5772_v57  ;;  %v4361_v5 = vadd.f32 %v1154_v21, %v5776_v22  ;;  %v1194_v0 = vmul.f32 %v5779_v23, %v5778_v58  ;;  %v5780_v2 = vld [vmem:[#allocation84_spill] sm:$0xff]  ;;  %v5786_v12 = vld [vmem:[#allocation87_spill] sm:$0xff] }
  0xee   : > { %5763 = vst [vmem:[#allocation41_spill] sm:$0xff] %v4340_v10  ;;  %5765 = vst [vmem:[#allocation52_spill] sm:$0xff] %v4343_v7  ;;  %v1195_v18 = vmul.f32 %v5779_v23, %v5780_v2  ;;  %v1196_v52 = vmul.f32 %v5779_v23, %v5781_v9  ;;  %v1197_v8 = vmul.f32 %v5779_v23, %v5782_v56  ;;  %v5788_v25 = vld [vmem:[#allocation88_spill] sm:$0xff]  ;;  %v5790_v29 = vld [vmem:[#allocation89_spill] sm:$0xff] }
  0xef   : > { %5767 = vst [vmem:[#allocation45_spill] sm:$0xff] %v4346_v28  ;;  %5769 = vst [vmem:[#allocation53_spill] sm:$0xff] %v4349_v27  ;;  %v1198_v49 = vmul.f32 %v5779_v23, %v5783_v41  ;;  %v1199_v11 = vmul.f32 %v5779_v23, %v5784_v48  ;;  %v1200_v40 = vmul.f32 %v5779_v23, %v5785_v6  ;;  %v5791_v21 = vld [vmem:[#allocation106_spill] sm:$0xff]  ;;  %v5793_v37 = vld [vmem:[#allocation107_spill] sm:$0xff] }
  0xf0   : > { %5771 = vst [vmem:[#allocation49_spill] sm:$0xff] %v4352_v13  ;;  %5773 = vst [vmem:[#allocation54_spill] sm:$0xff] %v4355_v60  ;;  %v1201_v15 = vmul.f32 %v5779_v23, %v5786_v12  ;;  %v1202_v63 = vmul.f32 %v5779_v23, %v5787_v38  ;;  %v1203_v3 = vmul.f32 %v5779_v23, %v5788_v25  ;;  %v5792_v31 = vld [vmem:[#allocation90_spill] sm:$0xff]  ;;  %v5794_v61 = vld [vmem:[#allocation91_spill] sm:$0xff] }
  0xf1   : > { %5775 = vst [vmem:[#allocation124_spill] sm:$0xff] %v4358_v42  ;;  %5777 = vst [vmem:[#allocation115_spill] sm:$0xff] %v4361_v5  ;;  %v1204_v26 = vmul.f32 %v5779_v23, %v5789_v36  ;;  %v1205_v33 = vmul.f32 %v5779_v23, %v5790_v29  ;;  %v1206_v30 = vmul.f32 %v5779_v23, %v5791_v21  ;;  %v5795_v58 = vld [vmem:[#allocation108_spill] sm:$0xff]  ;;  %v5797_v41 = vld [vmem:[#allocation109_spill] sm:$0xff] }
  0xf2   : > { %v1207_v59 = vmul.f32 %v5779_v23, %v5792_v31  ;;  %v1208_v57 = vmul.f32 %v5779_v23, %v5793_v37  ;;  %v1209_v22 = vmul.f32 %v5779_v23, %v5794_v61  ;;  %v1210_v2 = vmul.f32 %v5779_v23, %v5795_v58  ;;  %v5796_v9 = vld [vmem:[#allocation92_spill] sm:$0xff]  ;;  %v5798_v6 = vld [vmem:[#allocation93_spill] sm:$0xff]  ;;  %v5799_v38 = vld [vmem:[#allocation110_spill] sm:$0xff] }
  0xf3   : > { %v1211_v56 = vmul.f32 %v5779_v23, %v5796_v9  ;;  %v1212_v48 = vmul.f32 %v5779_v23, %v5797_v41  ;;  %v1213_v12 = vmul.f32 %v5779_v23, %v5798_v6  ;;  %v1214_v25 = vmul.f32 %v5779_v23, %v5799_v38  ;;  %v5800_v36 = vld [vmem:[#allocation96_spill] sm:$0xff]  ;;  %v5801_v21 = vld [vmem:[#allocation111_spill] sm:$0xff]  ;;  %v5802_v37 = vld [vmem:[#allocation97_spill] sm:$0xff] }
  0xf4   : > { %v1215_v29 = vmul.f32 %v5779_v23, %v5800_v36  ;;  %v1216_v31 = vmul.f32 %v5779_v23, %v5801_v21  ;;  %v1217_v61 = vmul.f32 %v5779_v23, %v5802_v37  ;;  %v5803_v58 = vld [vmem:[#allocation31_spill] sm:$0xff]  ;;  %v5804_v5 = vld [vmem:[#allocation29_spill] sm:$0xff]  ;;  %v5805_v41 = vld [vmem:[#allocation32_spill] sm:$0xff]  ;;  %v1229_v37 = vadd.f32 %v1197_v8, %v1161_v14 }
  0xf5   : > { %v1223_v9 = vadd.f32 %v5803_v58, %v1155_v20  ;;  %v1224_v42 = vadd.f32 %v5804_v5, %v1156_v47  ;;  %v1225_v60 = vadd.f32 %v5805_v41, %v1157_v32  ;;  %v5806_v13 = vld [vmem:[#allocation112_spill] sm:$0xff]  ;;  %v5808_v28 = vld [vmem:[#allocation13_spill] sm:$0xff]  ;;  %v1226_v47 = vadd.f32 %v1194_v0, %v1158_v46 }
  0xf6   : > { %v1218_v6 = vmul.f32 %v5779_v23, %v5806_v13  ;;  %v5807_v27 = vld [vmem:[#allocation100_spill] sm:$0xff]  ;;  %v1221_v36 = vmul.f32 %v5779_v23, %v5808_v28  ;;  %v1227_v5 = vadd.f32 %v1195_v18, %v1159_v16  ;;  %v1228_v32 = vadd.f32 %v1196_v52, %v1160_v39  ;;  %v5815_v8 = vld [vmem:[#allocation53_spill] sm:$0xff] }
  0xf7   : > { %v1219_v38 = vmul.f32 %v5779_v23, %v5807_v27  ;;  %v5809_v7 = vld [vmem:[#allocation20_spill] sm:$0xff]  ;;  %v1230_v58 = vadd.f32 %v1198_v49, %v1162_v44  ;;  %v1231_v13 = vadd.f32 %v1199_v11, %v1163_v35  ;;  %v1232_v41 = vadd.f32 %v1200_v40, %v1164_v34  ;;  %v5816_v11 = vld [vmem:[#allocation49_spill] sm:$0xff] }
  0xf8   : > { %v1222_v21 = vmul.f32 %v5779_v23, %v5809_v7  ;;  %v4425_v20 = vld [vmem:[%s5127_s2] ss:$0 sm:$0xff]  ;;  %v1233_v10 = vadd.f32 %v1201_v15, %v1165_v24  ;;  %v1234_v27 = vadd.f32 %v1202_v63, %v1166_v62  ;;  %v1235_v23 = vadd.f32 %v1203_v3, %v4307_v50  ;;  %v5817_v15 = vld [vmem:[#allocation54_spill] sm:$0xff] }
  0xf9   : > { %v1262_v4 = vmul.f32 %v4425_v20, %v1223_v9  ;;  %v1263_v28 = vmul.f32 %v4425_v20, %v1224_v42  ;;  %v1264_v7 = vmul.f32 %v4425_v20, %v1225_v60  ;;  %v1236_v43 = vadd.f32 %v1204_v26, %v4310_v17  ;;  %v4437_v14 = vld [vmem:[%s5128_s3] ss:$0 sm:$0xff] }
  0xfa   : > { %v1237_v46 = vadd.f32 %v1205_v33, %v4313_v45  ;;  %v1238_v16 = vadd.f32 %v1206_v30, %v4316_v55  ;;  %v1239_v39 = vadd.f32 %v1207_v59, %v4319_v53  ;;  %v1240_v44 = vadd.f32 %v1208_v57, %v4322_v1  ;;  %v5810_v50 = vld [vmem:[#allocation40_spill] sm:$0xff]  ;;  %v5819_v30 = vld [vmem:[#allocation115_spill] sm:$0xff] }
  0xfb   : > { %v1241_v35 = vadd.f32 %v1209_v22, %v4325_v51  ;;  %v1265_v34 = vmul.f32 %v4425_v20, %v1226_v47  ;;  %v1242_v24 = vadd.f32 %v1210_v2, %v4328_v54  ;;  %v1243_v62 = vadd.f32 %v1211_v56, %v4331_v19  ;;  %v5811_v45 = vld [vmem:[#allocation48_spill] sm:$0xff]  ;;  %v5812_v51 = vld [vmem:[#allocation41_spill] sm:$0xff] }
  0xfc   : > { %v1244_v17 = vadd.f32 %v1212_v48, %v5810_v50  ;;  %v1245_v55 = vadd.f32 %v1213_v12, %v5811_v45  ;;  %v1266_v60 = vmul.f32 %v4425_v20, %v1227_v5  ;;  %v4449_v42 = vadd.f32 %v4437_v14, %v1262_v4  ;;  %v5813_v54 = vld [vmem:[#allocation52_spill] sm:$0xff]  ;;  %v5814_v19 = vld [vmem:[#allocation45_spill] sm:$0xff] }
  0xfd   : > { %v4452_v53 = vadd.f32 %v4437_v14, %v1263_v28  ;;  %v4455_v1 = vadd.f32 %v4437_v14, %v1264_v7  ;;  %v1246_v0 = vadd.f32 %v1214_v25, %v5812_v51  ;;  %v1247_v18 = vadd.f32 %v1215_v29, %v5813_v54  ;;  %v5818_v26 = vld [vmem:[#allocation124_spill] sm:$0xff] }
  0xfe   : > { %v1248_v52 = vadd.f32 %v1216_v31, %v5814_v19  ;;  %v1249_v49 = vadd.f32 %v1217_v61, %v5815_v8  ;;  %v1250_v40 = vadd.f32 %v1218_v6, %v5816_v11  ;;  %v1251_v63 = vadd.f32 %v1219_v38, %v5817_v15 }
  0xff   : > { %v1267_v4 = vmul.f32 %v4425_v20, %v1228_v32  ;;  %v4465_v3 = vadd.f32 %v4437_v14, %v1265_v34  ;;  %v1253_v33 = vadd.f32 %v1221_v36, %v5818_v26  ;;  %v4469_v59 = vadd.f32 %v1222_v21, %v5819_v30  ;;  %v5820_v30 = vld [vmem:[#allocation30_spill] sm:$0xff] }
 0x100   : > { %v1268_v57 = vmul.f32 %v4425_v20, %v1229_v37  ;;  %v1269_v22 = vmul.f32 %v4425_v20, %v1230_v58  ;;  %v4474_v2 = vadd.f32 %v4437_v14, %v1266_v60  ;;  %v1333_v56 = vadd.f32 3.0, %v4449_v42 }
 0x101   : > { %v1334_v48 = vadd.f32 3.0, %v4452_v53  ;;  %v1335_v12 = vadd.f32 3.0, %v4455_v1  ;;  %v1270_v25 = vmul.f32 %v4425_v20, %v1231_v13  ;;  %v1271_v29 = vmul.f32 %v4425_v20, %v1232_v41 }
 0x102   : > { %v1272_v31 = vmul.f32 %v4425_v20, %v1233_v10  ;;  %v1273_v61 = vmul.f32 %v4425_v20, %v1234_v27  ;;  %v1274_v9 = vmul.f32 %v4425_v20, %v1235_v23  ;;  %v1275_v6 = vmul.f32 %v4425_v20, %v1236_v43 }
 0x103   : > { %v4486_v38 = vadd.f32 %v4437_v14, %v1267_v4  ;;  %v1336_v36 = vadd.f32 3.0, %v4465_v3  ;;  %v1276_v21 = vmul.f32 %v4425_v20, %v1237_v46  ;;  %v4491_v47 = vmul.f32 %v4425_v20, %v1238_v16 }
 0x104   : > { %v4494_v5 = vmul.f32 %v4425_v20, %v1239_v39  ;;  %v4497_v10 = vadd.f32 %v4437_v14, %v1268_v57  ;;  %v1337_v32 = vadd.f32 3.0, %v4474_v2  ;;  %v1365_v37 = vmax.f32 %v1333_v56, 0.0 }
 0x105   : > { %v1366_v43 = vmax.f32 %v1334_v48, 0.0  ;;  %v1367_v58 = vmax.f32 %v1335_v12, 0.0  ;;  %v4501_v13 = vmul.f32 %v4425_v20, %v1240_v44  ;;  %v4504_v41 = vmul.f32 %v4425_v20, %v1241_v35 }
 0x106   : > { %v4507_v27 = vmul.f32 %v4425_v20, %v1242_v24  ;;  %v4510_v28 = vmul.f32 %v4425_v20, %v1243_v62  ;;  %v4513_v7 = vmul.f32 %v4425_v20, %v1244_v17  ;;  %v4516_v23 = vadd.f32 %v4437_v14, %v1269_v22 }
 0x107   : > { %v1338_v46 = vadd.f32 3.0, %v4486_v38  ;;  %v1368_v16 = vmax.f32 %v1336_v36, 0.0  ;;  %v4520_v39 = vmul.f32 %v4425_v20, %v1245_v55  ;;  %v4523_v44 = vmul.f32 %v4425_v20, %v1246_v0 }
 0x108   : > { %v4526_v35 = vadd.f32 %v4437_v14, %v1270_v25  ;;  %v1339_v34 = vadd.f32 3.0, %v4497_v10  ;;  %v1369_v24 = vmax.f32 %v1337_v32, 0.0  ;;  %v1397_v62 = vmin.f32 %v1365_v37, 6.0 }
 0x109   : > { %v1398_v50 = vmin.f32 %v1366_v43, 6.0  ;;  %v1399_v17 = vmin.f32 %v1367_v58, 6.0  ;;  %v4530_v45 = vmul.f32 %v4425_v20, %v1247_v18  ;;  %v4533_v60 = vmul.f32 %v4425_v20, %v1248_v52 }
 0x10a   : > { %v4536_v55 = vmul.f32 %v4425_v20, %v1249_v49  ;;  %v4539_v51 = vmul.f32 %v4425_v20, %v1250_v40  ;;  %v4542_v0 = vadd.f32 %v4437_v14, %v1271_v29  ;;  %v1340_v54 = vadd.f32 3.0, %v4516_v23 }
 0x10b   : > { %v1370_v19 = vmax.f32 %v1338_v46, 0.0  ;;  %v1400_v8 = vmin.f32 %v1368_v16, 6.0  ;;  %v4546_v11 = vmul.f32 %v4425_v20, %v1251_v63  ;;  %v4549_v18 = vadd.f32 %v4437_v14, %v1272_v31 }
 0x10c   : > { %v1341_v52 = vadd.f32 3.0, %v4526_v35  ;;  %v1371_v49 = vmax.f32 %v1339_v34, 0.0  ;;  %v1401_v15 = vmin.f32 %v1369_v24, 6.0  ;;  %v1429_v40 = vmul.f32 %v1397_v62, %v4449_v42 }
 0x10d   : > { %v1430_v4 = vmul.f32 %v1398_v50, %v4452_v53  ;;  %v1431_v26 = vmul.f32 %v1399_v17, %v4455_v1  ;;  %v4557_v57 = vmul.f32 %v4425_v20, %v5820_v30  ;;  %v4560_v63 = vmul.f32 %v4425_v20, %v1253_v33 }
 0x10e   : > { %v4563_v22 = vadd.f32 %v4437_v14, %v1273_v61  ;;  %v4566_v56 = vadd.f32 %v4437_v14, %v1274_v9  ;;  %v1342_v48 = vadd.f32 3.0, %v4542_v0  ;;  %v1372_v42 = vmax.f32 %v1340_v54, 0.0 }
 0x10f   : > { %v1402_v12 = vmin.f32 %v1370_v19, 6.0  ;;  %v1432_v53 = vmul.f32 %v1400_v8, %v4465_v3  ;;  %v4572_v1 = vmul.f32 %v4425_v20, %v4469_v59  ;;  %v1343_v25 = vadd.f32 3.0, %v4549_v18 }
 0x110   : > { %v1373_v33 = vmax.f32 %v1341_v52, 0.0  ;;  %v1403_v29 = vmin.f32 %v1371_v49, 6.0  ;;  %v1433_v31 = vmul.f32 %v1401_v15, %v4474_v2  ;;  %v4576_v61 = vmul.f32 0.16666667, %v1429_v40 }
 0x111   : > { %v4578_v9 = vmul.f32 0.16666667, %v1430_v4  ;;  %v4580_v36 = vmul.f32 0.16666667, %v1431_v26  ;;  %v4583_v32 = vadd.f32 %v4437_v14, %v1275_v6  ;;  %v4586_v3 = vadd.f32 %v4437_v14, %v1276_v21 }
 0x112   : > { %v1344_v20 = vadd.f32 3.0, %v4563_v22  ;;  %v1345_v59 = vadd.f32 3.0, %v4566_v56  ;;  %v1374_v37 = vmax.f32 %v1342_v48, 0.0  ;;  %v1404_v43 = vmin.f32 %v1372_v42, 6.0 }
 0x113   : > { %v1434_v2 = vmul.f32 %v1402_v12, %v4486_v38  ;;  %v4591_v58 = vmul.f32 0.16666667, %v1432_v53  ;;  %v1375_v46 = vmax.f32 %v1343_v25, 0.0  ;;  %v1405_v16 = vmin.f32 %v1373_v33, 6.0 }
 0x114   : > { %v1435_v34 = vmul.f32 %v1403_v29, %v4497_v10  ;;  %v4594_v6 = vmul.f32 0.16666667, %v1433_v31  ;;  %v1494_v21 = vsel %vm1493_vm3, %v4576_v61, 0.0  ;;  %v1495_v24 = vsel %vm1493_vm3, %v4578_v9, 0.0 }
 0x115   : > { %v1497_v62 = vsel %vm1493_vm3, %v4580_v36, 0.0  ;;  %v4604_v38 = vadd.f32 %v4437_v14, %v4491_v47  ;;  %v1346_v50 = vadd.f32 3.0, %v4583_v32  ;;  %v1376_v17 = vmax.f32 %v1344_v20, 0.0 }
 0x116   : > { %v1496_v10 = vadd.f32 %v1495_v24, %v1494_v21  ;;  %v1406_v54 = vmin.f32 %v1374_v37, 6.0  ;;  %v1436_v19 = vmul.f32 %v1404_v43, %v4516_v23  ;;  %v4608_v8 = vmul.f32 0.16666667, %v1434_v2 }
 0x117   : > { %v1499_v52 = vsel %vm1493_vm3, %v4591_v58, 0.0  ;;  %v4614_v49 = vadd.f32 %v4437_v14, %v4494_v5  ;;  %v1347_v15 = vadd.f32 3.0, %v4586_v3  ;;  %v1377_v47 = vmax.f32 %v1345_v59, 0.0 }
 0x118   : > { %v1498_v40 = vadd.f32 %v1497_v62, %v1496_v10  ;;  %v1407_v4 = vmin.f32 %v1375_v46, 6.0  ;;  %v1437_v26 = vmul.f32 %v1405_v16, %v4526_v35  ;;  %v4618_v30 = vmul.f32 0.16666667, %v1435_v34 }
 0x119   : > { %v1501_v23 = vsel %vm1493_vm3, %v4594_v6, 0.0  ;;  %v4624_v48 = vadd.f32 %v4437_v14, %v4501_v13  ;;  %v1348_v42 = vadd.f32 3.0, %v4604_v38  ;;  %v1378_v5 = vmax.f32 %v1346_v50, 0.0 }
 0x11a   : > { %v1500_v12 = vadd.f32 %v1499_v52, %v1498_v40  ;;  %v1408_v53 = vmin.f32 %v1376_v17, 6.0  ;;  %v1438_v25 = vmul.f32 %v1406_v54, %v4542_v0  ;;  %v4628_v33 = vmul.f32 0.16666667, %v1436_v19 }
 0x11b   : > { %v1503_v35 = vsel %vm1493_vm3, %v4608_v8, 0.0  ;;  %v4634_v29 = vadd.f32 %v4437_v14, %v4504_v41  ;;  %v1349_v31 = vadd.f32 3.0, %v4614_v49  ;;  %v1379_v13 = vmax.f32 %v1347_v15, 0.0 }
 0x11c   : > { %v1502_v20 = vadd.f32 %v1501_v23, %v1500_v12  ;;  %v1409_v59 = vmin.f32 %v1377_v47, 6.0  ;;  %v1439_v37 = vmul.f32 %v1407_v4, %v4549_v18  ;;  %v4638_v43 = vmul.f32 0.16666667, %v1437_v26 }
 0x11d   : > { %v1505_v0 = vsel %vm1493_vm3, %v4618_v30, 0.0  ;;  %v4644_v2 = vadd.f32 %v4437_v14, %v4507_v27  ;;  %v1350_v46 = vadd.f32 3.0, %v4624_v48  ;;  %v1380_v41 = vmax.f32 %v1348_v42, 0.0 }
 0x11e   : > { %v1504_v16 = vadd.f32 %v1503_v35, %v1502_v20  ;;  %v1410_v34 = vmin.f32 %v1378_v5, 6.0  ;;  %v1440_v21 = vmul.f32 %v1408_v53, %v4563_v22  ;;  %v4648_v24 = vmul.f32 0.16666667, %v1438_v25 }
 0x11f   : > { %v1507_v18 = vsel %vm1493_vm3, %v4628_v33, 0.0  ;;  %v4654_v62 = vadd.f32 %v4437_v14, %v4510_v28  ;;  %v1351_v50 = vadd.f32 3.0, %v4634_v29  ;;  %v1381_v27 = vmax.f32 %v1349_v31, 0.0 }
 0x120   : > { %v1506_v17 = vadd.f32 %v1505_v0, %v1504_v16  ;;  %v1411_v10 = vmin.f32 %v1379_v13, 6.0  ;;  %v1441_v54 = vmul.f32 %v1409_v59, %v4566_v56  ;;  %v4658_v19 = vmul.f32 0.16666667, %v1439_v37 }
 0x121   : > { %v1509_v22 = vsel %vm1493_vm3, %v4638_v43, 0.0  ;;  %v4664_v52 = vadd.f32 %v4437_v14, %v4513_v7  ;;  %v1352_v15 = vadd.f32 3.0, %v4644_v2  ;;  %v1382_v28 = vmax.f32 %v1350_v46, 0.0 }
 0x122   : > { %v1508_v47 = vadd.f32 %v1507_v18, %v1506_v17  ;;  %v1412_v40 = vmin.f32 %v1380_v41, 6.0  ;;  %v1442_v4 = vmul.f32 %v1410_v34, %v4583_v32  ;;  %v4668_v26 = vmul.f32 0.16666667, %v1440_v21 }
 0x123   : > { %v1511_v56 = vsel %vm1493_vm3, %v4648_v24, 0.0  ;;  %v4674_v23 = vadd.f32 %v4437_v14, %v4520_v39  ;;  %v1353_v42 = vadd.f32 3.0, %v4654_v62  ;;  %v1383_v7 = vmax.f32 %v1351_v50, 0.0 }
 0x124   : > { %v1510_v5 = vadd.f32 %v1509_v22, %v1508_v47  ;;  %v1413_v12 = vmin.f32 %v1381_v27, 6.0  ;;  %v1443_v53 = vmul.f32 %v1411_v10, %v4586_v3  ;;  %v4678_v25 = vmul.f32 0.16666667, %v1441_v54 }
 0x125   : > { %v1513_v32 = vsel %vm1493_vm3, %v4658_v19, 0.0  ;;  %v4684_v35 = vadd.f32 %v4437_v14, %v4523_v44  ;;  %v1354_v31 = vadd.f32 3.0, %v4664_v52  ;;  %v1384_v39 = vmax.f32 %v1352_v15, 0.0 }
 0x126   : > { %v1512_v13 = vadd.f32 %v1511_v56, %v1510_v5  ;;  %v1414_v20 = vmin.f32 %v1382_v28, 6.0  ;;  %v1444_v59 = vmul.f32 %v1412_v40, %v4604_v38  ;;  %v4688_v37 = vmul.f32 0.16666667, %v1442_v4 }
 0x127   : > { %v1515_v3 = vsel %vm1493_vm3, %v4668_v26, 0.0  ;;  %v4694_v0 = vadd.f32 %v4437_v14, %v4530_v45  ;;  %v1355_v46 = vadd.f32 3.0, %v4674_v23  ;;  %v1385_v44 = vmax.f32 %v1353_v42, 0.0 }
 0x128   : > { %v1514_v41 = vadd.f32 %v1513_v32, %v1512_v13  ;;  %v1415_v16 = vmin.f32 %v1383_v7, 6.0  ;;  %v1445_v34 = vmul.f32 %v1413_v12, %v4614_v49  ;;  %v4698_v21 = vmul.f32 0.16666667, %v1443_v53 }
 0x129   : > { %v1517_v38 = vsel %vm1493_vm3, %v4678_v25, 0.0  ;;  %v4704_v18 = vadd.f32 %v4437_v14, %v4533_v60  ;;  %v1356_v50 = vadd.f32 3.0, %v4684_v35  ;;  %v1386_v45 = vmax.f32 %v1354_v31, 0.0 }
 0x12a   : > { %v1516_v27 = vadd.f32 %v1515_v3, %v1514_v41  ;;  %v1416_v17 = vmin.f32 %v1384_v39, 6.0  ;;  %v1446_v10 = vmul.f32 %v1414_v20, %v4624_v48  ;;  %v4708_v54 = vmul.f32 0.16666667, %v1444_v59 }
 0x12b   : > { %v1519_v49 = vsel %vm1493_vm3, %v4688_v37, 0.0  ;;  %v4714_v22 = vadd.f32 %v4437_v14, %v4536_v55  ;;  %v1357_v15 = vadd.f32 3.0, %v4694_v0  ;;  %v1387_v60 = vmax.f32 %v1355_v46, 0.0 }
 0x12c   : > { %v1518_v28 = vadd.f32 %v1517_v38, %v1516_v27  ;;  %v1417_v47 = vmin.f32 %v1385_v44, 6.0  ;;  %v1447_v40 = vmul.f32 %v1415_v16, %v4634_v29  ;;  %v4718_v4 = vmul.f32 0.16666667, %v1445_v34 }
 0x12d   : > { %v1521_v48 = vsel %vm1493_vm3, %v4698_v21, 0.0  ;;  %v4724_v56 = vadd.f32 %v4437_v14, %v4539_v51  ;;  %v1358_v42 = vadd.f32 3.0, %v4704_v18  ;;  %v1388_v55 = vmax.f32 %v1356_v50, 0.0 }
 0x12e   : > { %v1520_v7 = vadd.f32 %v1519_v49, %v1518_v28  ;;  %v1418_v5 = vmin.f32 %v1386_v45, 6.0  ;;  %v1448_v12 = vmul.f32 %v1416_v17, %v4644_v2  ;;  %v4728_v53 = vmul.f32 0.16666667, %v1446_v10 }
 0x12f   : > { %v1523_v29 = vsel %vm1493_vm3, %v4708_v54, 0.0  ;;  %v1329_v32 = vadd.f32 %v4437_v14, %v4546_v11  ;;  %v1359_v31 = vadd.f32 3.0, %v4714_v22  ;;  %v1389_v39 = vmax.f32 %v1357_v15, 0.0 }
 0x130   : > { %v1522_v51 = vadd.f32 %v1521_v48, %v1520_v7  ;;  %v1419_v13 = vmin.f32 %v1387_v60, 6.0  ;;  %v1449_v20 = vmul.f32 %v1417_v47, %v4654_v62  ;;  %v4736_v59 = vmul.f32 0.16666667, %v1447_v40 }
 0x131   : > { %v1525_v2 = vsel %vm1493_vm3, %v4718_v4, 0.0  ;;  %v1330_v3 = vadd.f32 %v4437_v14, %v4557_v57  ;;  %v1360_v46 = vadd.f32 3.0, %v4724_v56  ;;  %v1390_v44 = vmax.f32 %v1358_v42, 0.0 }
 0x132   : > { %v1524_v41 = vadd.f32 %v1523_v29, %v1522_v51  ;;  %v1420_v11 = vmin.f32 %v1388_v55, 6.0  ;;  %v1450_v16 = vmul.f32 %v1418_v5, %v4664_v52  ;;  %v4744_v34 = vmul.f32 0.16666667, %v1448_v12 }
 0x133   : > { %v1527_v62 = vsel %vm1493_vm3, %v4728_v53, 0.0  ;;  %v1331_v38 = vadd.f32 %v4437_v14, %v4560_v63  ;;  %v1361_v50 = vadd.f32 3.0, %v1329_v32  ;;  %v1391_v45 = vmax.f32 %v1359_v31, 0.0 }
 0x134   : > { %v1526_v27 = vadd.f32 %v1525_v2, %v1524_v41  ;;  %v1421_v17 = vmin.f32 %v1389_v39, 6.0  ;;  %v1451_v57 = vmul.f32 %v1419_v13, %v4674_v23  ;;  %v4751_v10 = vmul.f32 0.16666667, %v1449_v20 }
 0x135   : > { %v1529_v49 = vsel %vm1493_vm3, %v4736_v59, 0.0  ;;  %v1332_v52 = vadd.f32 %v4437_v14, %v4572_v1  ;;  %v1362_v15 = vadd.f32 3.0, %v1330_v3  ;;  %v1392_v60 = vmax.f32 %v1360_v46, 0.0 }
 0x136   : > { %v1528_v28 = vadd.f32 %v1527_v62, %v1526_v27  ;;  %v1422_v47 = vmin.f32 %v1390_v44, 6.0  ;;  %v1452_v63 = vmul.f32 %v1420_v11, %v4684_v35  ;;  %v4758_v40 = vmul.f32 0.16666667, %v1450_v16 }
 0x137   : > { %v1531_v48 = vsel %vm1493_vm3, %v4744_v34, 0.0  ;;  %v1363_v23 = vadd.f32 3.0, %v1331_v38  ;;  %v1393_v42 = vmax.f32 %v1361_v50, 0.0  ;;  %v1423_v7 = vmin.f32 %v1391_v45, 6.0 }
 0x138   : > { %v1530_v55 = vadd.f32 %v1529_v49, %v1528_v28  ;;  %v1453_v5 = vmul.f32 %v1421_v17, %v4694_v0  ;;  %v4763_v12 = vmul.f32 0.16666667, %v1451_v57  ;;  %v1533_v14 = vsel %vm1493_vm3, %v4751_v10, 0.0 }
 0x139   : > { %v1364_v1 = vadd.f32 3.0, %v1332_v52  ;;  %v1394_v29 = vmax.f32 %v1362_v15, 0.0  ;;  %v1424_v35 = vmin.f32 %v1392_v60, 6.0  ;;  %v1454_v39 = vmul.f32 %v1422_v47, %v4704_v18 }
 0x13a   : > { %v1532_v31 = vadd.f32 %v1531_v48, %v1530_v55  ;;  %v4768_v51 = vmul.f32 0.16666667, %v1452_v63  ;;  %v1535_v13 = vsel %vm1493_vm3, %v4758_v40, 0.0  ;;  %v1395_v20 = vmax.f32 %v1363_v23, 0.0 }
 0x13b   : > { %v1425_v46 = vmin.f32 %v1393_v42, 6.0  ;;  %v1455_v0 = vmul.f32 %v1423_v7, %v4714_v22  ;;  %v4773_v44 = vmul.f32 0.16666667, %v1453_v5  ;;  %v1537_v41 = vsel %vm1493_vm3, %v4763_v12, 0.0 }
 0x13c   : > { %v1534_v2 = vadd.f32 %v1533_v14, %v1532_v31  ;;  %v1396_v11 = vmax.f32 %v1364_v1, 0.0  ;;  %v1426_v62 = vmin.f32 %v1394_v29, 6.0  ;;  %v1456_v18 = vmul.f32 %v1424_v35, %v4724_v56 }
 0x13d   : > { %v4778_v50 = vmul.f32 0.16666667, %v1454_v39  ;;  %v1539_v45 = vsel %vm1493_vm3, %v4768_v51, 0.0  ;;  %v1427_v17 = vmin.f32 %v1395_v20, 6.0  ;;  %v1457_v57 = vmul.f32 %v1425_v46, %v1329_v32 }
 0x13e   : > { %v1536_v16 = vadd.f32 %v1535_v13, %v1534_v2  ;;  %v4782_v49 = vmul.f32 0.16666667, %v1455_v0  ;;  %v1541_v22 = vsel %vm1493_vm3, %v4773_v44, 0.0  ;;  %v1428_v60 = vmin.f32 %v1396_v11, 6.0 }
 0x13f   : > { %v1458_v28 = vmul.f32 %v1426_v62, %v1330_v3  ;;  %v4786_v47 = vmul.f32 0.16666667, %v1456_v18  ;;  %v1543_v56 = vsel %vm1493_vm3, %v4778_v50, 0.0  ;;  %v1459_v48 = vmul.f32 %v1427_v17, %v1331_v38  ;;  %v1569_v17 = vld [vmem:[%s5130_s5] sm:$0x1] }
 0x140   : > { %v1538_v27 = vadd.f32 %v1537_v41, %v1536_v16  ;;  %v4790_v23 = vmul.f32 0.16666667, %v1457_v57  ;;  %v1545_v32 = vsel %vm1493_vm3, %v4782_v49, 0.0  ;;  %v1460_v55 = vmul.f32 %v1428_v60, %v1332_v52 }
 0x141   : > { %v4794_v7 = vmul.f32 0.16666667, %v1458_v28  ;;  %v1547_v5 = vsel %vm1493_vm3, %v4786_v47, 0.0  ;;  %v4798_v14 = vmul.f32 0.16666667, %v1459_v48  ;;  %v2580_v28 = vld [vmem:[%s5133_s8 + $0x8] sm:$0xff]  }
 0x142   : > { %v1540_v15 = vadd.f32 %v1539_v45, %v1538_v27  ;;  %v1549_v1 = vsel %vm1493_vm3, %v4790_v23, 0.0  ;;  %v4802_v38 = vmul.f32 0.16666667, %v1460_v55  ;;  %v5821_v45 = vmov 0.0   ;;  %v1644_v27 = vld [vmem:[%s5131_s6] sm:$0xff]  ;;  %2524 = vmatprep.subr.bf16.mxu1 %v2580_v28 }
 0x143   : > { %v1551_v31 = vsel %vm1493_vm3, %v4794_v7, 0.0  ;;  %v1553_v52 = vsel %vm1493_vm3, %v4798_v14, 0.0  ;;  %2526 = vmatpush3.bf16.msra.mxu1 %v2580_v28 }
 0x144   : > { %v1542_v63 = vadd.f32 %v1541_v22, %v1540_v15  ;;  %v1555_v13 = vsel %vm1493_vm3, %v4802_v38, 0.0 }
 0x146   : > { %v1544_v42 = vadd.f32 %v1543_v56, %v1542_v63  ;;  %v2581_v56 = vld [vmem:[%s5133_s8] sm:$0xff]  }
 0x147   : > { %2525 = vmatprep.subr.bf16.mxu1 %v2581_v56  ;;  %v1645_v63 = vld [vmem:[%s5132_s7] sm:$0x1] }
 0x148   : > { %v1546_v3 = vadd.f32 %v1545_v32, %v1544_v42  ;;  %2527 = vmatpush3.bf16.msra.mxu1 %v2581_v56 }
 0x14a   : > { %v1548_v29 = vadd.f32 %v1547_v5, %v1546_v3 }
 0x14c   : > { %v1550_v35 = vadd.f32 %v1549_v1, %v1548_v29  ;;  %v5822_v29 = vld [vmem:[#allocation14_spill] sm:$0xff] }
 0x14e   : > { %v1552_v39 = vadd.f32 %v1551_v31, %v1550_v35  ;;  %v5823_v31 = vsub.s32 0, %v5822_v29 }
 0x150   : > { %v1554_v20 = vadd.f32 %v1553_v52, %v1552_v39 }
 0x152   : > { %v1556_v2 = vadd.f32 %v1555_v13, %v1554_v20 }
 0x154   : > { %v1557_v46 = vrot.slane %v1556_v2, 4 }
 0x156   : > { %v1558_v0 = vadd.f32 %v1557_v46, %v1556_v2 }
 0x158   : > { %v1559_v41 = vrot.slane %v1558_v0, 2 }
 0x15a   : > { %v1560_v11 = vadd.f32 %v1559_v41, %v1558_v0 }
 0x15c   : > { %v1561_v16 = vrot.slane %v1560_v11, 1 }
 0x15e   : > { %v1562_v62 = vadd.f32 %v1561_v16, %v1560_v11 }
 0x160   : > { %v1564_v18 = vmul.f32 0.00390625, %v1562_v62 }
 0x162   : > { %2481 = vmatmul.mubr.msk.f32.vlgmr.msra.gmra.mxu0 %vm1493_vm3, %v1564_v18 }
 0x163   : > { %2485 = vmatprep.mubr.msk.f32.mxu0 %vm2709_vm0, %v5821_v45  ;;  %2484 = vmatpush3.msra.mxu0 %v1644_v27 }
 0x164   : > { %2488 = vmatprep.subr.bf16.mxu0 %v2580_v28 }
 0x222   : > { %v1639_v57 = vpop.f32.mrf.mxu0 }
 0x223   : > { %v1640_v22 = vadd.f32 %v1639_v57, %v1569_v17 }
 0x224   : > { %v2482_v15 = vpop.f32.mrf.mxu0 }
 0x225   : > { %v1643_v60 = vmax.f32 %v1640_v22, 0.0 }
 0x227   : > { %2486 = vmatmul.mubr.msk.f32.vlgmr.msra.gmra.mxu0 %vm1646_vm4, %v1643_v60 }
 0x228   : > { %2489 = vmatpush3.bf16.msra.mxu0 %v2580_v28 }
 0x229   : > { %2490 = vmatprep.subr.bf16.mxu0 %v2581_v56 }
 0x22c   : > { %2491 = vmatpush3.bf16.msra.mxu0 %v2581_v56 }
 0x2e7   : > { %v1716_v48 = vpop.f32.mrf.mxu0 }
 0x2e8   : > { %v1717_v32 = vadd.f32 %v1716_v48, %v1645_v63 }
 0x2e9   : > { %v2487_v42 = vpop.f32.mrf.mxu0 }
 0x2ea   : > { %v1720_v55 = vmul.f32 0.16666667, %v1717_v32 }
 0x2ec   : > { %v1721_v5 = vadd.f32 0.5, %v1720_v55 }
 0x2ee   : > { %v1722_v3 = vmax.f32 %v1721_v5, 0.0 }
 0x2f0   : > { %v1723_v1 = vmin.f32 %v1722_v3, 1.0 }
 0x2f2   : > { %v1727_v35 = vrot.slane %v1723_v1, %v5823_v31 }
 0x2f4   : > { %v1728_v52 = vmul.f32 %v1727_v35, %v4576_v61  ;;  %v1729_v39 = vmul.f32 %v1727_v35, %v4578_v9  ;;  %v1740_v13 = vmul.f32 %v1727_v35, %v4678_v25  ;;  %v1741_v20 = vmul.f32 %v1727_v35, %v4688_v37 }
 0x2f5   : > { %v1730_v2 = vmul.f32 %v1727_v35, %v4580_v36  ;;  %v1731_v46 = vmul.f32 %v1727_v35, %v4591_v58  ;;  %v1742_v0 = vmul.f32 %v1727_v35, %v4698_v21  ;;  %v1743_v41 = vmul.f32 %v1727_v35, %v4708_v54 }
 0x2f6   : > { %v1760_v11 = vpack.c.bf16 %v1729_v39, %v1728_v52  ;;  %v1766_v16 = vpack.c.bf16 %v1741_v20, %v1740_v13  ;;  %v1732_v62 = vmul.f32 %v1727_v35, %v4594_v6  ;;  %v1733_v61 = vmul.f32 %v1727_v35, %v4608_v8 }
 0x2f7   : > { %v1761_v18 = vpack.c.bf16 %v1731_v46, %v1730_v2  ;;  %v1767_v9 = vpack.c.bf16 %v1743_v41, %v1742_v0  ;;  %v1744_v25 = vmul.f32 %v1727_v35, %v4718_v4  ;;  %v1745_v37 = vmul.f32 %v1727_v35, %v4728_v53 }
 0x2f8   : > { %2492 = vmatprep.mubr.msk.bf16.mxu0 %vm1493_vm3, %v1760_v11  ;;  %2504 = vmatprep.mubr.msk.bf16.mxu1 %vm1493_vm3, %v1766_v16  ;;  %v1762_v36 = vpack.c.bf16 %v1733_v61, %v1732_v62  ;;  %v1734_v6 = vmul.f32 %v1727_v35, %v4618_v30  ;;  %v1735_v8 = vmul.f32 %v1727_v35, %v4628_v33 }
 0x2f9   : > { %2493 = vmatmul.mubr.msk.bf16.vlgmr.msra.gmra.mxu0 %vm1493_vm3, %v1761_v18  ;;  %2505 = vmatmul.mubr.msk.bf16.vlgmr.msra.gmra.mxu1 %vm1493_vm3, %v1767_v9  ;;  %v1768_v58 = vpack.c.bf16 %v1745_v37, %v1744_v25  ;;  %v1746_v21 = vmul.f32 %v1727_v35, %v4736_v59  ;;  %v1747_v54 = vmul.f32 %v1727_v35, %v4744_v34 }
 0x2fa   : > { %2496 = vmatprep.mubr.msk.bf16.mxu0 %vm1493_vm3, %v1762_v36  ;;  %v1736_v4 = vmul.f32 %v1727_v35, %v4638_v43  ;;  %v1737_v53 = vmul.f32 %v1727_v35, %v4648_v24  ;;  %v1748_v45 = vmul.f32 %v1727_v35, %v4751_v10  ;;  %v1749_v27 = vmul.f32 %v1727_v35, %v4758_v40 }
 0x2fb   : > { %2508 = vmatprep.mubr.msk.bf16.mxu1 %vm1493_vm3, %v1768_v58  ;;  %v1763_v17 = vpack.c.bf16 %v1735_v8, %v1734_v6  ;;  %v1769_v57 = vpack.c.bf16 %v1747_v54, %v1746_v21  ;;  %v1738_v30 = vmul.f32 %v1727_v35, %v4658_v19  ;;  %v1739_v33 = vmul.f32 %v1727_v35, %v4668_v26 }
 0x2fc   : > { %v1764_v22 = vpack.c.bf16 %v1737_v53, %v1736_v4  ;;  %v1770_v15 = vpack.c.bf16 %v1749_v27, %v1748_v45  ;;  %v1750_v43 = vmul.f32 %v1727_v35, %v4763_v12  ;;  %v1751_v24 = vmul.f32 %v1727_v35, %v4768_v51 }
 0x2fd   : > { %v1752_v59 = vmul.f32 %v1727_v35, %v4773_v44  ;;  %v1753_v34 = vmul.f32 %v1727_v35, %v4778_v50  ;;  %v1765_v10 = vpack.c.bf16 %v1739_v33, %v1738_v30  ;;  %v1754_v19 = vmul.f32 %v1727_v35, %v4782_v49  ;;  %v4881_v49 = vld [vmem:[%s5134_s9] ss:$0 sm:$0xff] }
 0x2fe   : > { %v1771_v40 = vpack.c.bf16 %v1751_v24, %v1750_v43  ;;  %v1755_v26 = vmul.f32 %v1727_v35, %v4786_v47  ;;  %v1756_v12 = vmul.f32 %v1727_v35, %v4790_v23  ;;  %v1757_v51 = vmul.f32 %v1727_v35, %v4794_v7  ;;  %v4886_v23 = vld [vmem:[%s5135_s10] ss:$0 sm:$0xff] }
 0x2ff   : > { %v1772_v60 = vpack.c.bf16 %v1753_v34, %v1752_v59  ;;  %v1758_v50 = vmul.f32 %v1727_v35, %v4798_v14  ;;  %v1759_v56 = vmul.f32 %v1727_v35, %v4802_v38 }
 0x300   : > { %v1773_v44 = vpack.c.bf16 %v1755_v26, %v1754_v19  ;;  %v1774_v28 = vpack.c.bf16 %v1757_v51, %v1756_v12 }
 0x301   : > { %2497 = vmatmul.mubr.msk.bf16.gmra.mxu0 %vm1493_vm3, %v1763_v17  ;;  %2509 = vmatmul.mubr.msk.bf16.gmra.mxu1 %vm1493_vm3, %v1769_v57  ;;  %v1775_v63 = vpack.c.bf16 %v1759_v56, %v1758_v50 }
 0x302   : > { %2500 = vmatprep.mubr.msk.bf16.mxu0 %vm1493_vm3, %v1764_v22  ;;  %2512 = vmatprep.mubr.msk.bf16.mxu1 %vm1493_vm3, %v1770_v15 }
 0x309   : > { %2501 = vmatmul.mubr.msk.bf16.gmra.mxu0 %vm1493_vm3, %v1765_v10  ;;  %2513 = vmatmul.mubr.msk.bf16.gmra.mxu1 %vm1493_vm3, %v1771_v40 }
 0x30a   : > { %2516 = vmatprep.mubr.msk.bf16.mxu1 %vm1493_vm3, %v1772_v60 }
 0x311   : > { %2517 = vmatmul.mubr.msk.bf16.gmra.mxu1 %vm1493_vm3, %v1773_v44 }
 0x312   : > { %2520 = vmatprep.mubr.msk.bf16.mxu1 %vm1493_vm3, %v1774_v28 }
 0x319   : > { %2521 = vmatmul.mubr.msk.bf16.gmra.mxu1 %vm1493_vm3, %v1775_v63 }
 0x3b9   : > { %v2494_v47 = vpop.f32.mrf.mxu0  ;;  %v4888_v7 = vpop.f32.mrf.mxu1 }
 0x3ba   : > { %v2010_v14 = vmul.f32 %v2494_v47, %v4881_v49 }
 0x3bb   : > { %v1874_v48 = vpop.f32.mrf.mxu0  ;;  %v1922_v38 = vpop.f32.mrf.mxu1 }
 0x3bc   : > { %v2049_v32 = vadd.f32 %v4886_v23, %v2010_v14  ;;  %v2008_v42 = vmul.f32 %v4881_v49, %v1874_v48  ;;  %v4919_v50 = vmul.f32 %v4881_v49, %v1922_v38 }
 0x3bd   : > { %v2495_v55 = vpop.f32.mrf.mxu0  ;;  %v4893_v5 = vpop.f32.mrf.mxu1 }
 0x3be   : > { %v2047_v29 = vadd.f32 %v4886_v23, %v2008_v42  ;;  %v2081_v31 = vadd.f32 3.0, %v2049_v32  ;;  %v2011_v9 = vmul.f32 %v2495_v55, %v4881_v49 }
 0x3bf   : > { %v1877_v3 = vpop.f32.mrf.mxu0  ;;  %v4895_v1 = vpop.f32.mrf.mxu1 }
 0x3c0   : > { %v2009_v35 = vmul.f32 %v4881_v49, %v1877_v3  ;;  %v2079_v13 = vadd.f32 3.0, %v2047_v29  ;;  %v2113_v11 = vmax.f32 %v2081_v31, 0.0  ;;  %v2050_v22 = vadd.f32 %v4886_v23, %v2011_v9 }
 0x3c1   : > { %v2498_v52 = vpop.f32.mrf.mxu0  ;;  %v2510_v39 = vpop.f32.mrf.mxu1 }
 0x3c2   : > { %v2048_v20 = vadd.f32 %v4886_v23, %v2009_v35  ;;  %v2111_v0 = vmax.f32 %v2079_v13, 0.0  ;;  %v2026_v25 = vmul.f32 %v2510_v39, %v4881_v49  ;;  %v2145_v54 = vmin.f32 %v2113_v11, 6.0 }
 0x3c3   : > { %v1890_v2 = vpop.f32.mrf.mxu0  ;;  %v1938_v46 = vpop.f32.mrf.mxu1  ;;  %v2014_v15 = vmul.f32 %v2498_v52, %v4881_v49  ;;  %v2082_v56 = vadd.f32 3.0, %v2050_v22 }
 0x3c4   : > { %v2080_v41 = vadd.f32 3.0, %v2048_v20  ;;  %v2024_v16 = vmul.f32 %v4881_v49, %v1938_v46  ;;  %v2143_v18 = vmin.f32 %v2111_v0, 6.0  ;;  %v2012_v21 = vmul.f32 %v4881_v49, %v1890_v2 }
 0x3c5   : > { %v2499_v62 = vpop.f32.mrf.mxu0  ;;  %v2511_v61 = vpop.f32.mrf.mxu1  ;;  %v4909_v30 = vadd.f32 %v4886_v23, %v2026_v25  ;;  %v2177_v28 = vmul.f32 %v2145_v54, %v2049_v32  ;;  %v4922_v63 = vadd.f32 %v4886_v23, %v2014_v15  ;;  %v2114_v11 = vmax.f32 %v2082_v56, 0.0 }
 0x3c6   : > { %v2175_v58 = vmul.f32 %v2143_v18, %v2047_v29  ;;  %v2112_v6 = vmax.f32 %v2080_v41, 0.0  ;;  %v2063_v8 = vadd.f32 %v4886_v23, %v2024_v16  ;;  %v2015_v33 = vmul.f32 %v2499_v62, %v4881_v49 }
 0x3c7   : > { %v1893_v37 = vpop.f32.mrf.mxu0  ;;  %v1941_v36 = vpop.f32.mrf.mxu1  ;;  %v2027_v43 = vmul.f32 %v2511_v61, %v4881_v49  ;;  %v4915_v40 = vadd.f32 %v4886_v23, %v2012_v21  ;;  %v2097_v14 = vadd.f32 3.0, %v4909_v30  ;;  %v2085_v46 = vadd.f32 3.0, %v4922_v63 }
 0x3c8   : > { %v2025_v4 = vmul.f32 %v4881_v49, %v1941_v36  ;;  %v2207_v27 = vmul.f32 0.16666667, %v2175_v58  ;;  %v2144_v17 = vmin.f32 %v2112_v6, 6.0  ;;  %v2095_v57 = vadd.f32 3.0, %v2063_v8 }
 0x3c9   : > { %v2502_v53 = vpop.f32.mrf.mxu0  ;;  %v2514_v45 = vpop.f32.mrf.mxu1  ;;  %v2013_v60 = vmul.f32 %v4881_v49, %v1893_v37  ;;  %v4927_v48 = vadd.f32 %v4886_v23, %v2015_v33  ;;  %v2066_v42 = vadd.f32 %v4886_v23, %v2027_v43  ;;  %v2083_v32 = vadd.f32 3.0, %v4915_v40 }
 0x3ca   : > { %v2064_v24 = vadd.f32 %v4886_v23, %v2025_v4  ;;  %2239 = vxpose.xlu0.b32.start [1/16] (narrow) %v2207_v27, 64  ;;  %v2176_v34 = vmul.f32 %v2144_v17, %v2048_v20  ;;  %v2127_v10 = vmax.f32 %v2095_v57, 0.0  ;;  %v2018_v29 = vmul.f32 %v2502_v53, %v4881_v49 }
 0x3cb   : > { %v1954_v59 = vpop.f32.mrf.mxu1  ;;  %v1906_v26 = vpop.f32.mrf.mxu0  ;;  %v4932_v38 = vadd.f32 %v4886_v23, %v2013_v60  ;;  %v2030_v31 = vmul.f32 %v2514_v45, %v4881_v49  ;;  %v2209_v20 = vmul.f32 0.16666667, %v2177_v28  ;;  %v4945_v16 = vadd.f32 3.0, %v4927_v48 }
 0x3cc   : > { %v2096_v19 = vadd.f32 3.0, %v2064_v24  ;;  %v2208_v51 = vmul.f32 0.16666667, %v2176_v34  ;;  %v2159_v44 = vmin.f32 %v2127_v10, 6.0  ;;  %v2028_v47 = vmul.f32 %v4881_v49, %v1954_v59 }
 0x3cd   : > { %v2515_v12 = vpop.f32.mrf.mxu1  ;;  %v2503_v35 = vpop.f32.mrf.mxu0  ;;  %v2016_v0 = vmul.f32 %v4881_v49, %v1906_v26  ;;  %v2098_v62 = vadd.f32 3.0, %v2066_v42  ;;  %v2129_v9 = vmax.f32 %v2097_v14, 0.0  ;;  %v2084_v25 = vadd.f32 3.0, %v4932_v38 }
 0x3ce   : > { %2240 = vxpose.xlu0.b32.cont [2/16] (narrow) %v2208_v51, 64  ;;  %v2191_v3 = vmul.f32 %v2159_v44, %v2063_v8  ;;  %v2128_v2 = vmax.f32 %v2096_v19, 0.0  ;;  %v4942_v41 = vadd.f32 %v4886_v23, %v2028_v47  ;;  %v4949_v37 = vadd.f32 %v4886_v23, %v2018_v29 }
 0x3cf   : > { %v1957_v55 = vpop.f32.mrf.mxu1  ;;  %v4952_v36 = vadd.f32 %v4886_v23, %v2030_v31  ;;  %v2146_v58 = vmin.f32 %v2114_v11, 6.0  ;;  %v1909_v6 = vpop.f32.mrf.mxu0  ;;  %v2161_v4 = vmin.f32 %v2129_v9, 6.0  ;;  %v2115_v53 = vmax.f32 %v2083_v32, 0.0 }
 0x3d0   : > { %v2029_v52 = vmul.f32 %v4881_v49, %v1957_v55  ;;  %v2223_v13 = vmul.f32 0.16666667, %v2191_v3  ;;  %v2160_v18 = vmin.f32 %v2128_v2, 6.0  ;;  %v4960_v45 = vadd.f32 %v4886_v23, %v2016_v0 }
 0x3d1   : > { %v4937_v39 = vpop.f32.mrf.mxu1  ;;  %v2099_v27 = vadd.f32 3.0, %v4942_v41  ;;  %v2031_v17 = vmul.f32 %v2515_v12, %v4881_v49  ;;  %v2178_v57 = vmul.f32 %v2146_v58, %v2050_v22  ;;  %v2193_v43 = vmul.f32 %v2161_v4, %v4909_v30 }
 0x3d2   : > { %2271 = vxpose.xlu1.b32.start [1/16] (narrow) %v2223_v13, 64  ;;  %2241 = vxpose.xlu0.b32.cont [3/16] (narrow) %v2209_v20, 64  ;;  %v4955_v8 = vadd.f32 %v4886_v23, %v2029_v52  ;;  %v2192_v54 = vmul.f32 %v2160_v18, %v2064_v24  ;;  %v2147_v59 = vmin.f32 %v2115_v53, 6.0  ;;  %v2130_v34 = vmax.f32 %v2098_v62, 0.0 }
 0x3d3   : > { %v1970_v61 = vpop.f32.mrf.mxu1  ;;  %v2101_v10 = vadd.f32 3.0, %v4952_v36  ;;  %v2019_v24 = vmul.f32 %v2503_v35, %v4881_v49  ;;  %v2017_v60 = vmul.f32 %v4881_v49, %v1909_v6  ;;  %v2210_v19 = vmul.f32 0.16666667, %v2178_v57 }
 0x3d4   : > { %v2224_v15 = vmul.f32 0.16666667, %v2192_v54  ;;  %v2100_v26 = vadd.f32 3.0, %v4955_v8  ;;  %v2179_v12 = vmul.f32 %v2147_v59, %v4915_v40  ;;  %v2162_v22 = vmin.f32 %v2130_v34, 6.0 }
 0x3d5   : > { %v4957_v21 = vpop.f32.mrf.mxu1  ;;  %v2116_v44 = vmax.f32 %v2084_v25, 0.0  ;;  %v4971_v28 = vadd.f32 %v4886_v23, %v2031_v17  ;;  %v2032_v30 = vmul.f32 %v4881_v49, %v1970_v61  ;;  %v2131_v47 = vmax.f32 %v2099_v27, 0.0 }
 0x3d6   : > { %2272 = vxpose.xlu1.b32.cont [2/16] (narrow) %v2224_v15, 64  ;;  %2242 = vxpose.xlu0.b32.cont [4/16] (narrow) %v2210_v19, 64  ;;  %v2225_v14 = vmul.f32 0.16666667, %v2193_v43  ;;  %v2194_v3 = vmul.f32 %v2162_v22, %v2066_v42  ;;  %v2117_v29 = vmax.f32 %v2085_v46, 0.0  ;;  %v4978_v31 = vadd.f32 %v4886_v23, %v2017_v60 }
 0x3d7   : > { %v1973_v33 = vpop.f32.mrf.mxu1  ;;  %v2148_v32 = vmin.f32 %v2116_v44, 6.0  ;;  %v2211_v35 = vmul.f32 0.16666667, %v2179_v12  ;;  %v2163_v52 = vmin.f32 %v2131_v47, 6.0  ;;  %v2087_v13 = vadd.f32 3.0, %v4960_v45 }
 0x3d8   : > { %v2149_v0 = vmin.f32 %v2117_v29, 6.0  ;;  %v2132_v11 = vmax.f32 %v2100_v26, 0.0  ;;  %v2102_v42 = vadd.f32 3.0, %v4971_v28  ;;  %v4987_v46 = vadd.f32 %v4886_v23, %v2032_v30 }
 0x3d9   : > { %v2522_v51 = vpop.f32.mrf.mxu1  ;;  %v2180_v2 = vmul.f32 %v2148_v32, %v4932_v38  ;;  %v2033_v62 = vmul.f32 %v4881_v49, %v1973_v33  ;;  %v2226_v18 = vmul.f32 0.16666667, %v2194_v3  ;;  %v2195_v9 = vmul.f32 %v2163_v52, %v4942_v41 }
 0x3da   : > { %v2038_v56 = vmul.f32 %v2522_v51, %v4881_v49  ;;  %2273 = vxpose.xlu1.b32.cont [3/16] (narrow) %v2225_v14, 64  ;;  %2243 = vxpose.xlu0.b32.cont [5/16] (narrow) %v2211_v35, 64  ;;  %v2164_v25 = vmin.f32 %v2132_v11, 6.0  ;;  %v2118_v58 = vmax.f32 %v4945_v16, 0.0  ;;  %v2088_v38 = vadd.f32 3.0, %v4978_v31 }
 0x3db   : > { %v4975_v55 = vpop.f32.mrf.mxu1  ;;  %v2212_v54 = vmul.f32 0.16666667, %v2180_v2  ;;  %v2181_v4 = vmul.f32 %v2149_v0, %v4922_v63  ;;  %v2089_v53 = vadd.f32 3.0, %v4949_v37  ;;  %v5000_v27 = vadd.f32 %v4886_v23, %v2019_v24 }
 0x3dc   : > { %v4981_v40 = vadd.f32 %v4886_v23, %v2038_v56  ;;  %v2150_v17 = vmin.f32 %v2118_v58, 6.0  ;;  %v2133_v57 = vmax.f32 %v2101_v10, 0.0  ;;  %v2034_v41 = vmul.f32 %v4937_v39, %v4881_v49 }
 0x3dd   : > { %v2523_v20 = vpop.f32.mrf.mxu1  ;;  %v2103_v16 = vadd.f32 3.0, %v4987_v46  ;;  %v5006_v15 = vadd.f32 %v4886_v23, %v2033_v62  ;;  %v2119_v33 = vmax.f32 %v2087_v13, 0.0  ;;  %v2227_v43 = vmul.f32 0.16666667, %v2195_v9 }
 0x3de   : > { %v2039_v61 = vmul.f32 %v2523_v20, %v4881_v49  ;;  %2274 = vxpose.xlu1.b32.cont [4/16] (narrow) %v2226_v18, 64  ;;  %2244 = vxpose.xlu0.b32.cont [6/16] (narrow) %v2212_v54, 64  ;;  %v2196_v63 = vmul.f32 %v2164_v25, %v4955_v8  ;;  %v2165_v59 = vmin.f32 %v2133_v57, 6.0  ;;  %v2134_v34 = vmax.f32 %v2102_v42, 0.0 }
 0x3df   : > { %v2213_v24 = vmul.f32 0.16666667, %v2181_v4  ;;  %v2182_v60 = vmul.f32 %v2150_v17, %v4927_v48  ;;  %v2151_v19 = vmin.f32 %v2119_v33, 6.0  ;;  %v2120_v10 = vmax.f32 %v2088_v38, 0.0 }
 0x3e0   : > { %v4995_v6 = vadd.f32 %v4886_v23, %v2039_v61  ;;  %v5012_v39 = vadd.f32 %v4886_v23, %v4919_v50  ;;  %v2021_v26 = vmul.f32 %v4881_v49, %v4895_v1  ;;  %v2090_v51 = vadd.f32 3.0, %v5000_v27 }
 0x3e1   : > { %v5018_v12 = vadd.f32 %v4886_v23, %v2034_v41  ;;  %v2035_v8 = vmul.f32 %v4957_v21, %v4881_v49  ;;  %v2104_v48 = vadd.f32 3.0, %v5006_v15  ;;  %v2228_v22 = vmul.f32 0.16666667, %v2196_v63 }
 0x3e2   : > { %2275 = vxpose.xlu1.b32.cont [5/16] (narrow) %v2227_v43, 64  ;;  %2245 = vxpose.xlu0.b32.cont [7/16] (narrow) %v2213_v24, 64  ;;  %v2197_v44 = vmul.f32 %v2165_v59, %v4952_v36  ;;  %v2166_v50 = vmin.f32 %v2134_v34, 6.0  ;;  %v2135_v30 = vmax.f32 %v2103_v16, 0.0  ;;  %v2214_v56 = vmul.f32 0.16666667, %v2182_v60 }
 0x3e3   : > { %v2183_v1 = vmul.f32 %v2151_v19, %v4960_v45  ;;  %v2152_v47 = vmin.f32 %v2120_v10, 6.0  ;;  %v2121_v14 = vmax.f32 %v2089_v53, 0.0  ;;  %v2022_v3 = vmul.f32 %v4888_v7, %v4881_v49  ;;  %v1989_v45 = vpop.f32.mrf.mxu1 }
 0x3e4   : > { %v2091_v32 = vadd.f32 3.0, %v5012_v39  ;;  %v5029_v21 = vadd.f32 %v4886_v23, %v2021_v26  ;;  %v2105_v29 = vadd.f32 3.0, %v5018_v12  ;;  %v2074_v36 = vadd.f32 %v4886_v23, %v2035_v8 }
 0x3e5   : > { %v2036_v35 = vmul.f32 %v4881_v49, %v4975_v55  ;;  %v2229_v52 = vmul.f32 0.16666667, %v2197_v44  ;;  %v2198_v13 = vmul.f32 %v2166_v50, %v4971_v28  ;;  %v2167_v20 = vmin.f32 %v2135_v30, 6.0 }
 0x3e6   : > { %2276 = vxpose.xlu1.b32.cont [6/16] (narrow) %v2228_v22, 64  ;;  %2246 = vxpose.xlu0.b32.cont [8/16] (narrow) %v2214_v56, 64  ;;  %v2136_v7 = vmax.f32 %v2104_v48, 0.0  ;;  %v2215_v2 = vmul.f32 0.16666667, %v2183_v1  ;;  %v2184_v0 = vmul.f32 %v2152_v47, %v4978_v31  ;;  %v2153_v11 = vmin.f32 %v2121_v14, 6.0 }
 0x3e7   : > { %v2122_v42 = vmax.f32 %v2090_v51, 0.0  ;;  %v2061_v62 = vadd.f32 %v4886_v23, %v2022_v3  ;;  %v2023_v61 = vmul.f32 %v4893_v5, %v4881_v49  ;;  %v2092_v55 = vadd.f32 3.0, %v5029_v21 }
 0x3e8   : > { %v2106_v18 = vadd.f32 3.0, %v2074_v36  ;;  %v2075_v9 = vadd.f32 %v4886_v23, %v2036_v35  ;;  %v2037_v28 = vmul.f32 %v4881_v49, %v1989_v45  ;;  %v2230_v25 = vmul.f32 0.16666667, %v2198_v13 }
 0x3e9   : > { %v2199_v58 = vmul.f32 %v2167_v20, %v4987_v46  ;;  %v2168_v31 = vmin.f32 %v2136_v7, 6.0  ;;  %v2137_v38 = vmax.f32 %v2105_v29, 0.0  ;;  %v2216_v54 = vmul.f32 0.16666667, %v2184_v0 }
 0x3ea   : > { %2277 = vxpose.xlu1.b32.cont [7/16] (narrow) %v2229_v52, 64  ;;  %2247 = vxpose.xlu0.b32.cont [9/16] (narrow) %v2215_v2, 64  ;;  %v2185_v4 = vmul.f32 %v2153_v11, %v4949_v37  ;;  %v2154_v53 = vmin.f32 %v2122_v42, 6.0  ;;  %v2123_v17 = vmax.f32 %v2091_v32, 0.0  ;;  %v2093_v5 = vadd.f32 3.0, %v2061_v62 }
 0x3eb   : > { %v2062_v57 = vadd.f32 %v4886_v23, %v2023_v61  ;;  %v2107_v41 = vadd.f32 3.0, %v2075_v9  ;;  %v2076_v16 = vadd.f32 %v4886_v23, %v2037_v28  ;;  %v2231_v49 = vmul.f32 0.16666667, %v2199_v58 }
 0x3ec   : > { %v2200_v33 = vmul.f32 %v2168_v31, %v5006_v15  ;;  %v2169_v43 = vmin.f32 %v2137_v38, 6.0  ;;  %v2138_v46 = vmax.f32 %v2106_v18, 0.0  ;;  %v2217_v63 = vmul.f32 0.16666667, %v2185_v4 }
 0x3ed   : > { %v2186_v59 = vmul.f32 %v2154_v53, %v5000_v27  ;;  %v2155_v34 = vmin.f32 %v2123_v17, 6.0  ;;  %v2124_v37 = vmax.f32 %v2092_v55, 0.0  ;;  %v2108_v24 = vadd.f32 3.0, %v2076_v16 }
 0x3ee   : > { %2278 = vxpose.xlu1.b32.cont [8/16] (narrow) %v2230_v25, 64  ;;  %2248 = vxpose.xlu0.b32.cont [10/16] (narrow) %v2216_v54, 64  ;;  %v2125_v60 = vmax.f32 %v2093_v5, 0.0  ;;  %v2232_v19 = vmul.f32 0.16666667, %v2200_v33  ;;  %v2201_v10 = vmul.f32 %v2169_v43, %v5018_v12  ;;  %v2170_v26 = vmin.f32 %v2138_v46, 6.0 }
 0x3ef   : > { %v2139_v23 = vmax.f32 %v2107_v41, 0.0  ;;  %v2094_v51 = vadd.f32 3.0, %v2062_v57  ;;  %v2218_v8 = vmul.f32 0.16666667, %v2186_v59  ;;  %v2187_v15 = vmul.f32 %v2155_v34, %v5012_v39 }
 0x3f0   : > { %v2156_v48 = vmin.f32 %v2124_v37, 6.0  ;;  %v2109_v22 = vadd.f32 3.0, %v4981_v40  ;;  %v2233_v27 = vmul.f32 0.16666667, %v2201_v10  ;;  %v2202_v44 = vmul.f32 %v2170_v26, %v2074_v36 }
 0x3f1   : > { %v2171_v50 = vmin.f32 %v2139_v23, 6.0  ;;  %v2140_v30 = vmax.f32 %v2108_v24, 0.0  ;;  %v2219_v56 = vmul.f32 0.16666667, %v2187_v15  ;;  %v2157_v47 = vmin.f32 %v2125_v60, 6.0 }
 0x3f2   : > { %2279 = vxpose.xlu1.b32.cont [9/16] (narrow) %v2231_v49, 64  ;;  %2249 = vxpose.xlu0.b32.cont [11/16] (narrow) %v2217_v63, 64  ;;  %v2188_v1 = vmul.f32 %v2156_v48, %v5029_v21  ;;  %v2126_v12 = vmax.f32 %v2094_v51, 0.0  ;;  %v2110_v14 = vadd.f32 3.0, %v4995_v6  ;;  %v2234_v3 = vmul.f32 0.16666667, %v2202_v44 }
 0x3f3   : > { %v2203_v39 = vmul.f32 %v2171_v50, %v2075_v9  ;;  %v2172_v32 = vmin.f32 %v2140_v30, 6.0  ;;  %v2141_v29 = vmax.f32 %v2109_v22, 0.0  ;;  %v2189_v45 = vmul.f32 %v2157_v47, %v2061_v62 }
 0x3f4   : > { %v2220_v35 = vmul.f32 0.16666667, %v2188_v1  ;;  %v2158_v52 = vmin.f32 %v2126_v12, 6.0  ;;  %v2142_v7 = vmax.f32 %v2110_v14, 0.0 }
 0x3f5   : > { %v2235_v36 = vmul.f32 0.16666667, %v2203_v39  ;;  %v2204_v13 = vmul.f32 %v2172_v32, %v2076_v16  ;;  %v2173_v20 = vmin.f32 %v2141_v29, 6.0  ;;  %v2221_v21 = vmul.f32 0.16666667, %v2189_v45 }
 0x3f6   : > { %2280 = vxpose.xlu1.b32.cont [10/16] (narrow) %v2232_v19, 64  ;;  %2250 = vxpose.xlu0.b32.cont [12/16] (narrow) %v2218_v8, 64  ;;  %v2190_v2 = vmul.f32 %v2158_v52, %v2062_v57  ;;  %v2174_v42 = vmin.f32 %v2142_v7, 6.0 }
 0x3f7   : > { %v2236_v0 = vmul.f32 0.16666667, %v2204_v13  ;;  %v2205_v11 = vmul.f32 %v2173_v20, %v4981_v40 }
 0x3f8   : > { %v2222_v61 = vmul.f32 0.16666667, %v2190_v2  ;;  %v2206_v55 = vmul.f32 %v2174_v42, %v4995_v6 }
 0x3f9   : > { %v2237_v62 = vmul.f32 0.16666667, %v2205_v11 }
 0x3fa   : > { %2281 = vxpose.xlu1.b32.cont [11/16] (narrow) %v2233_v27, 64  ;;  %2251 = vxpose.xlu0.b32.cont [13/16] (narrow) %v2219_v56, 64  ;;  %v2238_v18 = vmul.f32 0.16666667, %v2206_v55 }
 0x3fe   : > { %2282 = vxpose.xlu1.b32.cont [12/16] (narrow) %v2234_v3, 64  ;;  %2252 = vxpose.xlu0.b32.cont [14/16] (narrow) %v2220_v35, 64 }
 0x402   : > { %2283 = vxpose.xlu1.b32.cont [13/16] (narrow) %v2235_v36, 64  ;;  %2253 = vxpose.xlu0.b32.cont [15/16] (narrow) %v2221_v21, 64 }
 0x406   : > { %2284 = vxpose.xlu1.b32.cont [14/16] (narrow) %v2236_v0, 64  ;;  %2254 = vxpose.xlu0.b32.end [16/16] (narrow) %v2222_v61, 64 }
 0x40a   : > { %2285 = vxpose.xlu1.b32.cont [15/16] (narrow) %v2237_v62, 64 }
 0x40e   : > { %2286 = vxpose.xlu1.b32.end [16/16] (narrow) %v2238_v18, 64 }
 0x446   : > { %v2255_v9 = vpop.trf.xlu0 }
 0x447   : > { %2303 = vst [vmem:[%s5057_s12] sm:$0xff] %v2255_v9 }
 0x44a   : > { %v2256_v40 = vpop.trf.xlu0 }
 0x44b   : > { %2305 = vst [vmem:[%s5057_s12 + $0x10] sm:$0xff] %v2256_v40 }
 0x44e   : > { %v2287_v6 = vpop.trf.xlu1  ;;  %v2257_v28 = vpop.trf.xlu0 }
 0x44f   : > { %2304 = vst [vmem:[%s5057_s12 + $0x8] sm:$0xff] %v2287_v6  ;;  %2307 = vst [vmem:[%s5057_s12 + $0x20] sm:$0xff] %v2257_v28 }
 0x452   : > { %v2288_v25 = vpop.trf.xlu1  ;;  %v2258_v58 = vpop.trf.xlu0 }
 0x453   : > { %2306 = vst [vmem:[%s5057_s12 + $0x18] sm:$0xff] %v2288_v25  ;;  %2309 = vst [vmem:[%s5057_s12 + $0x30] sm:$0xff] %v2258_v58 }
 0x456   : > { %v2289_v31 = vpop.trf.xlu1  ;;  %v2259_v38 = vpop.trf.xlu0 }
 0x457   : > { %2308 = vst [vmem:[%s5057_s12 + $0x28] sm:$0xff] %v2289_v31  ;;  %2311 = vst [vmem:[%s5057_s12 + $0x40] sm:$0xff] %v2259_v38 }
 0x45a   : > { %v2290_v54 = vpop.trf.xlu1  ;;  %v2260_v4 = vpop.trf.xlu0 }
 0x45b   : > { %2310 = vst [vmem:[%s5057_s12 + $0x38] sm:$0xff] %v2290_v54  ;;  %2313 = vst [vmem:[%s5057_s12 + $0x50] sm:$0xff] %v2260_v4 }
 0x45e   : > { %v2291_v53 = vpop.trf.xlu1  ;;  %v2261_v17 = vpop.trf.xlu0 }
 0x45f   : > { %2312 = vst [vmem:[%s5057_s12 + $0x48] sm:$0xff] %v2291_v53  ;;  %2315 = vst [vmem:[%s5057_s12 + $0x60] sm:$0xff] %v2261_v17 }
 0x462   : > { %v2292_v5 = vpop.trf.xlu1  ;;  %v2262_v57 = vpop.trf.xlu0 }
 0x463   : > { %2314 = vst [vmem:[%s5057_s12 + $0x58] sm:$0xff] %v2292_v5  ;;  %2317 = vst [vmem:[%s5057_s12 + $0x70] sm:$0xff] %v2262_v57 }
 0x466   : > { %v2293_v41 = vpop.trf.xlu1 }
 0x467   : > { %2316 = vst [vmem:[%s5057_s12 + $0x68] sm:$0xff] %v2293_v41 }
 0x46a   : > { %v2294_v16 = vpop.trf.xlu1 }
 0x46b   : > { %2318 = vst [vmem:[%s5057_s12 + $0x78] sm:$0xff] %v2294_v16 }
 0x46c   : > { %2652 = shalt.err (!%p2649_p10)
}
 0x46d   : > { %s2653_s24 = scalar_lea.hbm %s5079_s14, 2048  ;;  %s2657_s12 = scalar_lea.hbm %s5136_s11, 4096 }
 0x46e   : > { %p2654_p0 = scmp.ne.s32.totalorder %s5079_s14, %s2653_s24  ;;  %p2658_p1 = scmp.lt.s32.totalorder %s5079_s14, %s5136_s11 }
 0x46f   : > { %p2659_p3 = scmp.lt.s32.totalorder %s2657_s12, %s2653_s24 }
 0x470   : > { %p2655_p2 = pnand %p2654_p0, %p5824_p12 }
 0x471   : > { %p2660_p6 = por %p2659_p3, %p2658_p1 }
 0x472   : > { %p2656_p9 = pneg %p2655_p2 }
 0x474   : > { %p2661_p11 = pnand %p2660_p6, %p2656_p9 }
 0x476   : > { %2664 = shalt.err (!%p2661_p11)
}
 0x477   : > { %s2711_s15 = smov 256   ;;  %s2712_s16 = smov 16  }
 0x478   : > { %2530 = dma.vmem_to_hbm [thread:$0]  (%p5824_p12), %s5081_s13, 2048, %s5079_s14, %s2320_s27, %s2711_s15, %s2711_s15, %s2712_s16  }
 0x479 PF: > { %s5825_s21 = sld [smem:[#allocation11_spill]]  ;;  %s2348_s19 = sand.u32 1, %s2691_s17  }
 0x47a   : > { %p5827_p4 = scmp.ge.s32.totalorder %s2703_s20, 2  ;;  %s2349_s26 = scalar_lea.sflag [#allocation4], %s2348_s19 }
 0x47f   : > { %p5826_p13 = scmp.ne.s32.totalorder %s5825_s21, 0 }
 0x481   : > { %p2537_p5 = pnand %p5827_p4, %p5826_p13 }
 0x483   : > { %p2538_p7 = pneg %p2537_p5 }
 0x485   : > { %2686 = dma.done.wait (%p2538_p7), %s2349_s26, 2048  }
 0x486   : > { %2688 = vsyncadd (%p2538_p7), %s2349_s26, 4294965248  ;;  %s5828_s20 = sld [smem:[#allocation9_spill]]  ;;  %s5831_s17 = smov %s2695_s18 }
 0x487   : > { %s5829_s24 = sld [smem:[#allocation8_spill]] }
 0x488   : > { %s5830_s19 = sld [smem:[#allocation10_spill]] }
 0x48c   : > { %p24_p8 = scmp.ge.s32.totalorder %s5828_s20, 4  }
 0x48d   : > { %s5832_s18 = smov %s5829_s24 }
 0x48e   :  { %26 = sbr.rel (!%p24_p8) target bundleno = 5 (0x5), region = 109 }
 0x493   :  { %2354 = vsyncpa [#allocation3], 1 }
 0x494   :  { %2356 = vsyncpa [#allocation3 + $0x1], 1 }
 0x495   :  { %2357 = vsyncpa [#allocation4], 1 }
 0x496   :  { %2359 = vsyncpa [#allocation4 + $0x1], 1 }

</bundles_post_ra>
